<compile_context>
chip_gen: v7x
topology: tpu7x:2x2x1
jax: 0.10.0
libtpu: 0.0.40
codegen_flags: <defaults>
</compile_context>

<pallas_src>
import math
import jax
import jax.numpy as jnp
from jax import lax
from jax.experimental import pallas as pl
from jax.experimental.pallas import tpu as pltpu  # noqa: F401  (kept for TPU builds)

# ------------------------- scaled-down configuration -------------------------
B = 2                    # batch
T = 4                    # num_frames            (ViViT: 5  -> 4, even for tubelets)
C = 3                    # rgb channels
H = W = 16               # spatial               (ViViT: 224 -> 16)
TUB_T, TUB_P = 2, 8      # tubelet size          (ViViT: 2x16x16 -> 2x8x8)
D = 64                   # hidden dim            (ViViT: 768 -> 64)
HEADS = 4
DH = D // HEADS
MLP = 4 * D
LAYERS = 3               # num_hidden_layers=3 as in the module
CLASS_NUM = 19
DEC_DIM = 32             # decoder_dim
PIX_PER_PATCH = 16       # pixel_values_per_patch
NT = T // TUB_T
NS = (H // TUB_P) * (W // TUB_P)
NPATCH = NT * NS         # 8   (ViViT: 392)
SEQ = NPATCH + 1         # +cls
TUB_PIX = TUB_T * TUB_P * TUB_P * C
EPS = 1e-6
ATT_SCALE = 1.0 / math.sqrt(DH)


# ----------------------------- in-kernel helpers ------------------------------
def _ln(x, g, b):
    """LayerNorm over last axis, f32 math.  x: (S, D); g, b: (1, D)."""
    mu = jnp.mean(x, axis=-1, keepdims=True)
    xc = x - mu
    var = jnp.mean(xc * xc, axis=-1, keepdims=True)
    return xc * lax.rsqrt(var + EPS) * g + b


def _gelu(x):
    # tanh-approx GELU (ViViT "gelu_fast"-style), f32 math.
    return 0.5 * x * (1.0 + jnp.tanh(0.7978845608028654 * (x + 0.044715 * x * x * x)))


# --------------------------- the single fused kernel ---------------------------
def _fused_vivit_kernel(
    xp_ref,                                   # (B*NPATCH, TUB_PIX) flattened tubelets
    pw_ref, pb_ref, cls_ref, pcls_ref, ppat_ref,   # patch-embed / cls / pos params
    ln1g_ref, ln1b_ref, qkvw_ref, qkvb_ref,   # stacked (LAYERS, ...) transformer params
    outw_ref, outb_ref, ln2g_ref, ln2b_ref,
    m1w_ref, m1b_ref, m2w_ref, m2b_ref,
    lnfg_ref, lnfb_ref,                       # final LN
    out_ref,                                  # (B*SEQ, 2*D) f32: [emb | enc] lane-dense
):
    # ---- tubelet embedding + cls token + positional embedding (register value) ----
    xp = xp_ref[...].astype(jnp.bfloat16)                               # (B*NPATCH, TUB_PIX)
    proj = jnp.dot(xp, pw_ref[...], preferred_element_type=jnp.float32) + pb_ref[...]
    cls_row = cls_ref[...] + pcls_ref[...]                              # (1, D)
    pos_pat = ppat_ref[...]                                             # (NPATCH, D)
    rows = []
    for b in range(B):
        rows.append(cls_row)
        rows.append(proj[b * NPATCH:(b + 1) * NPATCH, :] + pos_pat)
    emb = jnp.concatenate(rows, axis=0)                                 # (B*SEQ, D) f32
    h = emb

    # ---- 3 pre-LN transformer layers, all VMEM/register-resident ----
    for l in range(LAYERS):
        # LN1 fused into QKV matmul (rows of both batch elems together)
        n1 = _ln(h, ln1g_ref[l], ln1b_ref[l])
        qkv = jnp.dot(n1.astype(jnp.bfloat16), qkvw_ref[l],
                      preferred_element_type=jnp.float32) + qkvb_ref[l]  # (B*SEQ, 3D)
        qkv_bf = qkv.astype(jnp.bfloat16)

        # multi-head self attention, per-batch / per-head statically unrolled
        ctx_batches = []
        for b in range(B):
            qkv_b = qkv_bf[b * SEQ:(b + 1) * SEQ, :]                    # (SEQ, 3D) bf16
            heads = []
            for hh in range(HEADS):
                qh = qkv_b[:, hh * DH:(hh + 1) * DH]                    # (SEQ, DH)
                kh = qkv_b[:, D + hh * DH: D + (hh + 1) * DH]
                vh = qkv_b[:, 2 * D + hh * DH: 2 * D + (hh + 1) * DH]
                # q @ k^T without materializing the transpose (bf16 in, f32 acc)
                s = lax.dot_general(qh, kh, (((1,), (1,)), ((), ())),
                                    preferred_element_type=jnp.float32) * ATT_SCALE
                s = s - jnp.max(s, axis=-1, keepdims=True)
                p = jnp.exp(s)
                p = p * pl.reciprocal(jnp.sum(p, axis=-1, keepdims=True), approx=True)
                heads.append(jnp.dot(p.astype(jnp.bfloat16), vh,
                                     preferred_element_type=jnp.float32))
            ctx_batches.append(jnp.concatenate(heads, axis=-1))         # (SEQ, D)
        ctx = jnp.concatenate(ctx_batches, axis=0)                       # (B*SEQ, D)

        # out-proj fused with residual add
        ao = jnp.dot(ctx.astype(jnp.bfloat16), outw_ref[l],
                     preferred_element_type=jnp.float32) + outb_ref[l]
        h = h + ao

        # LN2 fused into MLP, GELU, second residual
        n2 = _ln(h, ln2g_ref[l], ln2b_ref[l])
        m = jnp.dot(n2.astype(jnp.bfloat16), m1w_ref[l],
                    preferred_element_type=jnp.float32) + m1b_ref[l]
        m = _gelu(m)
        m = jnp.dot(m.astype(jnp.bfloat16), m2w_ref[l],
                    preferred_element_type=jnp.float32) + m2b_ref[l]
        h = h + m

    # ---- final layernorm ----
    enc = _ln(h, lnfg_ref[...], lnfb_ref[...])

    # single lane-dense (B*SEQ, 128) unmasked store: [embeddings | encoded]
    out_ref[...] = jnp.concatenate([emb, enc], axis=-1)


# ------------------------------ kernel wrapper --------------------------------
def fused_encoder(params, xp_flat):
    """xp_flat: (B*NPATCH, TUB_PIX) -> (embeddings, encoded) each (B, SEQ, D)."""
    ws = [
        params["patch_w"], params["patch_b"], params["cls"],
        params["pos_cls"], params["pos_patch"],
        params["ln1_g"], params["ln1_b"], params["qkv_w"], params["qkv_b"],
        params["out_w"], params["out_b"], params["ln2_g"], params["ln2_b"],
        params["mlp1_w"], params["mlp1_b"], params["mlp2_w"], params["mlp2_b"],
        params["lnf_g"], params["lnf_b"],
    ]
    out = pl.pallas_call(
        _fused_vivit_kernel,
        out_shape=jax.ShapeDtypeStruct((B * SEQ, 2 * D), jnp.float32),
    )(xp_flat, *ws)
    out = out.reshape(B, SEQ, 2 * D)
    return out[:, :, :D], out[:, :, D:]      # embeddings, encoded


# ------------------------------ parameter setup -------------------------------
def init_params(key):
    keys = iter(jax.random.split(key, 64))

    def w(shape, dtype=jnp.float32, scale=0.02):
        return (jax.random.normal(next(keys), shape, jnp.float32) * scale).astype(dtype)

    z = lambda shape: jnp.zeros(shape, jnp.float32)
    p = {}
    # tubelet Conv3d(stride == kernel) == linear on flattened tubelets
    p["patch_w"] = w((TUB_PIX, D), jnp.bfloat16)
    p["patch_b"] = z((1, D))
    p["cls"] = w((1, D))
    p["pos_cls"] = w((1, D))                 # positional embedding, cls row
    p["pos_patch"] = w((NPATCH, D))          # positional embedding, patch rows
    # stacked per-layer transformer params
    p["ln1_g"] = jnp.ones((LAYERS, 1, D), jnp.float32)
    p["ln1_b"] = z((LAYERS, 1, D))
    p["qkv_w"] = w((LAYERS, D, 3 * D), jnp.bfloat16)
    p["qkv_b"] = z((LAYERS, 1, 3 * D))
    p["out_w"] = w((LAYERS, D, D), jnp.bfloat16)
    p["out_b"] = z((LAYERS, 1, D))
    p["ln2_g"] = jnp.ones((LAYERS, 1, D), jnp.float32)
    p["ln2_b"] = z((LAYERS, 1, D))
    p["mlp1_w"] = w((LAYERS, D, MLP), jnp.bfloat16)
    p["mlp1_b"] = z((LAYERS, 1, MLP))
    p["mlp2_w"] = w((LAYERS, MLP, D), jnp.bfloat16)
    p["mlp2_b"] = z((LAYERS, 1, D))
    p["lnf_g"] = jnp.ones((1, D), jnp.float32)
    p["lnf_b"] = z((1, D))
    # tiny tail projections (plain jnp.dot in the wrapper — too small for a launch)
    p["classifier"] = (w((D, CLASS_NUM)), z((CLASS_NUM,)))
    p["enc_to_dec"] = (w((D, DEC_DIM)), z((DEC_DIM,)))
    p["to_pixels"] = (w((DEC_DIM, PIX_PER_PATCH)), z((PIX_PER_PATCH,)))
    return p


# --------------------------------- the model ----------------------------------
def framework_forward(params, x):
    """x: (B, T, C, H, W) -> {'logits', 'decoer_output', 'encoder_patches'}."""
    b = x.shape[0]
    # tubelet extraction (pure layout glue, no compute)
    xt = x.reshape(b, NT, TUB_T, C, H // TUB_P, TUB_P, W // TUB_P, TUB_P)
    xt = jnp.transpose(xt, (0, 1, 4, 6, 3, 2, 5, 7))          # (B,NT,Hn,Wn,C,tt,p,p)
    xp_flat = xt.reshape(b * NPATCH, TUB_PIX)

    # one fused Pallas launch: embeddings + full 3-layer encoder + final LN
    emb, encoded = fused_encoder(params, xp_flat)              # (B,SEQ,D) x2

    # tail projections: lane-sparse and tiny -> plain XLA dots, with
    # enc_to_dec + to_pixels folded into a single (D, 16) matrix.
    cw, cb = params["classifier"]
    logits = encoded[:, 0, :] @ cw + cb                        # (B, 19)
    ew, eb = params["enc_to_dec"]
    pw, pb = params["to_pixels"]
    w_fold = ew @ pw                                           # (D, 16)
    b_fold = eb @ pw + pb                                      # (16,)
    pred = encoded[:, 1:] @ w_fold + b_fold                    # (B, NPATCH, 16)

    return {
        "logits": logits,
        "decoer_output": pred,                    # (sic) keeping the original key
        "encoder_patches": emb[:, 1:],            # to_patch(x)[:, 1:]
    }


# ------------------------------------ main -------------------------------------
if __name__ == "__main__":
    key = jax.random.PRNGKey(0)
    pkey, xkey = jax.random.split(key)
    params = init_params(pkey)
    x = jax.random.normal(xkey, (B, T, C, H, W), jnp.float32)

    out = jax.jit(framework_forward)(params, x)
    out = jax.tree_util.tree_map(jax.block_until_ready, out)

    assert out["logits"].shape == (B, CLASS_NUM)
    assert out["decoer_output"].shape == (B, NPATCH, PIX_PER_PATCH)
    assert out["encoder_patches"].shape == (B, NPATCH, D)
    assert all(bool(jnp.isfinite(v).all()) for v in out.values())
    print("KERNEL_OK")
</pallas_src>

<mosaic_0001>
module attributes {stable_mosaic.version = 11 : i64} {
  func.func @_fused_vivit_kernel(%arg0: memref<16x384xf32, #tpu.memory_space<vmem>>, %arg1: memref<384x64xbf16, #tpu.memory_space<vmem>>, %arg2: memref<1x64xf32, #tpu.memory_space<vmem>>, %arg3: memref<1x64xf32, #tpu.memory_space<vmem>>, %arg4: memref<1x64xf32, #tpu.memory_space<vmem>>, %arg5: memref<8x64xf32, #tpu.memory_space<vmem>>, %arg6: memref<3x1x64xf32, #tpu.memory_space<vmem>>, %arg7: memref<3x1x64xf32, #tpu.memory_space<vmem>>, %arg8: memref<3x64x192xbf16, #tpu.memory_space<vmem>>, %arg9: memref<3x1x192xf32, #tpu.memory_space<vmem>>, %arg10: memref<3x64x64xbf16, #tpu.memory_space<vmem>>, %arg11: memref<3x1x64xf32, #tpu.memory_space<vmem>>, %arg12: memref<3x1x64xf32, #tpu.memory_space<vmem>>, %arg13: memref<3x1x64xf32, #tpu.memory_space<vmem>>, %arg14: memref<3x64x256xbf16, #tpu.memory_space<vmem>>, %arg15: memref<3x1x256xf32, #tpu.memory_space<vmem>>, %arg16: memref<3x256x64xbf16, #tpu.memory_space<vmem>>, %arg17: memref<3x1x64xf32, #tpu.memory_space<vmem>>, %arg18: memref<1x64xf32, #tpu.memory_space<vmem>>, %arg19: memref<1x64xf32, #tpu.memory_space<vmem>>, %arg20: memref<18x128xf32, #tpu.memory_space<vmem>>) attributes {dimension_semantics = [], scalar_prefetch = 0 : i64, scratch_operands = 0 : i64, tpu.core_type = #tpu.core_type<tc>} {
    %c0 = arith.constant 0 : index
    %c0_0 = arith.constant 0 : index
    %0 = vector.load %arg0[%c0, %c0_0] : memref<16x384xf32, #tpu.memory_space<vmem>>, vector<16x384xf32>
    %1 = arith.truncf %0 : vector<16x384xf32> to vector<16x384xbf16>
    %c0_1 = arith.constant 0 : index
    %c0_2 = arith.constant 0 : index
    %2 = vector.load %arg1[%c0_1, %c0_2] : memref<384x64xbf16, #tpu.memory_space<vmem>>, vector<384x64xbf16>
    %cst = arith.constant dense<0.000000e+00> : vector<16x64xf32>
    %3 = tpu.matmul %1, %2, %cst {dimension_numbers = #tpu.dot_dimension_numbers<[1], [0], [0], [1], [0, 0, 1, 1], [], []>} : vector<16x384xbf16>, vector<384x64xbf16>, vector<16x64xf32> -> vector<16x64xf32>
    %c0_3 = arith.constant 0 : index
    %c0_4 = arith.constant 0 : index
    %4 = vector.load %arg2[%c0_3, %c0_4] : memref<1x64xf32, #tpu.memory_space<vmem>>, vector<1x64xf32>
    %5 = vector.broadcast %4 : vector<1x64xf32> to vector<16x64xf32>
    %6 = arith.addf %3, %5 : vector<16x64xf32>
    %c0_5 = arith.constant 0 : index
    %c0_6 = arith.constant 0 : index
    %7 = vector.load %arg3[%c0_5, %c0_6] : memref<1x64xf32, #tpu.memory_space<vmem>>, vector<1x64xf32>
    %c0_7 = arith.constant 0 : index
    %c0_8 = arith.constant 0 : index
    %8 = vector.load %arg4[%c0_7, %c0_8] : memref<1x64xf32, #tpu.memory_space<vmem>>, vector<1x64xf32>
    %9 = arith.addf %7, %8 : vector<1x64xf32>
    %c0_9 = arith.constant 0 : index
    %c0_10 = arith.constant 0 : index
    %10 = vector.load %arg5[%c0_9, %c0_10] : memref<8x64xf32, #tpu.memory_space<vmem>>, vector<8x64xf32>
    %11 = vector.extract_strided_slice %6 {offsets = [0, 0], sizes = [8, 64], strides = [1, 1]} : vector<16x64xf32> to vector<8x64xf32>
    %12 = arith.addf %11, %10 : vector<8x64xf32>
    %13 = vector.extract_strided_slice %6 {offsets = [8, 0], sizes = [8, 64], strides = [1, 1]} : vector<16x64xf32> to vector<8x64xf32>
    %14 = arith.addf %13, %10 : vector<8x64xf32>
    %15 = tpu.concatenate %9, %12, %9, %14 in 0 : vector<1x64xf32>, vector<8x64xf32>, vector<1x64xf32>, vector<8x64xf32> -> vector<18x64xf32>
    %c0_11 = arith.constant 0 : index
    %c0_12 = arith.constant 0 : index
    %c0_13 = arith.constant 0 : index
    %16 = vector.load %arg6[%c0_11, %c0_12, %c0_13] : memref<3x1x64xf32, #tpu.memory_space<vmem>>, vector<1x1x64xf32>
    %17 = vector.shape_cast %16 : vector<1x1x64xf32> to vector<1x64xf32>
    %c0_14 = arith.constant 0 : index
    %c0_15 = arith.constant 0 : index
    %c0_16 = arith.constant 0 : index
    %18 = vector.load %arg7[%c0_14, %c0_15, %c0_16] : memref<3x1x64xf32, #tpu.memory_space<vmem>>, vector<1x1x64xf32>
    %19 = vector.shape_cast %18 : vector<1x1x64xf32> to vector<1x64xf32>
    %cst_17 = arith.constant dense<0.000000e+00> : vector<18xf32>
    %20 = vector.multi_reduction <add>, %15, %cst_17 [1] : vector<18x64xf32> to vector<18xf32>
    %21 = vector.shape_cast %20 : vector<18xf32> to vector<18x1xf32>
    %cst_18 = arith.constant 6.400000e+01 : f32
    %22 = vector.broadcast %cst_18 : f32 to vector<18x1xf32>
    %23 = arith.divf %21, %22 : vector<18x1xf32>
    %24 = vector.broadcast %23 : vector<18x1xf32> to vector<18x64xf32>
    %25 = arith.subf %15, %24 : vector<18x64xf32>
    %26 = arith.mulf %25, %25 : vector<18x64xf32>
    %cst_19 = arith.constant dense<0.000000e+00> : vector<18xf32>
    %27 = vector.multi_reduction <add>, %26, %cst_19 [1] : vector<18x64xf32> to vector<18xf32>
    %28 = vector.shape_cast %27 : vector<18xf32> to vector<18x1xf32>
    %cst_20 = arith.constant 6.400000e+01 : f32
    %29 = vector.broadcast %cst_20 : f32 to vector<18x1xf32>
    %30 = arith.divf %28, %29 : vector<18x1xf32>
    %cst_21 = arith.constant 9.99999997E-7 : f32
    %31 = vector.broadcast %cst_21 : f32 to vector<18x1xf32>
    %32 = arith.addf %30, %31 : vector<18x1xf32>
    %33 = math.rsqrt %32 : vector<18x1xf32>
    %34 = vector.broadcast %33 : vector<18x1xf32> to vector<18x64xf32>
    %35 = arith.mulf %25, %34 : vector<18x64xf32>
    %36 = vector.broadcast %17 : vector<1x64xf32> to vector<18x64xf32>
    %37 = arith.mulf %35, %36 : vector<18x64xf32>
    %38 = vector.broadcast %19 : vector<1x64xf32> to vector<18x64xf32>
    %39 = arith.addf %37, %38 : vector<18x64xf32>
    %40 = arith.truncf %39 : vector<18x64xf32> to vector<18x64xbf16>
    %c0_22 = arith.constant 0 : index
    %c0_23 = arith.constant 0 : index
    %c0_24 = arith.constant 0 : index
    %41 = vector.load %arg8[%c0_22, %c0_23, %c0_24] : memref<3x64x192xbf16, #tpu.memory_space<vmem>>, vector<1x64x192xbf16>
    %42 = vector.shape_cast %41 : vector<1x64x192xbf16> to vector<64x192xbf16>
    %cst_25 = arith.constant dense<0.000000e+00> : vector<18x192xf32>
    %43 = tpu.matmul %40, %42, %cst_25 {dimension_numbers = #tpu.dot_dimension_numbers<[1], [0], [0], [1], [0, 0, 1, 1], [], []>} : vector<18x64xbf16>, vector<64x192xbf16>, vector<18x192xf32> -> vector<18x192xf32>
    %c0_26 = arith.constant 0 : index
    %c0_27 = arith.constant 0 : index
    %c0_28 = arith.constant 0 : index
    %44 = vector.load %arg9[%c0_26, %c0_27, %c0_28] : memref<3x1x192xf32, #tpu.memory_space<vmem>>, vector<1x1x192xf32>
    %45 = vector.shape_cast %44 : vector<1x1x192xf32> to vector<1x192xf32>
    %46 = vector.broadcast %45 : vector<1x192xf32> to vector<18x192xf32>
    %47 = arith.addf %43, %46 : vector<18x192xf32>
    %48 = arith.truncf %47 : vector<18x192xf32> to vector<18x192xbf16>
    %49 = vector.extract_strided_slice %48 {offsets = [0, 0], sizes = [9, 192], strides = [1, 1]} : vector<18x192xbf16> to vector<9x192xbf16>
    %50 = vector.extract_strided_slice %49 {offsets = [0, 0], sizes = [9, 16], strides = [1, 1]} : vector<9x192xbf16> to vector<9x16xbf16>
    %51 = vector.extract_strided_slice %49 {offsets = [0, 64], sizes = [9, 16], strides = [1, 1]} : vector<9x192xbf16> to vector<9x16xbf16>
    %52 = vector.extract_strided_slice %49 {offsets = [0, 128], sizes = [9, 16], strides = [1, 1]} : vector<9x192xbf16> to vector<9x16xbf16>
    %cst_29 = arith.constant dense<0.000000e+00> : vector<9x9xf32>
    %53 = tpu.matmul %50, %51, %cst_29 {dimension_numbers = #tpu.dot_dimension_numbers<[1], [1], [0], [0], [0, 0, 1, 0], [], []>} : vector<9x16xbf16>, vector<9x16xbf16>, vector<9x9xf32> -> vector<9x9xf32>
    %cst_30 = arith.constant 2.500000e-01 : f32
    %54 = vector.broadcast %cst_30 : f32 to vector<9x9xf32>
    %55 = arith.mulf %53, %54 : vector<9x9xf32>
    %cst_31 = arith.constant dense<0xFF800000> : vector<9xf32>
    %56 = vector.multi_reduction <maximumf>, %55, %cst_31 [1] : vector<9x9xf32> to vector<9xf32>
    %57 = vector.shape_cast %56 : vector<9xf32> to vector<9x1xf32>
    %58 = vector.broadcast %57 : vector<9x1xf32> to vector<9x9xf32>
    %59 = arith.subf %55, %58 : vector<9x9xf32>
    %60 = math.exp %59 : vector<9x9xf32>
    %cst_32 = arith.constant dense<0.000000e+00> : vector<9xf32>
    %61 = vector.multi_reduction <add>, %60, %cst_32 [1] : vector<9x9xf32> to vector<9xf32>
    %62 = vector.shape_cast %61 : vector<9xf32> to vector<9x1xf32>
    %63 = tpu.reciprocal %62 {approx = true} : vector<9x1xf32> -> vector<9x1xf32>
    %64 = vector.broadcast %63 : vector<9x1xf32> to vector<9x9xf32>
    %65 = arith.mulf %60, %64 : vector<9x9xf32>
    %66 = arith.truncf %65 : vector<9x9xf32> to vector<9x9xbf16>
    %cst_33 = arith.constant dense<0.000000e+00> : vector<9x16xf32>
    %67 = tpu.matmul %66, %52, %cst_33 {dimension_numbers = #tpu.dot_dimension_numbers<[1], [0], [0], [1], [0, 0, 1, 1], [], []>} : vector<9x9xbf16>, vector<9x16xbf16>, vector<9x16xf32> -> vector<9x16xf32>
    %68 = vector.extract_strided_slice %49 {offsets = [0, 16], sizes = [9, 16], strides = [1, 1]} : vector<9x192xbf16> to vector<9x16xbf16>
    %69 = vector.extract_strided_slice %49 {offsets = [0, 80], sizes = [9, 16], strides = [1, 1]} : vector<9x192xbf16> to vector<9x16xbf16>
    %70 = vector.extract_strided_slice %49 {offsets = [0, 144], sizes = [9, 16], strides = [1, 1]} : vector<9x192xbf16> to vector<9x16xbf16>
    %cst_34 = arith.constant dense<0.000000e+00> : vector<9x9xf32>
    %71 = tpu.matmul %68, %69, %cst_34 {dimension_numbers = #tpu.dot_dimension_numbers<[1], [1], [0], [0], [0, 0, 1, 0], [], []>} : vector<9x16xbf16>, vector<9x16xbf16>, vector<9x9xf32> -> vector<9x9xf32>
    %cst_35 = arith.constant 2.500000e-01 : f32
    %72 = vector.broadcast %cst_35 : f32 to vector<9x9xf32>
    %73 = arith.mulf %71, %72 : vector<9x9xf32>
    %cst_36 = arith.constant dense<0xFF800000> : vector<9xf32>
    %74 = vector.multi_reduction <maximumf>, %73, %cst_36 [1] : vector<9x9xf32> to vector<9xf32>
    %75 = vector.shape_cast %74 : vector<9xf32> to vector<9x1xf32>
    %76 = vector.broadcast %75 : vector<9x1xf32> to vector<9x9xf32>
    %77 = arith.subf %73, %76 : vector<9x9xf32>
    %78 = math.exp %77 : vector<9x9xf32>
    %cst_37 = arith.constant dense<0.000000e+00> : vector<9xf32>
    %79 = vector.multi_reduction <add>, %78, %cst_37 [1] : vector<9x9xf32> to vector<9xf32>
    %80 = vector.shape_cast %79 : vector<9xf32> to vector<9x1xf32>
    %81 = tpu.reciprocal %80 {approx = true} : vector<9x1xf32> -> vector<9x1xf32>
    %82 = vector.broadcast %81 : vector<9x1xf32> to vector<9x9xf32>
    %83 = arith.mulf %78, %82 : vector<9x9xf32>
    %84 = arith.truncf %83 : vector<9x9xf32> to vector<9x9xbf16>
    %cst_38 = arith.constant dense<0.000000e+00> : vector<9x16xf32>
    %85 = tpu.matmul %84, %70, %cst_38 {dimension_numbers = #tpu.dot_dimension_numbers<[1], [0], [0], [1], [0, 0, 1, 1], [], []>} : vector<9x9xbf16>, vector<9x16xbf16>, vector<9x16xf32> -> vector<9x16xf32>
    %86 = vector.extract_strided_slice %49 {offsets = [0, 32], sizes = [9, 16], strides = [1, 1]} : vector<9x192xbf16> to vector<9x16xbf16>
    %87 = vector.extract_strided_slice %49 {offsets = [0, 96], sizes = [9, 16], strides = [1, 1]} : vector<9x192xbf16> to vector<9x16xbf16>
    %88 = vector.extract_strided_slice %49 {offsets = [0, 160], sizes = [9, 16], strides = [1, 1]} : vector<9x192xbf16> to vector<9x16xbf16>
    %cst_39 = arith.constant dense<0.000000e+00> : vector<9x9xf32>
    %89 = tpu.matmul %86, %87, %cst_39 {dimension_numbers = #tpu.dot_dimension_numbers<[1], [1], [0], [0], [0, 0, 1, 0], [], []>} : vector<9x16xbf16>, vector<9x16xbf16>, vector<9x9xf32> -> vector<9x9xf32>
    %cst_40 = arith.constant 2.500000e-01 : f32
    %90 = vector.broadcast %cst_40 : f32 to vector<9x9xf32>
    %91 = arith.mulf %89, %90 : vector<9x9xf32>
    %cst_41 = arith.constant dense<0xFF800000> : vector<9xf32>
    %92 = vector.multi_reduction <maximumf>, %91, %cst_41 [1] : vector<9x9xf32> to vector<9xf32>
    %93 = vector.shape_cast %92 : vector<9xf32> to vector<9x1xf32>
    %94 = vector.broadcast %93 : vector<9x1xf32> to vector<9x9xf32>
    %95 = arith.subf %91, %94 : vector<9x9xf32>
    %96 = math.exp %95 : vector<9x9xf32>
    %cst_42 = arith.constant dense<0.000000e+00> : vector<9xf32>
    %97 = vector.multi_reduction <add>, %96, %cst_42 [1] : vector<9x9xf32> to vector<9xf32>
    %98 = vector.shape_cast %97 : vector<9xf32> to vector<9x1xf32>
    %99 = tpu.reciprocal %98 {approx = true} : vector<9x1xf32> -> vector<9x1xf32>
    %100 = vector.broadcast %99 : vector<9x1xf32> to vector<9x9xf32>
    %101 = arith.mulf %96, %100 : vector<9x9xf32>
    %102 = arith.truncf %101 : vector<9x9xf32> to vector<9x9xbf16>
    %cst_43 = arith.constant dense<0.000000e+00> : vector<9x16xf32>
    %103 = tpu.matmul %102, %88, %cst_43 {dimension_numbers = #tpu.dot_dimension_numbers<[1], [0], [0], [1], [0, 0, 1, 1], [], []>} : vector<9x9xbf16>, vector<9x16xbf16>, vector<9x16xf32> -> vector<9x16xf32>
    %104 = vector.extract_strided_slice %49 {offsets = [0, 48], sizes = [9, 16], strides = [1, 1]} : vector<9x192xbf16> to vector<9x16xbf16>
    %105 = vector.extract_strided_slice %49 {offsets = [0, 112], sizes = [9, 16], strides = [1, 1]} : vector<9x192xbf16> to vector<9x16xbf16>
    %106 = vector.extract_strided_slice %49 {offsets = [0, 176], sizes = [9, 16], strides = [1, 1]} : vector<9x192xbf16> to vector<9x16xbf16>
    %cst_44 = arith.constant dense<0.000000e+00> : vector<9x9xf32>
    %107 = tpu.matmul %104, %105, %cst_44 {dimension_numbers = #tpu.dot_dimension_numbers<[1], [1], [0], [0], [0, 0, 1, 0], [], []>} : vector<9x16xbf16>, vector<9x16xbf16>, vector<9x9xf32> -> vector<9x9xf32>
    %cst_45 = arith.constant 2.500000e-01 : f32
    %108 = vector.broadcast %cst_45 : f32 to vector<9x9xf32>
    %109 = arith.mulf %107, %108 : vector<9x9xf32>
    %cst_46 = arith.constant dense<0xFF800000> : vector<9xf32>
    %110 = vector.multi_reduction <maximumf>, %109, %cst_46 [1] : vector<9x9xf32> to vector<9xf32>
    %111 = vector.shape_cast %110 : vector<9xf32> to vector<9x1xf32>
    %112 = vector.broadcast %111 : vector<9x1xf32> to vector<9x9xf32>
    %113 = arith.subf %109, %112 : vector<9x9xf32>
    %114 = math.exp %113 : vector<9x9xf32>
    %cst_47 = arith.constant dense<0.000000e+00> : vector<9xf32>
    %115 = vector.multi_reduction <add>, %114, %cst_47 [1] : vector<9x9xf32> to vector<9xf32>
    %116 = vector.shape_cast %115 : vector<9xf32> to vector<9x1xf32>
    %117 = tpu.reciprocal %116 {approx = true} : vector<9x1xf32> -> vector<9x1xf32>
    %118 = vector.broadcast %117 : vector<9x1xf32> to vector<9x9xf32>
    %119 = arith.mulf %114, %118 : vector<9x9xf32>
    %120 = arith.truncf %119 : vector<9x9xf32> to vector<9x9xbf16>
    %cst_48 = arith.constant dense<0.000000e+00> : vector<9x16xf32>
    %121 = tpu.matmul %120, %106, %cst_48 {dimension_numbers = #tpu.dot_dimension_numbers<[1], [0], [0], [1], [0, 0, 1, 1], [], []>} : vector<9x9xbf16>, vector<9x16xbf16>, vector<9x16xf32> -> vector<9x16xf32>
    %122 = tpu.concatenate %67, %85, %103, %121 in 1 : vector<9x16xf32>, vector<9x16xf32>, vector<9x16xf32>, vector<9x16xf32> -> vector<9x64xf32>
    %123 = vector.extract_strided_slice %48 {offsets = [9, 0], sizes = [9, 192], strides = [1, 1]} : vector<18x192xbf16> to vector<9x192xbf16>
    %124 = vector.extract_strided_slice %123 {offsets = [0, 0], sizes = [9, 16], strides = [1, 1]} : vector<9x192xbf16> to vector<9x16xbf16>
    %125 = vector.extract_strided_slice %123 {offsets = [0, 64], sizes = [9, 16], strides = [1, 1]} : vector<9x192xbf16> to vector<9x16xbf16>
    %126 = vector.extract_strided_slice %123 {offsets = [0, 128], sizes = [9, 16], strides = [1, 1]} : vector<9x192xbf16> to vector<9x16xbf16>
    %cst_49 = arith.constant dense<0.000000e+00> : vector<9x9xf32>
    %127 = tpu.matmul %124, %125, %cst_49 {dimension_numbers = #tpu.dot_dimension_numbers<[1], [1], [0], [0], [0, 0, 1, 0], [], []>} : vector<9x16xbf16>, vector<9x16xbf16>, vector<9x9xf32> -> vector<9x9xf32>
    %cst_50 = arith.constant 2.500000e-01 : f32
    %128 = vector.broadcast %cst_50 : f32 to vector<9x9xf32>
    %129 = arith.mulf %127, %128 : vector<9x9xf32>
    %cst_51 = arith.constant dense<0xFF800000> : vector<9xf32>
    %130 = vector.multi_reduction <maximumf>, %129, %cst_51 [1] : vector<9x9xf32> to vector<9xf32>
    %131 = vector.shape_cast %130 : vector<9xf32> to vector<9x1xf32>
    %132 = vector.broadcast %131 : vector<9x1xf32> to vector<9x9xf32>
    %133 = arith.subf %129, %132 : vector<9x9xf32>
    %134 = math.exp %133 : vector<9x9xf32>
    %cst_52 = arith.constant dense<0.000000e+00> : vector<9xf32>
    %135 = vector.multi_reduction <add>, %134, %cst_52 [1] : vector<9x9xf32> to vector<9xf32>
    %136 = vector.shape_cast %135 : vector<9xf32> to vector<9x1xf32>
    %137 = tpu.reciprocal %136 {approx = true} : vector<9x1xf32> -> vector<9x1xf32>
    %138 = vector.broadcast %137 : vector<9x1xf32> to vector<9x9xf32>
    %139 = arith.mulf %134, %138 : vector<9x9xf32>
    %140 = arith.truncf %139 : vector<9x9xf32> to vector<9x9xbf16>
    %cst_53 = arith.constant dense<0.000000e+00> : vector<9x16xf32>
    %141 = tpu.matmul %140, %126, %cst_53 {dimension_numbers = #tpu.dot_dimension_numbers<[1], [0], [0], [1], [0, 0, 1, 1], [], []>} : vector<9x9xbf16>, vector<9x16xbf16>, vector<9x16xf32> -> vector<9x16xf32>
    %142 = vector.extract_strided_slice %123 {offsets = [0, 16], sizes = [9, 16], strides = [1, 1]} : vector<9x192xbf16> to vector<9x16xbf16>
    %143 = vector.extract_strided_slice %123 {offsets = [0, 80], sizes = [9, 16], strides = [1, 1]} : vector<9x192xbf16> to vector<9x16xbf16>
    %144 = vector.extract_strided_slice %123 {offsets = [0, 144], sizes = [9, 16], strides = [1, 1]} : vector<9x192xbf16> to vector<9x16xbf16>
    %cst_54 = arith.constant dense<0.000000e+00> : vector<9x9xf32>
    %145 = tpu.matmul %142, %143, %cst_54 {dimension_numbers = #tpu.dot_dimension_numbers<[1], [1], [0], [0], [0, 0, 1, 0], [], []>} : vector<9x16xbf16>, vector<9x16xbf16>, vector<9x9xf32> -> vector<9x9xf32>
    %cst_55 = arith.constant 2.500000e-01 : f32
    %146 = vector.broadcast %cst_55 : f32 to vector<9x9xf32>
    %147 = arith.mulf %145, %146 : vector<9x9xf32>
    %cst_56 = arith.constant dense<0xFF800000> : vector<9xf32>
    %148 = vector.multi_reduction <maximumf>, %147, %cst_56 [1] : vector<9x9xf32> to vector<9xf32>
    %149 = vector.shape_cast %148 : vector<9xf32> to vector<9x1xf32>
    %150 = vector.broadcast %149 : vector<9x1xf32> to vector<9x9xf32>
    %151 = arith.subf %147, %150 : vector<9x9xf32>
    %152 = math.exp %151 : vector<9x9xf32>
    %cst_57 = arith.constant dense<0.000000e+00> : vector<9xf32>
    %153 = vector.multi_reduction <add>, %152, %cst_57 [1] : vector<9x9xf32> to vector<9xf32>
    %154 = vector.shape_cast %153 : vector<9xf32> to vector<9x1xf32>
    %155 = tpu.reciprocal %154 {approx = true} : vector<9x1xf32> -> vector<9x1xf32>
    %156 = vector.broadcast %155 : vector<9x1xf32> to vector<9x9xf32>
    %157 = arith.mulf %152, %156 : vector<9x9xf32>
    %158 = arith.truncf %157 : vector<9x9xf32> to vector<9x9xbf16>
    %cst_58 = arith.constant dense<0.000000e+00> : vector<9x16xf32>
    %159 = tpu.matmul %158, %144, %cst_58 {dimension_numbers = #tpu.dot_dimension_numbers<[1], [0], [0], [1], [0, 0, 1, 1], [], []>} : vector<9x9xbf16>, vector<9x16xbf16>, vector<9x16xf32> -> vector<9x16xf32>
    %160 = vector.extract_strided_slice %123 {offsets = [0, 32], sizes = [9, 16], strides = [1, 1]} : vector<9x192xbf16> to vector<9x16xbf16>
    %161 = vector.extract_strided_slice %123 {offsets = [0, 96], sizes = [9, 16], strides = [1, 1]} : vector<9x192xbf16> to vector<9x16xbf16>
    %162 = vector.extract_strided_slice %123 {offsets = [0, 160], sizes = [9, 16], strides = [1, 1]} : vector<9x192xbf16> to vector<9x16xbf16>
    %cst_59 = arith.constant dense<0.000000e+00> : vector<9x9xf32>
    %163 = tpu.matmul %160, %161, %cst_59 {dimension_numbers = #tpu.dot_dimension_numbers<[1], [1], [0], [0], [0, 0, 1, 0], [], []>} : vector<9x16xbf16>, vector<9x16xbf16>, vector<9x9xf32> -> vector<9x9xf32>
    %cst_60 = arith.constant 2.500000e-01 : f32
    %164 = vector.broadcast %cst_60 : f32 to vector<9x9xf32>
    %165 = arith.mulf %163, %164 : vector<9x9xf32>
    %cst_61 = arith.constant dense<0xFF800000> : vector<9xf32>
    %166 = vector.multi_reduction <maximumf>, %165, %cst_61 [1] : vector<9x9xf32> to vector<9xf32>
    %167 = vector.shape_cast %166 : vector<9xf32> to vector<9x1xf32>
    %168 = vector.broadcast %167 : vector<9x1xf32> to vector<9x9xf32>
    %169 = arith.subf %165, %168 : vector<9x9xf32>
    %170 = math.exp %169 : vector<9x9xf32>
    %cst_62 = arith.constant dense<0.000000e+00> : vector<9xf32>
    %171 = vector.multi_reduction <add>, %170, %cst_62 [1] : vector<9x9xf32> to vector<9xf32>
    %172 = vector.shape_cast %171 : vector<9xf32> to vector<9x1xf32>
    %173 = tpu.reciprocal %172 {approx = true} : vector<9x1xf32> -> vector<9x1xf32>
    %174 = vector.broadcast %173 : vector<9x1xf32> to vector<9x9xf32>
    %175 = arith.mulf %170, %174 : vector<9x9xf32>
    %176 = arith.truncf %175 : vector<9x9xf32> to vector<9x9xbf16>
    %cst_63 = arith.constant dense<0.000000e+00> : vector<9x16xf32>
    %177 = tpu.matmul %176, %162, %cst_63 {dimension_numbers = #tpu.dot_dimension_numbers<[1], [0], [0], [1], [0, 0, 1, 1], [], []>} : vector<9x9xbf16>, vector<9x16xbf16>, vector<9x16xf32> -> vector<9x16xf32>
    %178 = vector.extract_strided_slice %123 {offsets = [0, 48], sizes = [9, 16], strides = [1, 1]} : vector<9x192xbf16> to vector<9x16xbf16>
    %179 = vector.extract_strided_slice %123 {offsets = [0, 112], sizes = [9, 16], strides = [1, 1]} : vector<9x192xbf16> to vector<9x16xbf16>
    %180 = vector.extract_strided_slice %123 {offsets = [0, 176], sizes = [9, 16], strides = [1, 1]} : vector<9x192xbf16> to vector<9x16xbf16>
    %cst_64 = arith.constant dense<0.000000e+00> : vector<9x9xf32>
    %181 = tpu.matmul %178, %179, %cst_64 {dimension_numbers = #tpu.dot_dimension_numbers<[1], [1], [0], [0], [0, 0, 1, 0], [], []>} : vector<9x16xbf16>, vector<9x16xbf16>, vector<9x9xf32> -> vector<9x9xf32>
    %cst_65 = arith.constant 2.500000e-01 : f32
    %182 = vector.broadcast %cst_65 : f32 to vector<9x9xf32>
    %183 = arith.mulf %181, %182 : vector<9x9xf32>
    %cst_66 = arith.constant dense<0xFF800000> : vector<9xf32>
    %184 = vector.multi_reduction <maximumf>, %183, %cst_66 [1] : vector<9x9xf32> to vector<9xf32>
    %185 = vector.shape_cast %184 : vector<9xf32> to vector<9x1xf32>
    %186 = vector.broadcast %185 : vector<9x1xf32> to vector<9x9xf32>
    %187 = arith.subf %183, %186 : vector<9x9xf32>
    %188 = math.exp %187 : vector<9x9xf32>
    %cst_67 = arith.constant dense<0.000000e+00> : vector<9xf32>
    %189 = vector.multi_reduction <add>, %188, %cst_67 [1] : vector<9x9xf32> to vector<9xf32>
    %190 = vector.shape_cast %189 : vector<9xf32> to vector<9x1xf32>
    %191 = tpu.reciprocal %190 {approx = true} : vector<9x1xf32> -> vector<9x1xf32>
    %192 = vector.broadcast %191 : vector<9x1xf32> to vector<9x9xf32>
    %193 = arith.mulf %188, %192 : vector<9x9xf32>
    %194 = arith.truncf %193 : vector<9x9xf32> to vector<9x9xbf16>
    %cst_68 = arith.constant dense<0.000000e+00> : vector<9x16xf32>
    %195 = tpu.matmul %194, %180, %cst_68 {dimension_numbers = #tpu.dot_dimension_numbers<[1], [0], [0], [1], [0, 0, 1, 1], [], []>} : vector<9x9xbf16>, vector<9x16xbf16>, vector<9x16xf32> -> vector<9x16xf32>
    %196 = tpu.concatenate %141, %159, %177, %195 in 1 : vector<9x16xf32>, vector<9x16xf32>, vector<9x16xf32>, vector<9x16xf32> -> vector<9x64xf32>
    %197 = tpu.concatenate %122, %196 in 0 : vector<9x64xf32>, vector<9x64xf32> -> vector<18x64xf32>
    %198 = arith.truncf %197 : vector<18x64xf32> to vector<18x64xbf16>
    %c0_69 = arith.constant 0 : index
    %c0_70 = arith.constant 0 : index
    %c0_71 = arith.constant 0 : index
    %199 = vector.load %arg10[%c0_69, %c0_70, %c0_71] : memref<3x64x64xbf16, #tpu.memory_space<vmem>>, vector<1x64x64xbf16>
    %200 = vector.shape_cast %199 : vector<1x64x64xbf16> to vector<64x64xbf16>
    %cst_72 = arith.constant dense<0.000000e+00> : vector<18x64xf32>
    %201 = tpu.matmul %198, %200, %cst_72 {dimension_numbers = #tpu.dot_dimension_numbers<[1], [0], [0], [1], [0, 0, 1, 1], [], []>} : vector<18x64xbf16>, vector<64x64xbf16>, vector<18x64xf32> -> vector<18x64xf32>
    %c0_73 = arith.constant 0 : index
    %c0_74 = arith.constant 0 : index
    %c0_75 = arith.constant 0 : index
    %202 = vector.load %arg11[%c0_73, %c0_74, %c0_75] : memref<3x1x64xf32, #tpu.memory_space<vmem>>, vector<1x1x64xf32>
    %203 = vector.shape_cast %202 : vector<1x1x64xf32> to vector<1x64xf32>
    %204 = vector.broadcast %203 : vector<1x64xf32> to vector<18x64xf32>
    %205 = arith.addf %201, %204 : vector<18x64xf32>
    %206 = arith.addf %15, %205 : vector<18x64xf32>
    %c0_76 = arith.constant 0 : index
    %c0_77 = arith.constant 0 : index
    %c0_78 = arith.constant 0 : index
    %207 = vector.load %arg12[%c0_76, %c0_77, %c0_78] : memref<3x1x64xf32, #tpu.memory_space<vmem>>, vector<1x1x64xf32>
    %208 = vector.shape_cast %207 : vector<1x1x64xf32> to vector<1x64xf32>
    %c0_79 = arith.constant 0 : index
    %c0_80 = arith.constant 0 : index
    %c0_81 = arith.constant 0 : index
    %209 = vector.load %arg13[%c0_79, %c0_80, %c0_81] : memref<3x1x64xf32, #tpu.memory_space<vmem>>, vector<1x1x64xf32>
    %210 = vector.shape_cast %209 : vector<1x1x64xf32> to vector<1x64xf32>
    %cst_82 = arith.constant dense<0.000000e+00> : vector<18xf32>
    %211 = vector.multi_reduction <add>, %206, %cst_82 [1] : vector<18x64xf32> to vector<18xf32>
    %212 = vector.shape_cast %211 : vector<18xf32> to vector<18x1xf32>
    %cst_83 = arith.constant 6.400000e+01 : f32
    %213 = vector.broadcast %cst_83 : f32 to vector<18x1xf32>
    %214 = arith.divf %212, %213 : vector<18x1xf32>
    %215 = vector.broadcast %214 : vector<18x1xf32> to vector<18x64xf32>
    %216 = arith.subf %206, %215 : vector<18x64xf32>
    %217 = arith.mulf %216, %216 : vector<18x64xf32>
    %cst_84 = arith.constant dense<0.000000e+00> : vector<18xf32>
    %218 = vector.multi_reduction <add>, %217, %cst_84 [1] : vector<18x64xf32> to vector<18xf32>
    %219 = vector.shape_cast %218 : vector<18xf32> to vector<18x1xf32>
    %cst_85 = arith.constant 6.400000e+01 : f32
    %220 = vector.broadcast %cst_85 : f32 to vector<18x1xf32>
    %221 = arith.divf %219, %220 : vector<18x1xf32>
    %cst_86 = arith.constant 9.99999997E-7 : f32
    %222 = vector.broadcast %cst_86 : f32 to vector<18x1xf32>
    %223 = arith.addf %221, %222 : vector<18x1xf32>
    %224 = math.rsqrt %223 : vector<18x1xf32>
    %225 = vector.broadcast %224 : vector<18x1xf32> to vector<18x64xf32>
    %226 = arith.mulf %216, %225 : vector<18x64xf32>
    %227 = vector.broadcast %208 : vector<1x64xf32> to vector<18x64xf32>
    %228 = arith.mulf %226, %227 : vector<18x64xf32>
    %229 = vector.broadcast %210 : vector<1x64xf32> to vector<18x64xf32>
    %230 = arith.addf %228, %229 : vector<18x64xf32>
    %231 = arith.truncf %230 : vector<18x64xf32> to vector<18x64xbf16>
    %c0_87 = arith.constant 0 : index
    %c0_88 = arith.constant 0 : index
    %c0_89 = arith.constant 0 : index
    %232 = vector.load %arg14[%c0_87, %c0_88, %c0_89] : memref<3x64x256xbf16, #tpu.memory_space<vmem>>, vector<1x64x256xbf16>
    %233 = vector.shape_cast %232 : vector<1x64x256xbf16> to vector<64x256xbf16>
    %cst_90 = arith.constant dense<0.000000e+00> : vector<18x256xf32>
    %234 = tpu.matmul %231, %233, %cst_90 {dimension_numbers = #tpu.dot_dimension_numbers<[1], [0], [0], [1], [0, 0, 1, 1], [], []>} : vector<18x64xbf16>, vector<64x256xbf16>, vector<18x256xf32> -> vector<18x256xf32>
    %c0_91 = arith.constant 0 : index
    %c0_92 = arith.constant 0 : index
    %c0_93 = arith.constant 0 : index
    %235 = vector.load %arg15[%c0_91, %c0_92, %c0_93] : memref<3x1x256xf32, #tpu.memory_space<vmem>>, vector<1x1x256xf32>
    %236 = vector.shape_cast %235 : vector<1x1x256xf32> to vector<1x256xf32>
    %237 = vector.broadcast %236 : vector<1x256xf32> to vector<18x256xf32>
    %238 = arith.addf %234, %237 : vector<18x256xf32>
    %cst_94 = arith.constant 5.000000e-01 : f32
    %239 = vector.broadcast %cst_94 : f32 to vector<18x256xf32>
    %240 = arith.mulf %239, %238 : vector<18x256xf32>
    %cst_95 = arith.constant 4.471500e-02 : f32
    %241 = vector.broadcast %cst_95 : f32 to vector<18x256xf32>
    %242 = arith.mulf %241, %238 : vector<18x256xf32>
    %243 = arith.mulf %242, %238 : vector<18x256xf32>
    %244 = arith.mulf %243, %238 : vector<18x256xf32>
    %245 = arith.addf %238, %244 : vector<18x256xf32>
    %cst_96 = arith.constant 0.797884583 : f32
    %246 = vector.broadcast %cst_96 : f32 to vector<18x256xf32>
    %247 = arith.mulf %246, %245 : vector<18x256xf32>
    %248 = math.tanh %247 : vector<18x256xf32>
    %cst_97 = arith.constant 1.000000e+00 : f32
    %249 = vector.broadcast %cst_97 : f32 to vector<18x256xf32>
    %250 = arith.addf %249, %248 : vector<18x256xf32>
    %251 = arith.mulf %240, %250 : vector<18x256xf32>
    %252 = arith.truncf %251 : vector<18x256xf32> to vector<18x256xbf16>
    %c0_98 = arith.constant 0 : index
    %c0_99 = arith.constant 0 : index
    %c0_100 = arith.constant 0 : index
    %253 = vector.load %arg16[%c0_98, %c0_99, %c0_100] : memref<3x256x64xbf16, #tpu.memory_space<vmem>>, vector<1x256x64xbf16>
    %254 = vector.shape_cast %253 : vector<1x256x64xbf16> to vector<256x64xbf16>
    %cst_101 = arith.constant dense<0.000000e+00> : vector<18x64xf32>
    %255 = tpu.matmul %252, %254, %cst_101 {dimension_numbers = #tpu.dot_dimension_numbers<[1], [0], [0], [1], [0, 0, 1, 1], [], []>} : vector<18x256xbf16>, vector<256x64xbf16>, vector<18x64xf32> -> vector<18x64xf32>
    %c0_102 = arith.constant 0 : index
    %c0_103 = arith.constant 0 : index
    %c0_104 = arith.constant 0 : index
    %256 = vector.load %arg17[%c0_102, %c0_103, %c0_104] : memref<3x1x64xf32, #tpu.memory_space<vmem>>, vector<1x1x64xf32>
    %257 = vector.shape_cast %256 : vector<1x1x64xf32> to vector<1x64xf32>
    %258 = vector.broadcast %257 : vector<1x64xf32> to vector<18x64xf32>
    %259 = arith.addf %255, %258 : vector<18x64xf32>
    %260 = arith.addf %206, %259 : vector<18x64xf32>
    %c1 = arith.constant 1 : index
    %c0_105 = arith.constant 0 : index
    %c0_106 = arith.constant 0 : index
    %261 = vector.load %arg6[%c1, %c0_105, %c0_106] : memref<3x1x64xf32, #tpu.memory_space<vmem>>, vector<1x1x64xf32>
    %262 = vector.shape_cast %261 : vector<1x1x64xf32> to vector<1x64xf32>
    %c1_107 = arith.constant 1 : index
    %c0_108 = arith.constant 0 : index
    %c0_109 = arith.constant 0 : index
    %263 = vector.load %arg7[%c1_107, %c0_108, %c0_109] : memref<3x1x64xf32, #tpu.memory_space<vmem>>, vector<1x1x64xf32>
    %264 = vector.shape_cast %263 : vector<1x1x64xf32> to vector<1x64xf32>
    %cst_110 = arith.constant dense<0.000000e+00> : vector<18xf32>
    %265 = vector.multi_reduction <add>, %260, %cst_110 [1] : vector<18x64xf32> to vector<18xf32>
    %266 = vector.shape_cast %265 : vector<18xf32> to vector<18x1xf32>
    %cst_111 = arith.constant 6.400000e+01 : f32
    %267 = vector.broadcast %cst_111 : f32 to vector<18x1xf32>
    %268 = arith.divf %266, %267 : vector<18x1xf32>
    %269 = vector.broadcast %268 : vector<18x1xf32> to vector<18x64xf32>
    %270 = arith.subf %260, %269 : vector<18x64xf32>
    %271 = arith.mulf %270, %270 : vector<18x64xf32>
    %cst_112 = arith.constant dense<0.000000e+00> : vector<18xf32>
    %272 = vector.multi_reduction <add>, %271, %cst_112 [1] : vector<18x64xf32> to vector<18xf32>
    %273 = vector.shape_cast %272 : vector<18xf32> to vector<18x1xf32>
    %cst_113 = arith.constant 6.400000e+01 : f32
    %274 = vector.broadcast %cst_113 : f32 to vector<18x1xf32>
    %275 = arith.divf %273, %274 : vector<18x1xf32>
    %cst_114 = arith.constant 9.99999997E-7 : f32
    %276 = vector.broadcast %cst_114 : f32 to vector<18x1xf32>
    %277 = arith.addf %275, %276 : vector<18x1xf32>
    %278 = math.rsqrt %277 : vector<18x1xf32>
    %279 = vector.broadcast %278 : vector<18x1xf32> to vector<18x64xf32>
    %280 = arith.mulf %270, %279 : vector<18x64xf32>
    %281 = vector.broadcast %262 : vector<1x64xf32> to vector<18x64xf32>
    %282 = arith.mulf %280, %281 : vector<18x64xf32>
    %283 = vector.broadcast %264 : vector<1x64xf32> to vector<18x64xf32>
    %284 = arith.addf %282, %283 : vector<18x64xf32>
    %285 = arith.truncf %284 : vector<18x64xf32> to vector<18x64xbf16>
    %c1_115 = arith.constant 1 : index
    %c0_116 = arith.constant 0 : index
    %c0_117 = arith.constant 0 : index
    %286 = vector.load %arg8[%c1_115, %c0_116, %c0_117] : memref<3x64x192xbf16, #tpu.memory_space<vmem>>, vector<1x64x192xbf16>
    %287 = vector.shape_cast %286 : vector<1x64x192xbf16> to vector<64x192xbf16>
    %cst_118 = arith.constant dense<0.000000e+00> : vector<18x192xf32>
    %288 = tpu.matmul %285, %287, %cst_118 {dimension_numbers = #tpu.dot_dimension_numbers<[1], [0], [0], [1], [0, 0, 1, 1], [], []>} : vector<18x64xbf16>, vector<64x192xbf16>, vector<18x192xf32> -> vector<18x192xf32>
    %c1_119 = arith.constant 1 : index
    %c0_120 = arith.constant 0 : index
    %c0_121 = arith.constant 0 : index
    %289 = vector.load %arg9[%c1_119, %c0_120, %c0_121] : memref<3x1x192xf32, #tpu.memory_space<vmem>>, vector<1x1x192xf32>
    %290 = vector.shape_cast %289 : vector<1x1x192xf32> to vector<1x192xf32>
    %291 = vector.broadcast %290 : vector<1x192xf32> to vector<18x192xf32>
    %292 = arith.addf %288, %291 : vector<18x192xf32>
    %293 = arith.truncf %292 : vector<18x192xf32> to vector<18x192xbf16>
    %294 = vector.extract_strided_slice %293 {offsets = [0, 0], sizes = [9, 192], strides = [1, 1]} : vector<18x192xbf16> to vector<9x192xbf16>
    %295 = vector.extract_strided_slice %294 {offsets = [0, 0], sizes = [9, 16], strides = [1, 1]} : vector<9x192xbf16> to vector<9x16xbf16>
    %296 = vector.extract_strided_slice %294 {offsets = [0, 64], sizes = [9, 16], strides = [1, 1]} : vector<9x192xbf16> to vector<9x16xbf16>
    %297 = vector.extract_strided_slice %294 {offsets = [0, 128], sizes = [9, 16], strides = [1, 1]} : vector<9x192xbf16> to vector<9x16xbf16>
    %cst_122 = arith.constant dense<0.000000e+00> : vector<9x9xf32>
    %298 = tpu.matmul %295, %296, %cst_122 {dimension_numbers = #tpu.dot_dimension_numbers<[1], [1], [0], [0], [0, 0, 1, 0], [], []>} : vector<9x16xbf16>, vector<9x16xbf16>, vector<9x9xf32> -> vector<9x9xf32>
    %cst_123 = arith.constant 2.500000e-01 : f32
    %299 = vector.broadcast %cst_123 : f32 to vector<9x9xf32>
    %300 = arith.mulf %298, %299 : vector<9x9xf32>
    %cst_124 = arith.constant dense<0xFF800000> : vector<9xf32>
    %301 = vector.multi_reduction <maximumf>, %300, %cst_124 [1] : vector<9x9xf32> to vector<9xf32>
    %302 = vector.shape_cast %301 : vector<9xf32> to vector<9x1xf32>
    %303 = vector.broadcast %302 : vector<9x1xf32> to vector<9x9xf32>
    %304 = arith.subf %300, %303 : vector<9x9xf32>
    %305 = math.exp %304 : vector<9x9xf32>
    %cst_125 = arith.constant dense<0.000000e+00> : vector<9xf32>
    %306 = vector.multi_reduction <add>, %305, %cst_125 [1] : vector<9x9xf32> to vector<9xf32>
    %307 = vector.shape_cast %306 : vector<9xf32> to vector<9x1xf32>
    %308 = tpu.reciprocal %307 {approx = true} : vector<9x1xf32> -> vector<9x1xf32>
    %309 = vector.broadcast %308 : vector<9x1xf32> to vector<9x9xf32>
    %310 = arith.mulf %305, %309 : vector<9x9xf32>
    %311 = arith.truncf %310 : vector<9x9xf32> to vector<9x9xbf16>
    %cst_126 = arith.constant dense<0.000000e+00> : vector<9x16xf32>
    %312 = tpu.matmul %311, %297, %cst_126 {dimension_numbers = #tpu.dot_dimension_numbers<[1], [0], [0], [1], [0, 0, 1, 1], [], []>} : vector<9x9xbf16>, vector<9x16xbf16>, vector<9x16xf32> -> vector<9x16xf32>
    %313 = vector.extract_strided_slice %294 {offsets = [0, 16], sizes = [9, 16], strides = [1, 1]} : vector<9x192xbf16> to vector<9x16xbf16>
    %314 = vector.extract_strided_slice %294 {offsets = [0, 80], sizes = [9, 16], strides = [1, 1]} : vector<9x192xbf16> to vector<9x16xbf16>
    %315 = vector.extract_strided_slice %294 {offsets = [0, 144], sizes = [9, 16], strides = [1, 1]} : vector<9x192xbf16> to vector<9x16xbf16>
    %cst_127 = arith.constant dense<0.000000e+00> : vector<9x9xf32>
    %316 = tpu.matmul %313, %314, %cst_127 {dimension_numbers = #tpu.dot_dimension_numbers<[1], [1], [0], [0], [0, 0, 1, 0], [], []>} : vector<9x16xbf16>, vector<9x16xbf16>, vector<9x9xf32> -> vector<9x9xf32>
    %cst_128 = arith.constant 2.500000e-01 : f32
    %317 = vector.broadcast %cst_128 : f32 to vector<9x9xf32>
    %318 = arith.mulf %316, %317 : vector<9x9xf32>
    %cst_129 = arith.constant dense<0xFF800000> : vector<9xf32>
    %319 = vector.multi_reduction <maximumf>, %318, %cst_129 [1] : vector<9x9xf32> to vector<9xf32>
    %320 = vector.shape_cast %319 : vector<9xf32> to vector<9x1xf32>
    %321 = vector.broadcast %320 : vector<9x1xf32> to vector<9x9xf32>
    %322 = arith.subf %318, %321 : vector<9x9xf32>
    %323 = math.exp %322 : vector<9x9xf32>
    %cst_130 = arith.constant dense<0.000000e+00> : vector<9xf32>
    %324 = vector.multi_reduction <add>, %323, %cst_130 [1] : vector<9x9xf32> to vector<9xf32>
    %325 = vector.shape_cast %324 : vector<9xf32> to vector<9x1xf32>
    %326 = tpu.reciprocal %325 {approx = true} : vector<9x1xf32> -> vector<9x1xf32>
    %327 = vector.broadcast %326 : vector<9x1xf32> to vector<9x9xf32>
    %328 = arith.mulf %323, %327 : vector<9x9xf32>
    %329 = arith.truncf %328 : vector<9x9xf32> to vector<9x9xbf16>
    %cst_131 = arith.constant dense<0.000000e+00> : vector<9x16xf32>
    %330 = tpu.matmul %329, %315, %cst_131 {dimension_numbers = #tpu.dot_dimension_numbers<[1], [0], [0], [1], [0, 0, 1, 1], [], []>} : vector<9x9xbf16>, vector<9x16xbf16>, vector<9x16xf32> -> vector<9x16xf32>
    %331 = vector.extract_strided_slice %294 {offsets = [0, 32], sizes = [9, 16], strides = [1, 1]} : vector<9x192xbf16> to vector<9x16xbf16>
    %332 = vector.extract_strided_slice %294 {offsets = [0, 96], sizes = [9, 16], strides = [1, 1]} : vector<9x192xbf16> to vector<9x16xbf16>
    %333 = vector.extract_strided_slice %294 {offsets = [0, 160], sizes = [9, 16], strides = [1, 1]} : vector<9x192xbf16> to vector<9x16xbf16>
    %cst_132 = arith.constant dense<0.000000e+00> : vector<9x9xf32>
    %334 = tpu.matmul %331, %332, %cst_132 {dimension_numbers = #tpu.dot_dimension_numbers<[1], [1], [0], [0], [0, 0, 1, 0], [], []>} : vector<9x16xbf16>, vector<9x16xbf16>, vector<9x9xf32> -> vector<9x9xf32>
    %cst_133 = arith.constant 2.500000e-01 : f32
    %335 = vector.broadcast %cst_133 : f32 to vector<9x9xf32>
    %336 = arith.mulf %334, %335 : vector<9x9xf32>
    %cst_134 = arith.constant dense<0xFF800000> : vector<9xf32>
    %337 = vector.multi_reduction <maximumf>, %336, %cst_134 [1] : vector<9x9xf32> to vector<9xf32>
    %338 = vector.shape_cast %337 : vector<9xf32> to vector<9x1xf32>
    %339 = vector.broadcast %338 : vector<9x1xf32> to vector<9x9xf32>
    %340 = arith.subf %336, %339 : vector<9x9xf32>
    %341 = math.exp %340 : vector<9x9xf32>
    %cst_135 = arith.constant dense<0.000000e+00> : vector<9xf32>
    %342 = vector.multi_reduction <add>, %341, %cst_135 [1] : vector<9x9xf32> to vector<9xf32>
    %343 = vector.shape_cast %342 : vector<9xf32> to vector<9x1xf32>
    %344 = tpu.reciprocal %343 {approx = true} : vector<9x1xf32> -> vector<9x1xf32>
    %345 = vector.broadcast %344 : vector<9x1xf32> to vector<9x9xf32>
    %346 = arith.mulf %341, %345 : vector<9x9xf32>
    %347 = arith.truncf %346 : vector<9x9xf32> to vector<9x9xbf16>
    %cst_136 = arith.constant dense<0.000000e+00> : vector<9x16xf32>
    %348 = tpu.matmul %347, %333, %cst_136 {dimension_numbers = #tpu.dot_dimension_numbers<[1], [0], [0], [1], [0, 0, 1, 1], [], []>} : vector<9x9xbf16>, vector<9x16xbf16>, vector<9x16xf32> -> vector<9x16xf32>
    %349 = vector.extract_strided_slice %294 {offsets = [0, 48], sizes = [9, 16], strides = [1, 1]} : vector<9x192xbf16> to vector<9x16xbf16>
    %350 = vector.extract_strided_slice %294 {offsets = [0, 112], sizes = [9, 16], strides = [1, 1]} : vector<9x192xbf16> to vector<9x16xbf16>
    %351 = vector.extract_strided_slice %294 {offsets = [0, 176], sizes = [9, 16], strides = [1, 1]} : vector<9x192xbf16> to vector<9x16xbf16>
    %cst_137 = arith.constant dense<0.000000e+00> : vector<9x9xf32>
    %352 = tpu.matmul %349, %350, %cst_137 {dimension_numbers = #tpu.dot_dimension_numbers<[1], [1], [0], [0], [0, 0, 1, 0], [], []>} : vector<9x16xbf16>, vector<9x16xbf16>, vector<9x9xf32> -> vector<9x9xf32>
    %cst_138 = arith.constant 2.500000e-01 : f32
    %353 = vector.broadcast %cst_138 : f32 to vector<9x9xf32>
    %354 = arith.mulf %352, %353 : vector<9x9xf32>
    %cst_139 = arith.constant dense<0xFF800000> : vector<9xf32>
    %355 = vector.multi_reduction <maximumf>, %354, %cst_139 [1] : vector<9x9xf32> to vector<9xf32>
    %356 = vector.shape_cast %355 : vector<9xf32> to vector<9x1xf32>
    %357 = vector.broadcast %356 : vector<9x1xf32> to vector<9x9xf32>
    %358 = arith.subf %354, %357 : vector<9x9xf32>
    %359 = math.exp %358 : vector<9x9xf32>
    %cst_140 = arith.constant dense<0.000000e+00> : vector<9xf32>
    %360 = vector.multi_reduction <add>, %359, %cst_140 [1] : vector<9x9xf32> to vector<9xf32>
    %361 = vector.shape_cast %360 : vector<9xf32> to vector<9x1xf32>
    %362 = tpu.reciprocal %361 {approx = true} : vector<9x1xf32> -> vector<9x1xf32>
    %363 = vector.broadcast %362 : vector<9x1xf32> to vector<9x9xf32>
    %364 = arith.mulf %359, %363 : vector<9x9xf32>
    %365 = arith.truncf %364 : vector<9x9xf32> to vector<9x9xbf16>
    %cst_141 = arith.constant dense<0.000000e+00> : vector<9x16xf32>
    %366 = tpu.matmul %365, %351, %cst_141 {dimension_numbers = #tpu.dot_dimension_numbers<[1], [0], [0], [1], [0, 0, 1, 1], [], []>} : vector<9x9xbf16>, vector<9x16xbf16>, vector<9x16xf32> -> vector<9x16xf32>
    %367 = tpu.concatenate %312, %330, %348, %366 in 1 : vector<9x16xf32>, vector<9x16xf32>, vector<9x16xf32>, vector<9x16xf32> -> vector<9x64xf32>
    %368 = vector.extract_strided_slice %293 {offsets = [9, 0], sizes = [9, 192], strides = [1, 1]} : vector<18x192xbf16> to vector<9x192xbf16>
    %369 = vector.extract_strided_slice %368 {offsets = [0, 0], sizes = [9, 16], strides = [1, 1]} : vector<9x192xbf16> to vector<9x16xbf16>
    %370 = vector.extract_strided_slice %368 {offsets = [0, 64], sizes = [9, 16], strides = [1, 1]} : vector<9x192xbf16> to vector<9x16xbf16>
    %371 = vector.extract_strided_slice %368 {offsets = [0, 128], sizes = [9, 16], strides = [1, 1]} : vector<9x192xbf16> to vector<9x16xbf16>
    %cst_142 = arith.constant dense<0.000000e+00> : vector<9x9xf32>
    %372 = tpu.matmul %369, %370, %cst_142 {dimension_numbers = #tpu.dot_dimension_numbers<[1], [1], [0], [0], [0, 0, 1, 0], [], []>} : vector<9x16xbf16>, vector<9x16xbf16>, vector<9x9xf32> -> vector<9x9xf32>
    %cst_143 = arith.constant 2.500000e-01 : f32
    %373 = vector.broadcast %cst_143 : f32 to vector<9x9xf32>
    %374 = arith.mulf %372, %373 : vector<9x9xf32>
    %cst_144 = arith.constant dense<0xFF800000> : vector<9xf32>
    %375 = vector.multi_reduction <maximumf>, %374, %cst_144 [1] : vector<9x9xf32> to vector<9xf32>
    %376 = vector.shape_cast %375 : vector<9xf32> to vector<9x1xf32>
    %377 = vector.broadcast %376 : vector<9x1xf32> to vector<9x9xf32>
    %378 = arith.subf %374, %377 : vector<9x9xf32>
    %379 = math.exp %378 : vector<9x9xf32>
    %cst_145 = arith.constant dense<0.000000e+00> : vector<9xf32>
    %380 = vector.multi_reduction <add>, %379, %cst_145 [1] : vector<9x9xf32> to vector<9xf32>
    %381 = vector.shape_cast %380 : vector<9xf32> to vector<9x1xf32>
    %382 = tpu.reciprocal %381 {approx = true} : vector<9x1xf32> -> vector<9x1xf32>
    %383 = vector.broadcast %382 : vector<9x1xf32> to vector<9x9xf32>
    %384 = arith.mulf %379, %383 : vector<9x9xf32>
    %385 = arith.truncf %384 : vector<9x9xf32> to vector<9x9xbf16>
    %cst_146 = arith.constant dense<0.000000e+00> : vector<9x16xf32>
    %386 = tpu.matmul %385, %371, %cst_146 {dimension_numbers = #tpu.dot_dimension_numbers<[1], [0], [0], [1], [0, 0, 1, 1], [], []>} : vector<9x9xbf16>, vector<9x16xbf16>, vector<9x16xf32> -> vector<9x16xf32>
    %387 = vector.extract_strided_slice %368 {offsets = [0, 16], sizes = [9, 16], strides = [1, 1]} : vector<9x192xbf16> to vector<9x16xbf16>
    %388 = vector.extract_strided_slice %368 {offsets = [0, 80], sizes = [9, 16], strides = [1, 1]} : vector<9x192xbf16> to vector<9x16xbf16>
    %389 = vector.extract_strided_slice %368 {offsets = [0, 144], sizes = [9, 16], strides = [1, 1]} : vector<9x192xbf16> to vector<9x16xbf16>
    %cst_147 = arith.constant dense<0.000000e+00> : vector<9x9xf32>
    %390 = tpu.matmul %387, %388, %cst_147 {dimension_numbers = #tpu.dot_dimension_numbers<[1], [1], [0], [0], [0, 0, 1, 0], [], []>} : vector<9x16xbf16>, vector<9x16xbf16>, vector<9x9xf32> -> vector<9x9xf32>
    %cst_148 = arith.constant 2.500000e-01 : f32
    %391 = vector.broadcast %cst_148 : f32 to vector<9x9xf32>
    %392 = arith.mulf %390, %391 : vector<9x9xf32>
    %cst_149 = arith.constant dense<0xFF800000> : vector<9xf32>
    %393 = vector.multi_reduction <maximumf>, %392, %cst_149 [1] : vector<9x9xf32> to vector<9xf32>
    %394 = vector.shape_cast %393 : vector<9xf32> to vector<9x1xf32>
    %395 = vector.broadcast %394 : vector<9x1xf32> to vector<9x9xf32>
    %396 = arith.subf %392, %395 : vector<9x9xf32>
    %397 = math.exp %396 : vector<9x9xf32>
    %cst_150 = arith.constant dense<0.000000e+00> : vector<9xf32>
    %398 = vector.multi_reduction <add>, %397, %cst_150 [1] : vector<9x9xf32> to vector<9xf32>
    %399 = vector.shape_cast %398 : vector<9xf32> to vector<9x1xf32>
    %400 = tpu.reciprocal %399 {approx = true} : vector<9x1xf32> -> vector<9x1xf32>
    %401 = vector.broadcast %400 : vector<9x1xf32> to vector<9x9xf32>
    %402 = arith.mulf %397, %401 : vector<9x9xf32>
    %403 = arith.truncf %402 : vector<9x9xf32> to vector<9x9xbf16>
    %cst_151 = arith.constant dense<0.000000e+00> : vector<9x16xf32>
    %404 = tpu.matmul %403, %389, %cst_151 {dimension_numbers = #tpu.dot_dimension_numbers<[1], [0], [0], [1], [0, 0, 1, 1], [], []>} : vector<9x9xbf16>, vector<9x16xbf16>, vector<9x16xf32> -> vector<9x16xf32>
    %405 = vector.extract_strided_slice %368 {offsets = [0, 32], sizes = [9, 16], strides = [1, 1]} : vector<9x192xbf16> to vector<9x16xbf16>
    %406 = vector.extract_strided_slice %368 {offsets = [0, 96], sizes = [9, 16], strides = [1, 1]} : vector<9x192xbf16> to vector<9x16xbf16>
    %407 = vector.extract_strided_slice %368 {offsets = [0, 160], sizes = [9, 16], strides = [1, 1]} : vector<9x192xbf16> to vector<9x16xbf16>
    %cst_152 = arith.constant dense<0.000000e+00> : vector<9x9xf32>
    %408 = tpu.matmul %405, %406, %cst_152 {dimension_numbers = #tpu.dot_dimension_numbers<[1], [1], [0], [0], [0, 0, 1, 0], [], []>} : vector<9x16xbf16>, vector<9x16xbf16>, vector<9x9xf32> -> vector<9x9xf32>
    %cst_153 = arith.constant 2.500000e-01 : f32
    %409 = vector.broadcast %cst_153 : f32 to vector<9x9xf32>
    %410 = arith.mulf %408, %409 : vector<9x9xf32>
    %cst_154 = arith.constant dense<0xFF800000> : vector<9xf32>
    %411 = vector.multi_reduction <maximumf>, %410, %cst_154 [1] : vector<9x9xf32> to vector<9xf32>
    %412 = vector.shape_cast %411 : vector<9xf32> to vector<9x1xf32>
    %413 = vector.broadcast %412 : vector<9x1xf32> to vector<9x9xf32>
    %414 = arith.subf %410, %413 : vector<9x9xf32>
    %415 = math.exp %414 : vector<9x9xf32>
    %cst_155 = arith.constant dense<0.000000e+00> : vector<9xf32>
    %416 = vector.multi_reduction <add>, %415, %cst_155 [1] : vector<9x9xf32> to vector<9xf32>
    %417 = vector.shape_cast %416 : vector<9xf32> to vector<9x1xf32>
    %418 = tpu.reciprocal %417 {approx = true} : vector<9x1xf32> -> vector<9x1xf32>
    %419 = vector.broadcast %418 : vector<9x1xf32> to vector<9x9xf32>
    %420 = arith.mulf %415, %419 : vector<9x9xf32>
    %421 = arith.truncf %420 : vector<9x9xf32> to vector<9x9xbf16>
    %cst_156 = arith.constant dense<0.000000e+00> : vector<9x16xf32>
    %422 = tpu.matmul %421, %407, %cst_156 {dimension_numbers = #tpu.dot_dimension_numbers<[1], [0], [0], [1], [0, 0, 1, 1], [], []>} : vector<9x9xbf16>, vector<9x16xbf16>, vector<9x16xf32> -> vector<9x16xf32>
    %423 = vector.extract_strided_slice %368 {offsets = [0, 48], sizes = [9, 16], strides = [1, 1]} : vector<9x192xbf16> to vector<9x16xbf16>
    %424 = vector.extract_strided_slice %368 {offsets = [0, 112], sizes = [9, 16], strides = [1, 1]} : vector<9x192xbf16> to vector<9x16xbf16>
    %425 = vector.extract_strided_slice %368 {offsets = [0, 176], sizes = [9, 16], strides = [1, 1]} : vector<9x192xbf16> to vector<9x16xbf16>
    %cst_157 = arith.constant dense<0.000000e+00> : vector<9x9xf32>
    %426 = tpu.matmul %423, %424, %cst_157 {dimension_numbers = #tpu.dot_dimension_numbers<[1], [1], [0], [0], [0, 0, 1, 0], [], []>} : vector<9x16xbf16>, vector<9x16xbf16>, vector<9x9xf32> -> vector<9x9xf32>
    %cst_158 = arith.constant 2.500000e-01 : f32
    %427 = vector.broadcast %cst_158 : f32 to vector<9x9xf32>
    %428 = arith.mulf %426, %427 : vector<9x9xf32>
    %cst_159 = arith.constant dense<0xFF800000> : vector<9xf32>
    %429 = vector.multi_reduction <maximumf>, %428, %cst_159 [1] : vector<9x9xf32> to vector<9xf32>
    %430 = vector.shape_cast %429 : vector<9xf32> to vector<9x1xf32>
    %431 = vector.broadcast %430 : vector<9x1xf32> to vector<9x9xf32>
    %432 = arith.subf %428, %431 : vector<9x9xf32>
    %433 = math.exp %432 : vector<9x9xf32>
    %cst_160 = arith.constant dense<0.000000e+00> : vector<9xf32>
    %434 = vector.multi_reduction <add>, %433, %cst_160 [1] : vector<9x9xf32> to vector<9xf32>
    %435 = vector.shape_cast %434 : vector<9xf32> to vector<9x1xf32>
    %436 = tpu.reciprocal %435 {approx = true} : vector<9x1xf32> -> vector<9x1xf32>
    %437 = vector.broadcast %436 : vector<9x1xf32> to vector<9x9xf32>
    %438 = arith.mulf %433, %437 : vector<9x9xf32>
    %439 = arith.truncf %438 : vector<9x9xf32> to vector<9x9xbf16>
    %cst_161 = arith.constant dense<0.000000e+00> : vector<9x16xf32>
    %440 = tpu.matmul %439, %425, %cst_161 {dimension_numbers = #tpu.dot_dimension_numbers<[1], [0], [0], [1], [0, 0, 1, 1], [], []>} : vector<9x9xbf16>, vector<9x16xbf16>, vector<9x16xf32> -> vector<9x16xf32>
    %441 = tpu.concatenate %386, %404, %422, %440 in 1 : vector<9x16xf32>, vector<9x16xf32>, vector<9x16xf32>, vector<9x16xf32> -> vector<9x64xf32>
    %442 = tpu.concatenate %367, %441 in 0 : vector<9x64xf32>, vector<9x64xf32> -> vector<18x64xf32>
    %443 = arith.truncf %442 : vector<18x64xf32> to vector<18x64xbf16>
    %c1_162 = arith.constant 1 : index
    %c0_163 = arith.constant 0 : index
    %c0_164 = arith.constant 0 : index
    %444 = vector.load %arg10[%c1_162, %c0_163, %c0_164] : memref<3x64x64xbf16, #tpu.memory_space<vmem>>, vector<1x64x64xbf16>
    %445 = vector.shape_cast %444 : vector<1x64x64xbf16> to vector<64x64xbf16>
    %cst_165 = arith.constant dense<0.000000e+00> : vector<18x64xf32>
    %446 = tpu.matmul %443, %445, %cst_165 {dimension_numbers = #tpu.dot_dimension_numbers<[1], [0], [0], [1], [0, 0, 1, 1], [], []>} : vector<18x64xbf16>, vector<64x64xbf16>, vector<18x64xf32> -> vector<18x64xf32>
    %c1_166 = arith.constant 1 : index
    %c0_167 = arith.constant 0 : index
    %c0_168 = arith.constant 0 : index
    %447 = vector.load %arg11[%c1_166, %c0_167, %c0_168] : memref<3x1x64xf32, #tpu.memory_space<vmem>>, vector<1x1x64xf32>
    %448 = vector.shape_cast %447 : vector<1x1x64xf32> to vector<1x64xf32>
    %449 = vector.broadcast %448 : vector<1x64xf32> to vector<18x64xf32>
    %450 = arith.addf %446, %449 : vector<18x64xf32>
    %451 = arith.addf %260, %450 : vector<18x64xf32>
    %c1_169 = arith.constant 1 : index
    %c0_170 = arith.constant 0 : index
    %c0_171 = arith.constant 0 : index
    %452 = vector.load %arg12[%c1_169, %c0_170, %c0_171] : memref<3x1x64xf32, #tpu.memory_space<vmem>>, vector<1x1x64xf32>
    %453 = vector.shape_cast %452 : vector<1x1x64xf32> to vector<1x64xf32>
    %c1_172 = arith.constant 1 : index
    %c0_173 = arith.constant 0 : index
    %c0_174 = arith.constant 0 : index
    %454 = vector.load %arg13[%c1_172, %c0_173, %c0_174] : memref<3x1x64xf32, #tpu.memory_space<vmem>>, vector<1x1x64xf32>
    %455 = vector.shape_cast %454 : vector<1x1x64xf32> to vector<1x64xf32>
    %cst_175 = arith.constant dense<0.000000e+00> : vector<18xf32>
    %456 = vector.multi_reduction <add>, %451, %cst_175 [1] : vector<18x64xf32> to vector<18xf32>
    %457 = vector.shape_cast %456 : vector<18xf32> to vector<18x1xf32>
    %cst_176 = arith.constant 6.400000e+01 : f32
    %458 = vector.broadcast %cst_176 : f32 to vector<18x1xf32>
    %459 = arith.divf %457, %458 : vector<18x1xf32>
    %460 = vector.broadcast %459 : vector<18x1xf32> to vector<18x64xf32>
    %461 = arith.subf %451, %460 : vector<18x64xf32>
    %462 = arith.mulf %461, %461 : vector<18x64xf32>
    %cst_177 = arith.constant dense<0.000000e+00> : vector<18xf32>
    %463 = vector.multi_reduction <add>, %462, %cst_177 [1] : vector<18x64xf32> to vector<18xf32>
    %464 = vector.shape_cast %463 : vector<18xf32> to vector<18x1xf32>
    %cst_178 = arith.constant 6.400000e+01 : f32
    %465 = vector.broadcast %cst_178 : f32 to vector<18x1xf32>
    %466 = arith.divf %464, %465 : vector<18x1xf32>
    %cst_179 = arith.constant 9.99999997E-7 : f32
    %467 = vector.broadcast %cst_179 : f32 to vector<18x1xf32>
    %468 = arith.addf %466, %467 : vector<18x1xf32>
    %469 = math.rsqrt %468 : vector<18x1xf32>
    %470 = vector.broadcast %469 : vector<18x1xf32> to vector<18x64xf32>
    %471 = arith.mulf %461, %470 : vector<18x64xf32>
    %472 = vector.broadcast %453 : vector<1x64xf32> to vector<18x64xf32>
    %473 = arith.mulf %471, %472 : vector<18x64xf32>
    %474 = vector.broadcast %455 : vector<1x64xf32> to vector<18x64xf32>
    %475 = arith.addf %473, %474 : vector<18x64xf32>
    %476 = arith.truncf %475 : vector<18x64xf32> to vector<18x64xbf16>
    %c1_180 = arith.constant 1 : index
    %c0_181 = arith.constant 0 : index
    %c0_182 = arith.constant 0 : index
    %477 = vector.load %arg14[%c1_180, %c0_181, %c0_182] : memref<3x64x256xbf16, #tpu.memory_space<vmem>>, vector<1x64x256xbf16>
    %478 = vector.shape_cast %477 : vector<1x64x256xbf16> to vector<64x256xbf16>
    %cst_183 = arith.constant dense<0.000000e+00> : vector<18x256xf32>
    %479 = tpu.matmul %476, %478, %cst_183 {dimension_numbers = #tpu.dot_dimension_numbers<[1], [0], [0], [1], [0, 0, 1, 1], [], []>} : vector<18x64xbf16>, vector<64x256xbf16>, vector<18x256xf32> -> vector<18x256xf32>
    %c1_184 = arith.constant 1 : index
    %c0_185 = arith.constant 0 : index
    %c0_186 = arith.constant 0 : index
    %480 = vector.load %arg15[%c1_184, %c0_185, %c0_186] : memref<3x1x256xf32, #tpu.memory_space<vmem>>, vector<1x1x256xf32>
    %481 = vector.shape_cast %480 : vector<1x1x256xf32> to vector<1x256xf32>
    %482 = vector.broadcast %481 : vector<1x256xf32> to vector<18x256xf32>
    %483 = arith.addf %479, %482 : vector<18x256xf32>
    %cst_187 = arith.constant 5.000000e-01 : f32
    %484 = vector.broadcast %cst_187 : f32 to vector<18x256xf32>
    %485 = arith.mulf %484, %483 : vector<18x256xf32>
    %cst_188 = arith.constant 4.471500e-02 : f32
    %486 = vector.broadcast %cst_188 : f32 to vector<18x256xf32>
    %487 = arith.mulf %486, %483 : vector<18x256xf32>
    %488 = arith.mulf %487, %483 : vector<18x256xf32>
    %489 = arith.mulf %488, %483 : vector<18x256xf32>
    %490 = arith.addf %483, %489 : vector<18x256xf32>
    %cst_189 = arith.constant 0.797884583 : f32
    %491 = vector.broadcast %cst_189 : f32 to vector<18x256xf32>
    %492 = arith.mulf %491, %490 : vector<18x256xf32>
    %493 = math.tanh %492 : vector<18x256xf32>
    %cst_190 = arith.constant 1.000000e+00 : f32
    %494 = vector.broadcast %cst_190 : f32 to vector<18x256xf32>
    %495 = arith.addf %494, %493 : vector<18x256xf32>
    %496 = arith.mulf %485, %495 : vector<18x256xf32>
    %497 = arith.truncf %496 : vector<18x256xf32> to vector<18x256xbf16>
    %c1_191 = arith.constant 1 : index
    %c0_192 = arith.constant 0 : index
    %c0_193 = arith.constant 0 : index
    %498 = vector.load %arg16[%c1_191, %c0_192, %c0_193] : memref<3x256x64xbf16, #tpu.memory_space<vmem>>, vector<1x256x64xbf16>
    %499 = vector.shape_cast %498 : vector<1x256x64xbf16> to vector<256x64xbf16>
    %cst_194 = arith.constant dense<0.000000e+00> : vector<18x64xf32>
    %500 = tpu.matmul %497, %499, %cst_194 {dimension_numbers = #tpu.dot_dimension_numbers<[1], [0], [0], [1], [0, 0, 1, 1], [], []>} : vector<18x256xbf16>, vector<256x64xbf16>, vector<18x64xf32> -> vector<18x64xf32>
    %c1_195 = arith.constant 1 : index
    %c0_196 = arith.constant 0 : index
    %c0_197 = arith.constant 0 : index
    %501 = vector.load %arg17[%c1_195, %c0_196, %c0_197] : memref<3x1x64xf32, #tpu.memory_space<vmem>>, vector<1x1x64xf32>
    %502 = vector.shape_cast %501 : vector<1x1x64xf32> to vector<1x64xf32>
    %503 = vector.broadcast %502 : vector<1x64xf32> to vector<18x64xf32>
    %504 = arith.addf %500, %503 : vector<18x64xf32>
    %505 = arith.addf %451, %504 : vector<18x64xf32>
    %c2 = arith.constant 2 : index
    %c0_198 = arith.constant 0 : index
    %c0_199 = arith.constant 0 : index
    %506 = vector.load %arg6[%c2, %c0_198, %c0_199] : memref<3x1x64xf32, #tpu.memory_space<vmem>>, vector<1x1x64xf32>
    %507 = vector.shape_cast %506 : vector<1x1x64xf32> to vector<1x64xf32>
    %c2_200 = arith.constant 2 : index
    %c0_201 = arith.constant 0 : index
    %c0_202 = arith.constant 0 : index
    %508 = vector.load %arg7[%c2_200, %c0_201, %c0_202] : memref<3x1x64xf32, #tpu.memory_space<vmem>>, vector<1x1x64xf32>
    %509 = vector.shape_cast %508 : vector<1x1x64xf32> to vector<1x64xf32>
    %cst_203 = arith.constant dense<0.000000e+00> : vector<18xf32>
    %510 = vector.multi_reduction <add>, %505, %cst_203 [1] : vector<18x64xf32> to vector<18xf32>
    %511 = vector.shape_cast %510 : vector<18xf32> to vector<18x1xf32>
    %cst_204 = arith.constant 6.400000e+01 : f32
    %512 = vector.broadcast %cst_204 : f32 to vector<18x1xf32>
    %513 = arith.divf %511, %512 : vector<18x1xf32>
    %514 = vector.broadcast %513 : vector<18x1xf32> to vector<18x64xf32>
    %515 = arith.subf %505, %514 : vector<18x64xf32>
    %516 = arith.mulf %515, %515 : vector<18x64xf32>
    %cst_205 = arith.constant dense<0.000000e+00> : vector<18xf32>
    %517 = vector.multi_reduction <add>, %516, %cst_205 [1] : vector<18x64xf32> to vector<18xf32>
    %518 = vector.shape_cast %517 : vector<18xf32> to vector<18x1xf32>
    %cst_206 = arith.constant 6.400000e+01 : f32
    %519 = vector.broadcast %cst_206 : f32 to vector<18x1xf32>
    %520 = arith.divf %518, %519 : vector<18x1xf32>
    %cst_207 = arith.constant 9.99999997E-7 : f32
    %521 = vector.broadcast %cst_207 : f32 to vector<18x1xf32>
    %522 = arith.addf %520, %521 : vector<18x1xf32>
    %523 = math.rsqrt %522 : vector<18x1xf32>
    %524 = vector.broadcast %523 : vector<18x1xf32> to vector<18x64xf32>
    %525 = arith.mulf %515, %524 : vector<18x64xf32>
    %526 = vector.broadcast %507 : vector<1x64xf32> to vector<18x64xf32>
    %527 = arith.mulf %525, %526 : vector<18x64xf32>
    %528 = vector.broadcast %509 : vector<1x64xf32> to vector<18x64xf32>
    %529 = arith.addf %527, %528 : vector<18x64xf32>
    %530 = arith.truncf %529 : vector<18x64xf32> to vector<18x64xbf16>
    %c2_208 = arith.constant 2 : index
    %c0_209 = arith.constant 0 : index
    %c0_210 = arith.constant 0 : index
    %531 = vector.load %arg8[%c2_208, %c0_209, %c0_210] : memref<3x64x192xbf16, #tpu.memory_space<vmem>>, vector<1x64x192xbf16>
    %532 = vector.shape_cast %531 : vector<1x64x192xbf16> to vector<64x192xbf16>
    %cst_211 = arith.constant dense<0.000000e+00> : vector<18x192xf32>
    %533 = tpu.matmul %530, %532, %cst_211 {dimension_numbers = #tpu.dot_dimension_numbers<[1], [0], [0], [1], [0, 0, 1, 1], [], []>} : vector<18x64xbf16>, vector<64x192xbf16>, vector<18x192xf32> -> vector<18x192xf32>
    %c2_212 = arith.constant 2 : index
    %c0_213 = arith.constant 0 : index
    %c0_214 = arith.constant 0 : index
    %534 = vector.load %arg9[%c2_212, %c0_213, %c0_214] : memref<3x1x192xf32, #tpu.memory_space<vmem>>, vector<1x1x192xf32>
    %535 = vector.shape_cast %534 : vector<1x1x192xf32> to vector<1x192xf32>
    %536 = vector.broadcast %535 : vector<1x192xf32> to vector<18x192xf32>
    %537 = arith.addf %533, %536 : vector<18x192xf32>
    %538 = arith.truncf %537 : vector<18x192xf32> to vector<18x192xbf16>
    %539 = vector.extract_strided_slice %538 {offsets = [0, 0], sizes = [9, 192], strides = [1, 1]} : vector<18x192xbf16> to vector<9x192xbf16>
    %540 = vector.extract_strided_slice %539 {offsets = [0, 0], sizes = [9, 16], strides = [1, 1]} : vector<9x192xbf16> to vector<9x16xbf16>
    %541 = vector.extract_strided_slice %539 {offsets = [0, 64], sizes = [9, 16], strides = [1, 1]} : vector<9x192xbf16> to vector<9x16xbf16>
    %542 = vector.extract_strided_slice %539 {offsets = [0, 128], sizes = [9, 16], strides = [1, 1]} : vector<9x192xbf16> to vector<9x16xbf16>
    %cst_215 = arith.constant dense<0.000000e+00> : vector<9x9xf32>
    %543 = tpu.matmul %540, %541, %cst_215 {dimension_numbers = #tpu.dot_dimension_numbers<[1], [1], [0], [0], [0, 0, 1, 0], [], []>} : vector<9x16xbf16>, vector<9x16xbf16>, vector<9x9xf32> -> vector<9x9xf32>
    %cst_216 = arith.constant 2.500000e-01 : f32
    %544 = vector.broadcast %cst_216 : f32 to vector<9x9xf32>
    %545 = arith.mulf %543, %544 : vector<9x9xf32>
    %cst_217 = arith.constant dense<0xFF800000> : vector<9xf32>
    %546 = vector.multi_reduction <maximumf>, %545, %cst_217 [1] : vector<9x9xf32> to vector<9xf32>
    %547 = vector.shape_cast %546 : vector<9xf32> to vector<9x1xf32>
    %548 = vector.broadcast %547 : vector<9x1xf32> to vector<9x9xf32>
    %549 = arith.subf %545, %548 : vector<9x9xf32>
    %550 = math.exp %549 : vector<9x9xf32>
    %cst_218 = arith.constant dense<0.000000e+00> : vector<9xf32>
    %551 = vector.multi_reduction <add>, %550, %cst_218 [1] : vector<9x9xf32> to vector<9xf32>
    %552 = vector.shape_cast %551 : vector<9xf32> to vector<9x1xf32>
    %553 = tpu.reciprocal %552 {approx = true} : vector<9x1xf32> -> vector<9x1xf32>
    %554 = vector.broadcast %553 : vector<9x1xf32> to vector<9x9xf32>
    %555 = arith.mulf %550, %554 : vector<9x9xf32>
    %556 = arith.truncf %555 : vector<9x9xf32> to vector<9x9xbf16>
    %cst_219 = arith.constant dense<0.000000e+00> : vector<9x16xf32>
    %557 = tpu.matmul %556, %542, %cst_219 {dimension_numbers = #tpu.dot_dimension_numbers<[1], [0], [0], [1], [0, 0, 1, 1], [], []>} : vector<9x9xbf16>, vector<9x16xbf16>, vector<9x16xf32> -> vector<9x16xf32>
    %558 = vector.extract_strided_slice %539 {offsets = [0, 16], sizes = [9, 16], strides = [1, 1]} : vector<9x192xbf16> to vector<9x16xbf16>
    %559 = vector.extract_strided_slice %539 {offsets = [0, 80], sizes = [9, 16], strides = [1, 1]} : vector<9x192xbf16> to vector<9x16xbf16>
    %560 = vector.extract_strided_slice %539 {offsets = [0, 144], sizes = [9, 16], strides = [1, 1]} : vector<9x192xbf16> to vector<9x16xbf16>
    %cst_220 = arith.constant dense<0.000000e+00> : vector<9x9xf32>
    %561 = tpu.matmul %558, %559, %cst_220 {dimension_numbers = #tpu.dot_dimension_numbers<[1], [1], [0], [0], [0, 0, 1, 0], [], []>} : vector<9x16xbf16>, vector<9x16xbf16>, vector<9x9xf32> -> vector<9x9xf32>
    %cst_221 = arith.constant 2.500000e-01 : f32
    %562 = vector.broadcast %cst_221 : f32 to vector<9x9xf32>
    %563 = arith.mulf %561, %562 : vector<9x9xf32>
    %cst_222 = arith.constant dense<0xFF800000> : vector<9xf32>
    %564 = vector.multi_reduction <maximumf>, %563, %cst_222 [1] : vector<9x9xf32> to vector<9xf32>
    %565 = vector.shape_cast %564 : vector<9xf32> to vector<9x1xf32>
    %566 = vector.broadcast %565 : vector<9x1xf32> to vector<9x9xf32>
    %567 = arith.subf %563, %566 : vector<9x9xf32>
    %568 = math.exp %567 : vector<9x9xf32>
    %cst_223 = arith.constant dense<0.000000e+00> : vector<9xf32>
    %569 = vector.multi_reduction <add>, %568, %cst_223 [1] : vector<9x9xf32> to vector<9xf32>
    %570 = vector.shape_cast %569 : vector<9xf32> to vector<9x1xf32>
    %571 = tpu.reciprocal %570 {approx = true} : vector<9x1xf32> -> vector<9x1xf32>
    %572 = vector.broadcast %571 : vector<9x1xf32> to vector<9x9xf32>
    %573 = arith.mulf %568, %572 : vector<9x9xf32>
    %574 = arith.truncf %573 : vector<9x9xf32> to vector<9x9xbf16>
    %cst_224 = arith.constant dense<0.000000e+00> : vector<9x16xf32>
    %575 = tpu.matmul %574, %560, %cst_224 {dimension_numbers = #tpu.dot_dimension_numbers<[1], [0], [0], [1], [0, 0, 1, 1], [], []>} : vector<9x9xbf16>, vector<9x16xbf16>, vector<9x16xf32> -> vector<9x16xf32>
    %576 = vector.extract_strided_slice %539 {offsets = [0, 32], sizes = [9, 16], strides = [1, 1]} : vector<9x192xbf16> to vector<9x16xbf16>
    %577 = vector.extract_strided_slice %539 {offsets = [0, 96], sizes = [9, 16], strides = [1, 1]} : vector<9x192xbf16> to vector<9x16xbf16>
    %578 = vector.extract_strided_slice %539 {offsets = [0, 160], sizes = [9, 16], strides = [1, 1]} : vector<9x192xbf16> to vector<9x16xbf16>
    %cst_225 = arith.constant dense<0.000000e+00> : vector<9x9xf32>
    %579 = tpu.matmul %576, %577, %cst_225 {dimension_numbers = #tpu.dot_dimension_numbers<[1], [1], [0], [0], [0, 0, 1, 0], [], []>} : vector<9x16xbf16>, vector<9x16xbf16>, vector<9x9xf32> -> vector<9x9xf32>
    %cst_226 = arith.constant 2.500000e-01 : f32
    %580 = vector.broadcast %cst_226 : f32 to vector<9x9xf32>
    %581 = arith.mulf %579, %580 : vector<9x9xf32>
    %cst_227 = arith.constant dense<0xFF800000> : vector<9xf32>
    %582 = vector.multi_reduction <maximumf>, %581, %cst_227 [1] : vector<9x9xf32> to vector<9xf32>
    %583 = vector.shape_cast %582 : vector<9xf32> to vector<9x1xf32>
    %584 = vector.broadcast %583 : vector<9x1xf32> to vector<9x9xf32>
    %585 = arith.subf %581, %584 : vector<9x9xf32>
    %586 = math.exp %585 : vector<9x9xf32>
    %cst_228 = arith.constant dense<0.000000e+00> : vector<9xf32>
    %587 = vector.multi_reduction <add>, %586, %cst_228 [1] : vector<9x9xf32> to vector<9xf32>
    %588 = vector.shape_cast %587 : vector<9xf32> to vector<9x1xf32>
    %589 = tpu.reciprocal %588 {approx = true} : vector<9x1xf32> -> vector<9x1xf32>
    %590 = vector.broadcast %589 : vector<9x1xf32> to vector<9x9xf32>
    %591 = arith.mulf %586, %590 : vector<9x9xf32>
    %592 = arith.truncf %591 : vector<9x9xf32> to vector<9x9xbf16>
    %cst_229 = arith.constant dense<0.000000e+00> : vector<9x16xf32>
    %593 = tpu.matmul %592, %578, %cst_229 {dimension_numbers = #tpu.dot_dimension_numbers<[1], [0], [0], [1], [0, 0, 1, 1], [], []>} : vector<9x9xbf16>, vector<9x16xbf16>, vector<9x16xf32> -> vector<9x16xf32>
    %594 = vector.extract_strided_slice %539 {offsets = [0, 48], sizes = [9, 16], strides = [1, 1]} : vector<9x192xbf16> to vector<9x16xbf16>
    %595 = vector.extract_strided_slice %539 {offsets = [0, 112], sizes = [9, 16], strides = [1, 1]} : vector<9x192xbf16> to vector<9x16xbf16>
    %596 = vector.extract_strided_slice %539 {offsets = [0, 176], sizes = [9, 16], strides = [1, 1]} : vector<9x192xbf16> to vector<9x16xbf16>
    %cst_230 = arith.constant dense<0.000000e+00> : vector<9x9xf32>
    %597 = tpu.matmul %594, %595, %cst_230 {dimension_numbers = #tpu.dot_dimension_numbers<[1], [1], [0], [0], [0, 0, 1, 0], [], []>} : vector<9x16xbf16>, vector<9x16xbf16>, vector<9x9xf32> -> vector<9x9xf32>
    %cst_231 = arith.constant 2.500000e-01 : f32
    %598 = vector.broadcast %cst_231 : f32 to vector<9x9xf32>
    %599 = arith.mulf %597, %598 : vector<9x9xf32>
    %cst_232 = arith.constant dense<0xFF800000> : vector<9xf32>
    %600 = vector.multi_reduction <maximumf>, %599, %cst_232 [1] : vector<9x9xf32> to vector<9xf32>
    %601 = vector.shape_cast %600 : vector<9xf32> to vector<9x1xf32>
    %602 = vector.broadcast %601 : vector<9x1xf32> to vector<9x9xf32>
    %603 = arith.subf %599, %602 : vector<9x9xf32>
    %604 = math.exp %603 : vector<9x9xf32>
    %cst_233 = arith.constant dense<0.000000e+00> : vector<9xf32>
    %605 = vector.multi_reduction <add>, %604, %cst_233 [1] : vector<9x9xf32> to vector<9xf32>
    %606 = vector.shape_cast %605 : vector<9xf32> to vector<9x1xf32>
    %607 = tpu.reciprocal %606 {approx = true} : vector<9x1xf32> -> vector<9x1xf32>
    %608 = vector.broadcast %607 : vector<9x1xf32> to vector<9x9xf32>
    %609 = arith.mulf %604, %608 : vector<9x9xf32>
    %610 = arith.truncf %609 : vector<9x9xf32> to vector<9x9xbf16>
    %cst_234 = arith.constant dense<0.000000e+00> : vector<9x16xf32>
    %611 = tpu.matmul %610, %596, %cst_234 {dimension_numbers = #tpu.dot_dimension_numbers<[1], [0], [0], [1], [0, 0, 1, 1], [], []>} : vector<9x9xbf16>, vector<9x16xbf16>, vector<9x16xf32> -> vector<9x16xf32>
    %612 = tpu.concatenate %557, %575, %593, %611 in 1 : vector<9x16xf32>, vector<9x16xf32>, vector<9x16xf32>, vector<9x16xf32> -> vector<9x64xf32>
    %613 = vector.extract_strided_slice %538 {offsets = [9, 0], sizes = [9, 192], strides = [1, 1]} : vector<18x192xbf16> to vector<9x192xbf16>
    %614 = vector.extract_strided_slice %613 {offsets = [0, 0], sizes = [9, 16], strides = [1, 1]} : vector<9x192xbf16> to vector<9x16xbf16>
    %615 = vector.extract_strided_slice %613 {offsets = [0, 64], sizes = [9, 16], strides = [1, 1]} : vector<9x192xbf16> to vector<9x16xbf16>
    %616 = vector.extract_strided_slice %613 {offsets = [0, 128], sizes = [9, 16], strides = [1, 1]} : vector<9x192xbf16> to vector<9x16xbf16>
    %cst_235 = arith.constant dense<0.000000e+00> : vector<9x9xf32>
    %617 = tpu.matmul %614, %615, %cst_235 {dimension_numbers = #tpu.dot_dimension_numbers<[1], [1], [0], [0], [0, 0, 1, 0], [], []>} : vector<9x16xbf16>, vector<9x16xbf16>, vector<9x9xf32> -> vector<9x9xf32>
    %cst_236 = arith.constant 2.500000e-01 : f32
    %618 = vector.broadcast %cst_236 : f32 to vector<9x9xf32>
    %619 = arith.mulf %617, %618 : vector<9x9xf32>
    %cst_237 = arith.constant dense<0xFF800000> : vector<9xf32>
    %620 = vector.multi_reduction <maximumf>, %619, %cst_237 [1] : vector<9x9xf32> to vector<9xf32>
    %621 = vector.shape_cast %620 : vector<9xf32> to vector<9x1xf32>
    %622 = vector.broadcast %621 : vector<9x1xf32> to vector<9x9xf32>
    %623 = arith.subf %619, %622 : vector<9x9xf32>
    %624 = math.exp %623 : vector<9x9xf32>
    %cst_238 = arith.constant dense<0.000000e+00> : vector<9xf32>
    %625 = vector.multi_reduction <add>, %624, %cst_238 [1] : vector<9x9xf32> to vector<9xf32>
    %626 = vector.shape_cast %625 : vector<9xf32> to vector<9x1xf32>
    %627 = tpu.reciprocal %626 {approx = true} : vector<9x1xf32> -> vector<9x1xf32>
    %628 = vector.broadcast %627 : vector<9x1xf32> to vector<9x9xf32>
    %629 = arith.mulf %624, %628 : vector<9x9xf32>
    %630 = arith.truncf %629 : vector<9x9xf32> to vector<9x9xbf16>
    %cst_239 = arith.constant dense<0.000000e+00> : vector<9x16xf32>
    %631 = tpu.matmul %630, %616, %cst_239 {dimension_numbers = #tpu.dot_dimension_numbers<[1], [0], [0], [1], [0, 0, 1, 1], [], []>} : vector<9x9xbf16>, vector<9x16xbf16>, vector<9x16xf32> -> vector<9x16xf32>
    %632 = vector.extract_strided_slice %613 {offsets = [0, 16], sizes = [9, 16], strides = [1, 1]} : vector<9x192xbf16> to vector<9x16xbf16>
    %633 = vector.extract_strided_slice %613 {offsets = [0, 80], sizes = [9, 16], strides = [1, 1]} : vector<9x192xbf16> to vector<9x16xbf16>
    %634 = vector.extract_strided_slice %613 {offsets = [0, 144], sizes = [9, 16], strides = [1, 1]} : vector<9x192xbf16> to vector<9x16xbf16>
    %cst_240 = arith.constant dense<0.000000e+00> : vector<9x9xf32>
    %635 = tpu.matmul %632, %633, %cst_240 {dimension_numbers = #tpu.dot_dimension_numbers<[1], [1], [0], [0], [0, 0, 1, 0], [], []>} : vector<9x16xbf16>, vector<9x16xbf16>, vector<9x9xf32> -> vector<9x9xf32>
    %cst_241 = arith.constant 2.500000e-01 : f32
    %636 = vector.broadcast %cst_241 : f32 to vector<9x9xf32>
    %637 = arith.mulf %635, %636 : vector<9x9xf32>
    %cst_242 = arith.constant dense<0xFF800000> : vector<9xf32>
    %638 = vector.multi_reduction <maximumf>, %637, %cst_242 [1] : vector<9x9xf32> to vector<9xf32>
    %639 = vector.shape_cast %638 : vector<9xf32> to vector<9x1xf32>
    %640 = vector.broadcast %639 : vector<9x1xf32> to vector<9x9xf32>
    %641 = arith.subf %637, %640 : vector<9x9xf32>
    %642 = math.exp %641 : vector<9x9xf32>
    %cst_243 = arith.constant dense<0.000000e+00> : vector<9xf32>
    %643 = vector.multi_reduction <add>, %642, %cst_243 [1] : vector<9x9xf32> to vector<9xf32>
    %644 = vector.shape_cast %643 : vector<9xf32> to vector<9x1xf32>
    %645 = tpu.reciprocal %644 {approx = true} : vector<9x1xf32> -> vector<9x1xf32>
    %646 = vector.broadcast %645 : vector<9x1xf32> to vector<9x9xf32>
    %647 = arith.mulf %642, %646 : vector<9x9xf32>
    %648 = arith.truncf %647 : vector<9x9xf32> to vector<9x9xbf16>
    %cst_244 = arith.constant dense<0.000000e+00> : vector<9x16xf32>
    %649 = tpu.matmul %648, %634, %cst_244 {dimension_numbers = #tpu.dot_dimension_numbers<[1], [0], [0], [1], [0, 0, 1, 1], [], []>} : vector<9x9xbf16>, vector<9x16xbf16>, vector<9x16xf32> -> vector<9x16xf32>
    %650 = vector.extract_strided_slice %613 {offsets = [0, 32], sizes = [9, 16], strides = [1, 1]} : vector<9x192xbf16> to vector<9x16xbf16>
    %651 = vector.extract_strided_slice %613 {offsets = [0, 96], sizes = [9, 16], strides = [1, 1]} : vector<9x192xbf16> to vector<9x16xbf16>
    %652 = vector.extract_strided_slice %613 {offsets = [0, 160], sizes = [9, 16], strides = [1, 1]} : vector<9x192xbf16> to vector<9x16xbf16>
    %cst_245 = arith.constant dense<0.000000e+00> : vector<9x9xf32>
    %653 = tpu.matmul %650, %651, %cst_245 {dimension_numbers = #tpu.dot_dimension_numbers<[1], [1], [0], [0], [0, 0, 1, 0], [], []>} : vector<9x16xbf16>, vector<9x16xbf16>, vector<9x9xf32> -> vector<9x9xf32>
    %cst_246 = arith.constant 2.500000e-01 : f32
    %654 = vector.broadcast %cst_246 : f32 to vector<9x9xf32>
    %655 = arith.mulf %653, %654 : vector<9x9xf32>
    %cst_247 = arith.constant dense<0xFF800000> : vector<9xf32>
    %656 = vector.multi_reduction <maximumf>, %655, %cst_247 [1] : vector<9x9xf32> to vector<9xf32>
    %657 = vector.shape_cast %656 : vector<9xf32> to vector<9x1xf32>
    %658 = vector.broadcast %657 : vector<9x1xf32> to vector<9x9xf32>
    %659 = arith.subf %655, %658 : vector<9x9xf32>
    %660 = math.exp %659 : vector<9x9xf32>
    %cst_248 = arith.constant dense<0.000000e+00> : vector<9xf32>
    %661 = vector.multi_reduction <add>, %660, %cst_248 [1] : vector<9x9xf32> to vector<9xf32>
    %662 = vector.shape_cast %661 : vector<9xf32> to vector<9x1xf32>
    %663 = tpu.reciprocal %662 {approx = true} : vector<9x1xf32> -> vector<9x1xf32>
    %664 = vector.broadcast %663 : vector<9x1xf32> to vector<9x9xf32>
    %665 = arith.mulf %660, %664 : vector<9x9xf32>
    %666 = arith.truncf %665 : vector<9x9xf32> to vector<9x9xbf16>
    %cst_249 = arith.constant dense<0.000000e+00> : vector<9x16xf32>
    %667 = tpu.matmul %666, %652, %cst_249 {dimension_numbers = #tpu.dot_dimension_numbers<[1], [0], [0], [1], [0, 0, 1, 1], [], []>} : vector<9x9xbf16>, vector<9x16xbf16>, vector<9x16xf32> -> vector<9x16xf32>
    %668 = vector.extract_strided_slice %613 {offsets = [0, 48], sizes = [9, 16], strides = [1, 1]} : vector<9x192xbf16> to vector<9x16xbf16>
    %669 = vector.extract_strided_slice %613 {offsets = [0, 112], sizes = [9, 16], strides = [1, 1]} : vector<9x192xbf16> to vector<9x16xbf16>
    %670 = vector.extract_strided_slice %613 {offsets = [0, 176], sizes = [9, 16], strides = [1, 1]} : vector<9x192xbf16> to vector<9x16xbf16>
    %cst_250 = arith.constant dense<0.000000e+00> : vector<9x9xf32>
    %671 = tpu.matmul %668, %669, %cst_250 {dimension_numbers = #tpu.dot_dimension_numbers<[1], [1], [0], [0], [0, 0, 1, 0], [], []>} : vector<9x16xbf16>, vector<9x16xbf16>, vector<9x9xf32> -> vector<9x9xf32>
    %cst_251 = arith.constant 2.500000e-01 : f32
    %672 = vector.broadcast %cst_251 : f32 to vector<9x9xf32>
    %673 = arith.mulf %671, %672 : vector<9x9xf32>
    %cst_252 = arith.constant dense<0xFF800000> : vector<9xf32>
    %674 = vector.multi_reduction <maximumf>, %673, %cst_252 [1] : vector<9x9xf32> to vector<9xf32>
    %675 = vector.shape_cast %674 : vector<9xf32> to vector<9x1xf32>
    %676 = vector.broadcast %675 : vector<9x1xf32> to vector<9x9xf32>
    %677 = arith.subf %673, %676 : vector<9x9xf32>
    %678 = math.exp %677 : vector<9x9xf32>
    %cst_253 = arith.constant dense<0.000000e+00> : vector<9xf32>
    %679 = vector.multi_reduction <add>, %678, %cst_253 [1] : vector<9x9xf32> to vector<9xf32>
    %680 = vector.shape_cast %679 : vector<9xf32> to vector<9x1xf32>
    %681 = tpu.reciprocal %680 {approx = true} : vector<9x1xf32> -> vector<9x1xf32>
    %682 = vector.broadcast %681 : vector<9x1xf32> to vector<9x9xf32>
    %683 = arith.mulf %678, %682 : vector<9x9xf32>
    %684 = arith.truncf %683 : vector<9x9xf32> to vector<9x9xbf16>
    %cst_254 = arith.constant dense<0.000000e+00> : vector<9x16xf32>
    %685 = tpu.matmul %684, %670, %cst_254 {dimension_numbers = #tpu.dot_dimension_numbers<[1], [0], [0], [1], [0, 0, 1, 1], [], []>} : vector<9x9xbf16>, vector<9x16xbf16>, vector<9x16xf32> -> vector<9x16xf32>
    %686 = tpu.concatenate %631, %649, %667, %685 in 1 : vector<9x16xf32>, vector<9x16xf32>, vector<9x16xf32>, vector<9x16xf32> -> vector<9x64xf32>
    %687 = tpu.concatenate %612, %686 in 0 : vector<9x64xf32>, vector<9x64xf32> -> vector<18x64xf32>
    %688 = arith.truncf %687 : vector<18x64xf32> to vector<18x64xbf16>
    %c2_255 = arith.constant 2 : index
    %c0_256 = arith.constant 0 : index
    %c0_257 = arith.constant 0 : index
    %689 = vector.load %arg10[%c2_255, %c0_256, %c0_257] : memref<3x64x64xbf16, #tpu.memory_space<vmem>>, vector<1x64x64xbf16>
    %690 = vector.shape_cast %689 : vector<1x64x64xbf16> to vector<64x64xbf16>
    %cst_258 = arith.constant dense<0.000000e+00> : vector<18x64xf32>
    %691 = tpu.matmul %688, %690, %cst_258 {dimension_numbers = #tpu.dot_dimension_numbers<[1], [0], [0], [1], [0, 0, 1, 1], [], []>} : vector<18x64xbf16>, vector<64x64xbf16>, vector<18x64xf32> -> vector<18x64xf32>
    %c2_259 = arith.constant 2 : index
    %c0_260 = arith.constant 0 : index
    %c0_261 = arith.constant 0 : index
    %692 = vector.load %arg11[%c2_259, %c0_260, %c0_261] : memref<3x1x64xf32, #tpu.memory_space<vmem>>, vector<1x1x64xf32>
    %693 = vector.shape_cast %692 : vector<1x1x64xf32> to vector<1x64xf32>
    %694 = vector.broadcast %693 : vector<1x64xf32> to vector<18x64xf32>
    %695 = arith.addf %691, %694 : vector<18x64xf32>
    %696 = arith.addf %505, %695 : vector<18x64xf32>
    %c2_262 = arith.constant 2 : index
    %c0_263 = arith.constant 0 : index
    %c0_264 = arith.constant 0 : index
    %697 = vector.load %arg12[%c2_262, %c0_263, %c0_264] : memref<3x1x64xf32, #tpu.memory_space<vmem>>, vector<1x1x64xf32>
    %698 = vector.shape_cast %697 : vector<1x1x64xf32> to vector<1x64xf32>
    %c2_265 = arith.constant 2 : index
    %c0_266 = arith.constant 0 : index
    %c0_267 = arith.constant 0 : index
    %699 = vector.load %arg13[%c2_265, %c0_266, %c0_267] : memref<3x1x64xf32, #tpu.memory_space<vmem>>, vector<1x1x64xf32>
    %700 = vector.shape_cast %699 : vector<1x1x64xf32> to vector<1x64xf32>
    %cst_268 = arith.constant dense<0.000000e+00> : vector<18xf32>
    %701 = vector.multi_reduction <add>, %696, %cst_268 [1] : vector<18x64xf32> to vector<18xf32>
    %702 = vector.shape_cast %701 : vector<18xf32> to vector<18x1xf32>
    %cst_269 = arith.constant 6.400000e+01 : f32
    %703 = vector.broadcast %cst_269 : f32 to vector<18x1xf32>
    %704 = arith.divf %702, %703 : vector<18x1xf32>
    %705 = vector.broadcast %704 : vector<18x1xf32> to vector<18x64xf32>
    %706 = arith.subf %696, %705 : vector<18x64xf32>
    %707 = arith.mulf %706, %706 : vector<18x64xf32>
    %cst_270 = arith.constant dense<0.000000e+00> : vector<18xf32>
    %708 = vector.multi_reduction <add>, %707, %cst_270 [1] : vector<18x64xf32> to vector<18xf32>
    %709 = vector.shape_cast %708 : vector<18xf32> to vector<18x1xf32>
    %cst_271 = arith.constant 6.400000e+01 : f32
    %710 = vector.broadcast %cst_271 : f32 to vector<18x1xf32>
    %711 = arith.divf %709, %710 : vector<18x1xf32>
    %cst_272 = arith.constant 9.99999997E-7 : f32
    %712 = vector.broadcast %cst_272 : f32 to vector<18x1xf32>
    %713 = arith.addf %711, %712 : vector<18x1xf32>
    %714 = math.rsqrt %713 : vector<18x1xf32>
    %715 = vector.broadcast %714 : vector<18x1xf32> to vector<18x64xf32>
    %716 = arith.mulf %706, %715 : vector<18x64xf32>
    %717 = vector.broadcast %698 : vector<1x64xf32> to vector<18x64xf32>
    %718 = arith.mulf %716, %717 : vector<18x64xf32>
    %719 = vector.broadcast %700 : vector<1x64xf32> to vector<18x64xf32>
    %720 = arith.addf %718, %719 : vector<18x64xf32>
    %721 = arith.truncf %720 : vector<18x64xf32> to vector<18x64xbf16>
    %c2_273 = arith.constant 2 : index
    %c0_274 = arith.constant 0 : index
    %c0_275 = arith.constant 0 : index
    %722 = vector.load %arg14[%c2_273, %c0_274, %c0_275] : memref<3x64x256xbf16, #tpu.memory_space<vmem>>, vector<1x64x256xbf16>
    %723 = vector.shape_cast %722 : vector<1x64x256xbf16> to vector<64x256xbf16>
    %cst_276 = arith.constant dense<0.000000e+00> : vector<18x256xf32>
    %724 = tpu.matmul %721, %723, %cst_276 {dimension_numbers = #tpu.dot_dimension_numbers<[1], [0], [0], [1], [0, 0, 1, 1], [], []>} : vector<18x64xbf16>, vector<64x256xbf16>, vector<18x256xf32> -> vector<18x256xf32>
    %c2_277 = arith.constant 2 : index
    %c0_278 = arith.constant 0 : index
    %c0_279 = arith.constant 0 : index
    %725 = vector.load %arg15[%c2_277, %c0_278, %c0_279] : memref<3x1x256xf32, #tpu.memory_space<vmem>>, vector<1x1x256xf32>
    %726 = vector.shape_cast %725 : vector<1x1x256xf32> to vector<1x256xf32>
    %727 = vector.broadcast %726 : vector<1x256xf32> to vector<18x256xf32>
    %728 = arith.addf %724, %727 : vector<18x256xf32>
    %cst_280 = arith.constant 5.000000e-01 : f32
    %729 = vector.broadcast %cst_280 : f32 to vector<18x256xf32>
    %730 = arith.mulf %729, %728 : vector<18x256xf32>
    %cst_281 = arith.constant 4.471500e-02 : f32
    %731 = vector.broadcast %cst_281 : f32 to vector<18x256xf32>
    %732 = arith.mulf %731, %728 : vector<18x256xf32>
    %733 = arith.mulf %732, %728 : vector<18x256xf32>
    %734 = arith.mulf %733, %728 : vector<18x256xf32>
    %735 = arith.addf %728, %734 : vector<18x256xf32>
    %cst_282 = arith.constant 0.797884583 : f32
    %736 = vector.broadcast %cst_282 : f32 to vector<18x256xf32>
    %737 = arith.mulf %736, %735 : vector<18x256xf32>
    %738 = math.tanh %737 : vector<18x256xf32>
    %cst_283 = arith.constant 1.000000e+00 : f32
    %739 = vector.broadcast %cst_283 : f32 to vector<18x256xf32>
    %740 = arith.addf %739, %738 : vector<18x256xf32>
    %741 = arith.mulf %730, %740 : vector<18x256xf32>
    %742 = arith.truncf %741 : vector<18x256xf32> to vector<18x256xbf16>
    %c2_284 = arith.constant 2 : index
    %c0_285 = arith.constant 0 : index
    %c0_286 = arith.constant 0 : index
    %743 = vector.load %arg16[%c2_284, %c0_285, %c0_286] : memref<3x256x64xbf16, #tpu.memory_space<vmem>>, vector<1x256x64xbf16>
    %744 = vector.shape_cast %743 : vector<1x256x64xbf16> to vector<256x64xbf16>
    %cst_287 = arith.constant dense<0.000000e+00> : vector<18x64xf32>
    %745 = tpu.matmul %742, %744, %cst_287 {dimension_numbers = #tpu.dot_dimension_numbers<[1], [0], [0], [1], [0, 0, 1, 1], [], []>} : vector<18x256xbf16>, vector<256x64xbf16>, vector<18x64xf32> -> vector<18x64xf32>
    %c2_288 = arith.constant 2 : index
    %c0_289 = arith.constant 0 : index
    %c0_290 = arith.constant 0 : index
    %746 = vector.load %arg17[%c2_288, %c0_289, %c0_290] : memref<3x1x64xf32, #tpu.memory_space<vmem>>, vector<1x1x64xf32>
    %747 = vector.shape_cast %746 : vector<1x1x64xf32> to vector<1x64xf32>
    %748 = vector.broadcast %747 : vector<1x64xf32> to vector<18x64xf32>
    %749 = arith.addf %745, %748 : vector<18x64xf32>
    %750 = arith.addf %696, %749 : vector<18x64xf32>
    %c0_291 = arith.constant 0 : index
    %c0_292 = arith.constant 0 : index
    %751 = vector.load %arg18[%c0_291, %c0_292] : memref<1x64xf32, #tpu.memory_space<vmem>>, vector<1x64xf32>
    %c0_293 = arith.constant 0 : index
    %c0_294 = arith.constant 0 : index
    %752 = vector.load %arg19[%c0_293, %c0_294] : memref<1x64xf32, #tpu.memory_space<vmem>>, vector<1x64xf32>
    %cst_295 = arith.constant dense<0.000000e+00> : vector<18xf32>
    %753 = vector.multi_reduction <add>, %750, %cst_295 [1] : vector<18x64xf32> to vector<18xf32>
    %754 = vector.shape_cast %753 : vector<18xf32> to vector<18x1xf32>
    %cst_296 = arith.constant 6.400000e+01 : f32
    %755 = vector.broadcast %cst_296 : f32 to vector<18x1xf32>
    %756 = arith.divf %754, %755 : vector<18x1xf32>
    %757 = vector.broadcast %756 : vector<18x1xf32> to vector<18x64xf32>
    %758 = arith.subf %750, %757 : vector<18x64xf32>
    %759 = arith.mulf %758, %758 : vector<18x64xf32>
    %cst_297 = arith.constant dense<0.000000e+00> : vector<18xf32>
    %760 = vector.multi_reduction <add>, %759, %cst_297 [1] : vector<18x64xf32> to vector<18xf32>
    %761 = vector.shape_cast %760 : vector<18xf32> to vector<18x1xf32>
    %cst_298 = arith.constant 6.400000e+01 : f32
    %762 = vector.broadcast %cst_298 : f32 to vector<18x1xf32>
    %763 = arith.divf %761, %762 : vector<18x1xf32>
    %cst_299 = arith.constant 9.99999997E-7 : f32
    %764 = vector.broadcast %cst_299 : f32 to vector<18x1xf32>
    %765 = arith.addf %763, %764 : vector<18x1xf32>
    %766 = math.rsqrt %765 : vector<18x1xf32>
    %767 = vector.broadcast %766 : vector<18x1xf32> to vector<18x64xf32>
    %768 = arith.mulf %758, %767 : vector<18x64xf32>
    %769 = vector.broadcast %751 : vector<1x64xf32> to vector<18x64xf32>
    %770 = arith.mulf %768, %769 : vector<18x64xf32>
    %771 = vector.broadcast %752 : vector<1x64xf32> to vector<18x64xf32>
    %772 = arith.addf %770, %771 : vector<18x64xf32>
    %773 = tpu.concatenate %15, %772 in 1 : vector<18x64xf32>, vector<18x64xf32> -> vector<18x128xf32>
    %c0_300 = arith.constant 0 : index
    %c0_301 = arith.constant 0 : index
    %774 = vector.load %arg20[%c0_300, %c0_301] : memref<18x128xf32, #tpu.memory_space<vmem>>, vector<18x128xf32>
    tpu.vector_store %arg20[%c0_300, %c0_301], %773 {strides = array<i32>} : memref<18x128xf32, #tpu.memory_space<vmem>>, vector<18x128xf32>,
    return
  }
}

</mosaic_0001>

<bundles_post_ra>
// kernel: framework_forward.1
= control target key start
LH: loop header
LB: loop body
LE: loop exit
PB: predicated region body
PF: predicated region fallthrough
CT: control target
= control target key end

     0   :  { %v7332_v1 = vmov 0.0   ;;  %vm7333_vm0 = vmmov 0   ;;  %v366_v34 = vlaneseq  ;;  %vm374_vm1 = vcmask 1040384   ;;  %s7336_s26 = smov 64   ;;  %s7339_s28 = smov 96   ;;  %s9092_s1 = inlined_call_operand.vmem [shape: bf16[384,64], index: 1, kind: input, shape index: {}]   ;;  %s9093_s0 = inlined_call_operand.vmem [shape: f32[16,384], index: 0, kind: input, shape index: {}]   ;;  %s9094_s2 = inlined_call_operand.vmem [shape: f32[1,64], index: 2, kind: input, shape index: {}]   ;;  %s9095_s3 = inlined_call_operand.vmem [shape: f32[1,64], index: 3, kind: input, shape index: {}]   ;;  %s9096_s4 = inlined_call_operand.vmem [shape: f32[1,64], index: 4, kind: input, shape index: {}]   ;;  %s9097_s5 = inlined_call_operand.vmem [shape: f32[8,64], index: 5, kind: input, shape index: {}]   ;;  %s9098_s8 = inlined_call_operand.vmem [shape: bf16[3,64,192], index: 8, kind: input, shape index: {}]   ;;  %s9099_s6 = inlined_call_operand.vmem [shape: f32[3,1,64], index: 6, kind: input, shape index: {}]   ;;  %s9100_s7 = inlined_call_operand.vmem [shape: f32[3,1,64], index: 7, kind: input, shape index: {}]   ;;  %s9101_s9 = inlined_call_operand.vmem [shape: f32[3,1,192], index: 9, kind: input, shape index: {}]   ;;  %s9102_s10 = inlined_call_operand.vmem [shape: bf16[3,64,64], index: 10, kind: input, shape index: {}]   ;;  %s9103_s11 = inlined_call_operand.vmem [shape: f32[3,1,64], index: 11, kind: input, shape index: {}]   ;;  %s9104_s14 = inlined_call_operand.vmem [shape: bf16[3,64,256], index: 14, kind: input, shape index: {}]   ;;  %s9105_s12 = inlined_call_operand.vmem [shape: f32[3,1,64], index: 12, kind: input, shape index: {}]   ;;  %s9106_s13 = inlined_call_operand.vmem [shape: f32[3,1,64], index: 13, kind: input, shape index: {}]   ;;  %s9107_s16 = inlined_call_operand.vmem [shape: bf16[3,256,64], index: 16, kind: input, shape index: {}]   ;;  %s9108_s15 = inlined_call_operand.vmem [shape: f32[3,1,256], index: 15, kind: input, shape index: {}]   ;;  %s9109_s17 = inlined_call_operand.vmem [shape: f32[3,1,64], index: 17, kind: input, shape index: {}]   ;;  %s9110_s18 = inlined_call_operand.vmem [shape: f32[1,64], index: 18, kind: input, shape index: {}]   ;;  %s9111_s19 = inlined_call_operand.vmem [shape: f32[1,64], index: 19, kind: input, shape index: {}]   ;;  %s9112_s20 = inlined_call_operand.vmem [shape: f32[18,128], index: 20, kind: output, shape index: {}]  }
   0x1   :  { %9119 = sst [smem:[#allocation2_spill]] %s9092_s1  ;;  %6461 = vmatprep.subr.bf16.mxu1 %v7332_v1  ;;  %6477 = vmatprep.mubr.msk.bf16.mxu1 %vm7333_vm0, %v7332_v1  ;;  %v359_v52 = vld [vmem:[%s9097_s5] sm:$0xff]  ;;  %vm381_vm2 = vcmask 523264   ;;  %vm377_vm3 = vcmask 1041408   ;;  %vm388_vm4 = vcmask 517120   ;;  %vm645_vm5 = vcmask 1043456  }
   0x2   :  { %9120 = sst [smem:[#allocation3_spill]] %s9093_s0  ;;  %s9124_s23 = sld [smem:[#allocation2_spill]]  ;;  %v7554_v37 = vshrl.u32 %v366_v34, 7  ;;  %vm646_vm6 = vcmask 1044480   ;;  %vm1101_vm7 = vsmask.f32 3328 }
   0x3   :  { %9121 = sst [smem:[#allocation4_spill]] %s9094_s2  ;;  %s9125_s0 = sld [smem:[#allocation3_spill]]  ;;  %vm567_vm8 = vcmask 130048   ;;  %vm617_vm9 = vcmask 72704   ;;  %vm621_vm10 = vcmask 65536   ;;  %vm1095_vm11 = vcmask 261120  }
   0x4   :  { %9122 = sst [smem:[#allocation5_spill]] %s9095_s3  ;;  %s9126_s27 = sld [smem:[#allocation4_spill]]  ;;  %v7563_v51 = vsub.s32 0, %v7554_v37  ;;  %vm1098_vm12 = vcmask 392192  }
   0x5   :  { %9123 = sst [smem:[#allocation6_spill]] %s9096_s4  ;;  %s9127_s4 = sld [smem:[#allocation5_spill]] }
   0x6   :  { %s9128_s1 = sld [smem:[#allocation6_spill]]  ;;  %s7341_s29 = smov 48  }
   0x7   :  { %s9115_s30 = smov 16  }
   0x8   :  { %v6906_v0 = vld [vmem:[%s9124_s23 + $0x40] sm:$0xff]   ;;  %v6909_v4 = vld [vmem:[%s9124_s23 + $0x48] sm:$0xff]   ;;  %v6912_v7 = vld [vmem:[%s9124_s23 + $0x50] sm:$0xff]  }
   0x9   :  { %v6907_v2 = vld [vmem:[%s9124_s23] sm:$0xff]   ;;  %6232 = vmatprep.subr.bf16.mxu0 %v6906_v0  ;;  %v6910_v5 = vld [vmem:[%s9124_s23 + $0x8] sm:$0xff]   ;;  %v6913_v8 = vld [vmem:[%s9124_s23 + $0x10] sm:$0xff]  }
   0xa   :  { %v6908_v3 = vld [vmem:[%s9124_s23 + $0x80] sm:$0xff]   ;;  %6233 = vmatpush3.bf16.msra.mxu0 %v6907_v2  ;;  %v6911_v6 = vld [vmem:[%s9124_s23 + $0x88] sm:$0xff]   ;;  %v6914_v9 = vld [vmem:[%s9124_s23 + $0x90] sm:$0xff]  }
   0xb   :  { %6462 = vmatpush3.bf16.msra.mxu1 %v6908_v3  ;;  %6234 = vmatprep.subr.bf16.mxu0 %v6909_v4  ;;  %v6915_v10 = vld [vmem:[%s9124_s23 + $0x58] sm:$0xff]   ;;  %v6918_v13 = vld [vmem:[%s9124_s23 + $0x60] sm:$0xff]   ;;  %v6921_v16 = vld [vmem:[%s9124_s23 + $0x68] sm:$0xff]  }
   0xc   :  { %6463 = vmatprep.subr.bf16.mxu1 %v7332_v1  ;;  %v6916_v11 = vld [vmem:[%s9124_s23 + $0x18] sm:$0xff]   ;;  %v6919_v14 = vld [vmem:[%s9124_s23 + $0x20] sm:$0xff]   ;;  %v6922_v17 = vld [vmem:[%s9124_s23 + $0x28] sm:$0xff]  }
   0xd   :  { %v6917_v12 = vld [vmem:[%s9124_s23 + $0x98] sm:$0xff]   ;;  %v6920_v15 = vld [vmem:[%s9124_s23 + $0xa0] sm:$0xff]   ;;  %v6923_v18 = vld [vmem:[%s9124_s23 + $0xa8] sm:$0xff]  }
   0xe   :  { %6235 = vmatpush3.bf16.msra.mxu0 %v6910_v5  ;;  %v6924_v19 = vld [vmem:[%s9124_s23 + $0x70] sm:$0xff]   ;;  %v67_v21 = vld [vmem:[%s9125_s0 + $0x8] sm:$0xff]  ;;  %v70_v22 = vld [vmem:[%s9125_s0 + $0x20] sm:$0xff] }
   0xf   :  { %6464 = vmatpush3.bf16.msra.mxu1 %v6911_v6  ;;  %6236 = vmatprep.subr.bf16.mxu0 %v6912_v7  ;;  %v6925_v20 = vld [vmem:[%s9124_s23 + $0x30] sm:$0xff]   ;;  %v6927_v24 = vld [vmem:[%s9124_s23 + $0x78] sm:$0xff]   ;;  %v73_v25 = vpack.c.bf16 %v70_v22, %v67_v21  ;;  %v66_v27 = vld [vmem:[%s9125_s0] sm:$0xff] }
  0x10   :  { %6465 = vmatprep.subr.bf16.mxu1 %v7332_v1  ;;  %v6926_v23 = vld [vmem:[%s9124_s23 + $0xb0] sm:$0xff]   ;;  %v6928_v26 = vld [vmem:[%s9124_s23 + $0x38] sm:$0xff]   ;;  %v71_v31 = vld [vmem:[%s9125_s0 + $0x28] sm:$0xff] }
  0x11   :  { %306 = vmatprep.mubr.bf16.mxu0 %v73_v25  ;;  %v69_v28 = vld [vmem:[%s9125_s0 + $0x18] sm:$0xff]  ;;  %v68_v30 = vld [vmem:[%s9125_s0 + $0x10] sm:$0xff]  ;;  %v5885_v36 = vld [vmem:[%s9126_s27] ss:$0 sm:$0xff]  ;;  %s7337_s27 = smov 112   ;;  %s7338_s0 = smov 32  }
  0x12   :  { %6237 = vmatpush3.bf16.msra.mxu0 %v6913_v8  ;;  %v6929_v29 = vld [vmem:[%s9124_s23 + $0xb8] sm:$0xff]   ;;  %v72_v32 = vpack.c.bf16 %v69_v28, %v66_v27  ;;  %v74_v33 = vpack.c.bf16 %v71_v31, %v68_v30  ;;  %v356_v40 = vld [vmem:[%s9127_s4] sm:$0x1]  ;;  %v7334_v27 = vmov 0   ;;  %s9117_s4 = smov 80   ;;  %s9129_s23 = smov 16  }
  0x13   :  { %6466 = vmatpush3.bf16.msra.mxu1 %v6914_v9  ;;  %6238 = vmatprep.subr.bf16.mxu0 %v6915_v10  ;;  %v357_v41 = vld [vmem:[%s9128_s1] sm:$0x1]  ;;  %v6935_v21 = vld [vmem:[%s9098_s8 + $0x14] ss:$8 sps:$4 sm:$0xff]   ;;  %v6933_v22 = vld [vmem:[%s9098_s8 + $0x10] ss:$8 sps:$4 sm:$0xff]  }
  0x14   :  { %6467 = vmatprep.subr.bf16.mxu1 %v7332_v1  ;;  %v358_v50 = vadd.f32 %v357_v41, %v356_v40  ;;  %v6939_v25 = vld [vmem:[%s9098_s8 + $0x30] ss:$8 sps:$4 sm:$0xff]   ;;  %v5910_v40 = vld [vmem:[%s9099_s6] ss:$0 sm:$0xff] }
  0x16   :  { %6239 = vmatpush3.bf16.msra.mxu0 %v6916_v11  ;;  %v369_v57 = vrot.slane %v358_v50, %v7563_v51 }
  0x17   :  { %6468 = vmatpush3.bf16.msra.mxu1 %v6917_v12  ;;  %6240 = vmatprep.subr.bf16.mxu0 %v6918_v13 }
  0x18   :  { %6469 = vmatprep.subr.bf16.mxu1 %v7332_v1 }
  0x1a   :  { %6241 = vmatpush3.bf16.msra.mxu0 %v6919_v14 }
  0x1b   :  { %6470 = vmatpush3.bf16.msra.mxu1 %v6920_v15  ;;  %6242 = vmatprep.subr.bf16.mxu0 %v6921_v16 }
  0x1c   :  { %6471 = vmatprep.subr.bf16.mxu1 %v7332_v1 }
  0x1e   :  { %6243 = vmatpush3.bf16.msra.mxu0 %v6922_v17 }
  0x1f   :  { %6472 = vmatpush3.bf16.msra.mxu1 %v6923_v18  ;;  %6244 = vmatprep.subr.bf16.mxu0 %v6924_v19  ;;  %v6932_v19 = vld [vmem:[%s9098_s8 + $0x4] ss:$8 sps:$4 sm:$0xff]  }
  0x20   :  { %6473 = vmatprep.subr.bf16.mxu1 %v7332_v1 }
  0x22   :  { %6245 = vmatpush3.bf16.msra.mxu0 %v6925_v20  ;;  %v6930_v20 = vld [vmem:[%s9098_s8] ss:$8 sps:$4 sm:$0xff]  }
  0x23   :  { %6474 = vmatpush3.bf16.msra.mxu1 %v6926_v23  ;;  %6246 = vmatprep.subr.bf16.mxu0 %v6927_v24  ;;  %v6938_v23 = vld [vmem:[%s9098_s8 + $0x24] ss:$8 sps:$4 sm:$0xff]   ;;  %v6936_v24 = vld [vmem:[%s9098_s8 + $0x20] ss:$8 sps:$4 sm:$0xff]  }
  0x24   :  { %6475 = vmatprep.subr.bf16.mxu1 %v7332_v1 }
  0x26   :  { %6247 = vmatpush3.bf16.msra.mxu0 %v6928_v26  ;;  %v6941_v26 = vld [vmem:[%s9098_s8 + $0x34] ss:$8 sps:$4 sm:$0xff]  }
  0x27   :  { %6476 = vmatpush3.bf16.msra.mxu1 %v6929_v29  ;;  %509 = vmatprep.subr.bf16.mxu0 %v6932_v19 }
  0x28   :  { %6487 = vmatprep.subr.bf16.mxu1 %v7332_v1 }
  0x29   :  { %307 = vmatmul.mubr.bf16.vlgmr.msra.gmra.mrb[0].mxu0 %v72_v32 }
  0x2a   :  { %6478 = vmatmul.mubr.bf16.vlgmr.msra.gmra.mrb[0].mxu1 %v74_v33  ;;  %510 = vmatpush1.bf16.msra.mxu0 %v6930_v20 }
  0x2b   :  { %6489 = vmatprep.mubr.msk.bf16.mxu1 %vm7333_vm0, %v7332_v1  ;;  %511 = vmatprep.subr.bf16.mxu0 %v6935_v21 }
  0x2c   :  { %541 = vmatprep.mubr.bf16.mxu0 %v7334_v27 }
  0x2e   :  { %512 = vmatpush1.bf16.msra.mxu0 %v6933_v22 }
  0x2f   :  { %513 = vmatprep.subr.bf16.mxu0 %v6938_v23 }
  0x32   :  { %514 = vmatpush1.bf16.msra.mxu0 %v6936_v24 }
  0x33   :  { %515 = vmatprep.subr.bf16.mxu0 %v6941_v26 }
  0x36   :  { %516 = vmatpush1.bf16.msra.mxu0 %v6939_v25 }
  0x37   :  { %6481 = vmatprep.subr.bf16.mxu0 %v7332_v1 }
  0xfc   :  { %v6248_v35 = vpop.f32.mrb[0].mxu0 }
  0xfd   :  { %v6249_v38 = vpop.f32.mrb[1].mxu0  ;;  %v349_v39 = vpop.f32.mrb[0].mxu1 }
  0xfe   :  { %v6250_v42 = vadd.f32 %v6249_v38, %v6248_v35  ;;  %v6251_v43 = vpop.f32.mrb[2].mxu0  ;;  %v6479_v44 = vpop.f32.mrb[1].mxu1 }
  0xff   :  { %v6252_v45 = vpop.f32.mrb[3].mxu0  ;;  %v352_v46 = vpop.f32.mrb[2].mxu1  ;;  %v5911_v44 = vld [vmem:[%s9100_s7] ss:$0 sm:$0xff] }
 0x100   :  { %v309_v47 = vadd.f32 %v6250_v42, %v5885_v36  ;;  %v6253_v48 = vadd.f32 %v6252_v45, %v6251_v43  ;;  %v6480_v49 = vpop.f32.mrb[3].mxu1 }
 0x102   :  { %v350_v53 = vadd.f32 %v349_v39, %v309_v47  ;;  %v312_v54 = vadd.f32 %v6253_v48, %v5885_v36 }
 0x104   :  { %v360_v55 = vadd.f32 %v359_v52, %v350_v53  ;;  %v353_v56 = vadd.f32 %v352_v46, %v312_v54 }
 0x106   :  { %v363_v58 = vrot.slane %v360_v55, 7  ;;  %v361_v59 = vadd.f32 %v359_v52, %v353_v56  ;;  %v451_v55 = vld [vmem:[%s9101_s9] sm:$0x3]  ;;  %v7631_v56 = vsub.s32 1, %v7554_v37 }
 0x108   :  { %v7569_v60 = vrot.slane %v361_v59, 6  ;;  %v7572_v61 = vsel %vm374_vm1, %v358_v50, %v363_v58  ;;  %v376_v62 = vsel %vm374_vm1, %v363_v58, %v369_v57  ;;  %v456_v57 = vrot.slane %v451_v55, %v7563_v51 }
 0x109   :  { %v382_v63 = vsel %vm381_vm2, %v7572_v61, 0.0  ;;  %v460_v59 = vrot.slane %v451_v55, %v7631_v56 }
 0x10a   :  { %383 = vadd.xlane.f32.xlu0 %v382_v63  ;;  %v7578_v0 = vsel %vm377_vm3, %v376_v62, %v7569_v60  ;;  %v389_v3 = vsel %vm388_vm4, %v7569_v60, 0.0 }
 0x10b   :  { %v385_v2 = vsel %vm381_vm2, %v7578_v0, 0.0 }
 0x10e   :  { %386 = vadd.xlane.f32.xlu0 %v385_v2  ;;  %v7335_v2 = vmov 65535  }
 0x112   :  { %390 = vadd.xlane.f32.xlu0 %v389_v3  ;;  %v647_v3 = vsel %vm645_vm5, 4294967295, %v7335_v2 }
 0x113   :  { %v7637_v37 = vsel %vm646_vm6, %v647_v3, 0 }
 0x197   :  { %v384_v4 = vpop.xlane.xlu0 %383 }
 0x198   :  { %v393_v5 = vmul.f32 0.015625, %v384_v4 }
 0x19a   :  { %v396_v6 = vsub.f32 %v7572_v61, %v393_v5 }
 0x19b   :  { %v387_v7 = vpop.xlane.xlu0 %386 }
 0x19c   :  { %v394_v8 = vmul.f32 0.015625, %v387_v7  ;;  %v399_v9 = vmul.f32 %v396_v6, %v396_v6 }
 0x19e   :  { %v397_v10 = vsub.f32 %v7578_v0, %v394_v8  ;;  %v402_v11 = vsel %vm381_vm2, %v399_v9, 0.0 }
 0x19f   :  { %403 = vadd.xlane.f32.xlu1 %v402_v11  ;;  %v391_v12 = vpop.xlane.xlu0 %390 }
 0x1a0   :  { %v395_v13 = vmul.f32 0.015625, %v391_v12  ;;  %v400_v14 = vmul.f32 %v397_v10, %v397_v10 }
 0x1a2   :  { %v398_v15 = vsub.f32 %v7569_v60, %v395_v13  ;;  %v405_v16 = vsel %vm381_vm2, %v400_v14, 0.0 }
 0x1a3   :  { %406 = vadd.xlane.f32.xlu1 %v405_v16 }
 0x1a4   :  { %v401_v17 = vmul.f32 %v398_v15, %v398_v15 }
 0x1a6   :  { %v408_v18 = vsel %vm388_vm4, %v401_v17, 0.0 }
 0x1a7   :  { %409 = vadd.xlane.f32.xlu1 %v408_v18 }
 0x22c   :  { %v404_v28 = vpop.xlane.xlu1 %403 }
 0x22d   :  { %v411_v29 = vmul.f32 0.015625, %v404_v28 }
 0x22f   :  { %v414_v30 = vadd.f32 1e-06, %v411_v29 }
 0x230   :  { %v407_v31 = vpop.xlane.xlu1 %406 }
 0x231   :  { %7062 = vrsqrt.f32 %v414_v30  ;;  %v412_v32 = vmul.f32 0.015625, %v407_v31 }
 0x233   :  { %v415_v33 = vadd.f32 1e-06, %v412_v32 }
 0x234   :  { %v410_v34 = vpop.xlane.xlu1 %409 }
 0x235   :  { %7064 = vrsqrt.f32 %v415_v33  ;;  %v413_v35 = vmul.f32 0.015625, %v410_v34 }
 0x237   :  { %v416_v36 = vadd.f32 1e-06, %v413_v35 }
 0x239   :  { %7066 = vrsqrt.f32 %v416_v36 }
 0x23b   :  { %v7063_v38 = vpop.eup %7062 }
 0x23c   :  { %v420_v39 = vmul.f32 %v7063_v38, %v396_v6 }
 0x23e   :  { %v429_v42 = vmul.f32 %v5910_v40, %v420_v39 }
 0x23f   :  { %v7065_v41 = vpop.eup %7064 }
 0x240   :  { %v421_v43 = vmul.f32 %v7065_v41, %v397_v10  ;;  %v438_v47 = vadd.f32 %v5911_v44, %v429_v42 }
 0x242   :  { %v430_v45 = vmul.f32 %v5910_v40, %v421_v43 }
 0x243   :  { %v7067_v46 = vpop.eup %7066 }
 0x244   :  { %v439_v48 = vadd.f32 %v5911_v44, %v430_v45  ;;  %v422_v49 = vmul.f32 %v7067_v46, %v398_v15 }
 0x246   :  { %v441_v50 = vpack.c.bf16 %v439_v48, %v438_v47  ;;  %v431_v52 = vmul.f32 %v5910_v40, %v422_v49 }
 0x248   :  { %5920 = vmatmul.mubr.msk.bf16.vlgmr.msra.gmra.mrb[4].mxu0 %vm381_vm2, %v441_v50  ;;  %v440_v53 = vadd.f32 %v5911_v44, %v431_v52 }
 0x249   :  { %551 = vmatprep.mubr.bf16.mxu0 %v7334_v27 }
 0x24a   :  { %v442_v54 = vpack.c.bf16 %v440_v53, %v440_v53 }
 0x250   :  { %5921 = vmatmul.mubr.msk.bf16.gmra.mrb[8].mxu0 %vm381_vm2, %v442_v54 }
 0x251   :  { %6483 = vmatprep.mubr.msk.bf16.mxu0 %vm7333_vm0, %v7332_v1 }
 0x31b   :  { %v543_v58 = vpop.f32.mrb[4].mxu0 }
 0x31c   :  { %v545_v62 = vpop.f32.mrb[5].mxu0  ;;  %v544_v4 = vadd.f32 %v543_v58, %v456_v57 }
 0x31d   :  { %v547_v63 = vpop.f32.mrb[6].mxu0  ;;  %v546_v7 = vadd.f32 %v545_v62, %v460_v59 }
 0x31e   :  { %v548_v5 = vadd.f32 %v547_v63, %v456_v57  ;;  %v549_v6 = vpop.f32.mrb[7].mxu0 }
 0x31f   :  { %v550_v8 = vadd.f32 %v549_v6, %v460_v59 }
 0x320   :  { %v7635_v9 = vpack.c.bf16 %v548_v5, %v544_v4 }
 0x321   :  { %v7639_v10 = vpack.c.bf16 %v550_v8, %v546_v7 }
 0x322   :  { %565 = vrot.lane.b32.xlu0 %v7635_v9, %s7336_s26  ;;  %v1102_v21 = vshrl.u32 %v7635_v9, 16  ;;  %v1105_v22 = vshll.u32 %v7635_v9, 16 }
 0x323   :  { %v553_v11 = vpop.f32.mrb[8].mxu0  ;;  %v650_v12 = vand.u32 %v7637_v37, %v7639_v10 }
 0x324   :  { %v554_v13 = vadd.f32 %v553_v11, %v456_v57  ;;  %v555_v14 = vpop.f32.mrb[9].mxu0  ;;  %v1104_v25 = vrot.slane %v1102_v21, 4  ;;  %v1107_v26 = vrot.slane %v1105_v22, 5 }
 0x325   :  { %v7645_v15 = vadd.f32 %v555_v14, %v460_v59  ;;  %v557_v16 = vpop.f32.mrb[10].mxu0  ;;  %6488 = vmatpush3.bf16.msra.mxu1 %v650_v12 }
 0x326   :  { %v562_v17 = vpack.c.bf16 %v554_v13, %v554_v13  ;;  %693 = vrot.lane.b32.xlu0 %v7635_v9, %s7337_s27  ;;  %v558_v18 = vpop.f32.mrb[11].mxu0  ;;  %6493 = vmatprep.subr.bf16.mxu1 %v7332_v1  ;;  %v1108_v29 = vor.u32 %v1107_v26, %v1104_v25 }
 0x328   :  { %v1110_v19 = vshrl.u32 %v562_v17, 16  ;;  %v1113_v20 = vshll.u32 %v562_v17, 16 }
 0x32a   :  { %821 = vrot.lane.b32.xlu0 %v7635_v9, %s7338_s0  ;;  %v1112_v23 = vrot.slane %v1110_v19, 4  ;;  %v1115_v24 = vrot.slane %v1113_v20, 5 }
 0x32c   :  { %v1116_v28 = vor.u32 %v1115_v24, %v1112_v23 }
 0x32e   :  { %819 = vrot.lane.b32.xlu0 %v7635_v9, %s7339_s28  ;;  %v7659_v30 = vsel %vm1101_vm7, %v1108_v29, %v1116_v28 }
 0x332   :  { %944 = vrot.lane.b32.xlu0 %v7635_v9, %s9117_s4 }
 0x336   :  { %1257 = vrot.lane.b32.xlu0 %v7659_v30, %s7341_s29 }
 0x33a   :  { %1382 = vrot.lane.b32.xlu0 %v7659_v30, %s7338_s0 }
 0x33e   :  { %1507 = vrot.lane.b32.xlu0 %v7659_v30, %s9115_s30 }
 0x394   :  { %v566_v31 = vpop.permute.xlu0 %565 }
 0x395   :  { %v572_v32 = vsel %vm567_vm8, %v566_v31, 0 }
 0x396   :  { %6482 = vmatpush3.bf16.xpose.msra.mxu0 %v572_v32 }
 0x397   :  { %6499 = vmatprep.subr.bf16.mxu0 %v7332_v1 }
 0x398   :  { %v694_v2 = vpop.permute.xlu0 %693 }
 0x39c   :  { %v822_v4 = vpop.permute.xlu0 %821 }
 0x39d   :  { %6484 = vmatmul.mubr.msk.bf16.vlgmr.msra.gmra.mrb[12].mxu0 %vm567_vm8, %v7635_v9  ;;  %v827_v5 = vsel %vm567_vm8, %v822_v4, 0 }
 0x39e   :  { %6501 = vmatprep.mubr.msk.bf16.mxu0 %vm7333_vm0, %v7332_v1 }
 0x3a0   :  { %v820_v7 = vpop.permute.xlu0 %819 }
 0x3a4   :  { %v945_v11 = vpop.permute.xlu0 %944 }
 0x3a8   :  { %v1258_v13 = vpop.permute.xlu0 %1257 }
 0x3a9   :  { %v1263_v14 = vsel %vm567_vm8, %v1258_v13, 0 }
 0x3ac   :  { %v1383_v16 = vpop.permute.xlu0 %1382 }
 0x3ad   :  { %v1388_v18 = vsel %vm567_vm8, %v1383_v16, 0 }
 0x3b0   :  { %v1508_v19 = vpop.permute.xlu0 %1507 }
 0x3b1   :  { %v1513_v21 = vsel %vm567_vm8, %v1508_v19, 0 }
 0x470   :  { %v608_v33 = vpop.f32.mrb[12].mxu0 }
 0x471   :  { %v615_v34 = vmul.f32 0.25, %v608_v33  ;;  %v6485_v35 = vpop.f32.mrb[13].mxu0 }
 0x472   :  { %v611_v36 = vpop.f32.mrb[14].mxu0 }
 0x473   :  { %v616_v38 = vmul.f32 0.25, %v611_v36  ;;  %v6486_v39 = vpop.f32.mrb[15].mxu0  ;;  %v618_v40 = vsel %vm617_vm9, %v615_v34, -inf }
 0x474   :  { %619 = vmax.xlane.f32.xlu1 %v618_v40 }
 0x475   :  { %v622_v41 = vsel %vm621_vm10, %v616_v38, -inf }
 0x478   :  { %623 = vmax.xlane.f32.xlu1 %v622_v41 }
 0x501   :  { %v620_v42 = vpop.xlane.xlu1 %619 }
 0x502   :  { %v625_v43 = vsub.f32 %v615_v34, %v620_v42 }
 0x504   :  { %v627_v44 = vmul.f32 1.442695, %v625_v43 }
 0x505   :  { %v624_v45 = vpop.xlane.xlu1 %623 }
 0x506   :  { %7068 = vpow2.f32 %v627_v44  ;;  %v626_v46 = vsub.f32 %v616_v38, %v624_v45 }
 0x508   :  { %v629_v47 = vmul.f32 1.442695, %v626_v46 }
 0x50a   :  { %7070 = vpow2.f32 %v629_v47 }
 0x510   :  { %v7069_v48 = vpop.eup %7068 }
 0x511   :  { %v631_v49 = vsel %vm617_vm9, %v7069_v48, 0.0 }
 0x512   :  { %632 = vadd.xlane.f32.xlu1 %v631_v49 }
 0x514   :  { %v7071_v50 = vpop.eup %7070 }
 0x515   :  { %v634_v52 = vsel %vm621_vm10, %v7071_v50, 0.0 }
 0x516   :  { %635 = vadd.xlane.f32.xlu1 %v634_v52 }
 0x527   :  { %695 = vrot.lane.b32.xlu1 %v7635_v9, %s7341_s29 }
 0x52b   :  { %946 = vrot.lane.b32.xlu1 %v7635_v9, %s9115_s30 }
 0x52f   :  { %1118 = vrot.lane.b32.xlu1 %v7659_v30, %s7336_s26 }
 0x533   :  { %1255 = vrot.lane.b32.xlu1 %v7659_v30, %s7337_s27 }
 0x537   :  { %1380 = vrot.lane.b32.xlu1 %v7659_v30, %s7339_s28 }
 0x53b   :  { %1505 = vrot.lane.b32.xlu1 %v7659_v30, %s9117_s4 }
 0x59f   :  { %v633_v53 = vpop.xlane.xlu1 %632 }
 0x5a0   :  { %7072 = vrcp.f32 %v633_v53 }
 0x5a3   :  { %v636_v54 = vpop.xlane.xlu1 %635 }
 0x5a4   :  { %7074 = vrcp.f32 %v636_v54 }
 0x5a7   :  { %v696_v62 = vpop.permute.xlu1 %695 }
 0x5a8   :  { %v701_v3 = vsel %vm567_vm8, %v696_v62, 0 }
 0x5aa   :  { %v7073_v55 = vpop.eup %7072 }
 0x5ab   :  { %v639_v58 = vmul.f32 %v7073_v55, %v7069_v48  ;;  %v947_v6 = vpop.permute.xlu1 %946 }
 0x5ac   :  { %v952_v8 = vsel %vm567_vm8, %v947_v6, 0 }
 0x5ae   :  { %v7075_v57 = vpop.eup %7074 }
 0x5af   :  { %v640_v59 = vmul.f32 %v7075_v57, %v7071_v50  ;;  %v1119_v9 = vpop.permute.xlu1 %1118 }
 0x5b0   :  { %v1124_v12 = vsel %vm567_vm8, %v1119_v9, 0 }
 0x5b1   :  { %v641_v63 = vpack.c.bf16 %v640_v59, %v639_v58 }
 0x5b3   :  { %6490 = vmatmul.mubr.msk.bf16.vlgmr.msra.gmra.mrb[4].mxu1 %vm617_vm9, %v641_v63  ;;  %v1256_v17 = vpop.permute.xlu1 %1255 }
 0x5b4   :  { %6494 = vmatpush3.bf16.xpose.msra.mxu1 %v701_v3  ;;  %6495 = vmatprep.mubr.msk.bf16.mxu1 %vm7333_vm0, %v7332_v1 }
 0x5b5   :  { %6505 = vmatprep.subr.bf16.mxu1 %v7332_v1 }
 0x5b7   :  { %v1381_v20 = vpop.permute.xlu1 %1380 }
 0x5bb   :  { %6496 = vmatmul.mubr.msk.bf16.vlgmr.msra.gmra.mrb[8].mxu1 %vm567_vm8, %v694_v2  ;;  %v1506_v22 = vpop.permute.xlu1 %1505 }
 0x5bc   :  { %6506 = vmatpush3.bf16.xpose.msra.mxu1 %v827_v5  ;;  %6507 = vmatprep.mubr.msk.bf16.mxu1 %vm7333_vm0, %v7332_v1 }
 0x5bd   :  { %6517 = vmatprep.subr.bf16.mxu1 %v7332_v1 }
 0x5c3   :  { %6508 = vmatmul.mubr.msk.bf16.vlgmr.msra.gmra.mrb[12].mxu1 %vm567_vm8, %v820_v7 }
 0x5c4   :  { %6518 = vmatpush3.bf16.xpose.msra.mxu1 %v952_v8  ;;  %6519 = vmatprep.mubr.msk.bf16.mxu1 %vm7333_vm0, %v7332_v1 }
 0x5c5   :  { %6529 = vmatprep.subr.bf16.mxu1 %v7332_v1 }
 0x5cb   :  { %6520 = vmatmul.mubr.msk.bf16.vlgmr.msra.gmra.mrb[16].mxu1 %vm567_vm8, %v945_v11 }
 0x5cc   :  { %6530 = vmatpush3.bf16.xpose.msra.mxu1 %v1124_v12  ;;  %6531 = vmatprep.mubr.msk.bf16.mxu1 %vm7333_vm0, %v7332_v1 }
 0x5cd   :  { %6541 = vmatprep.subr.bf16.mxu1 %v7332_v1 }
 0x5d3   :  { %6532 = vmatmul.mubr.msk.bf16.vlgmr.msra.gmra.mrb[20].mxu1 %vm567_vm8, %v7659_v30 }
 0x5d4   :  { %6542 = vmatpush3.bf16.xpose.msra.mxu1 %v1263_v14  ;;  %6543 = vmatprep.mubr.msk.bf16.mxu1 %vm7333_vm0, %v7332_v1 }
 0x5d5   :  { %6553 = vmatprep.subr.bf16.mxu1 %v7332_v1 }
 0x5db   :  { %6544 = vmatmul.mubr.msk.bf16.vlgmr.msra.gmra.mrb[24].mxu1 %vm567_vm8, %v1256_v17 }
 0x5dc   :  { %6554 = vmatpush3.bf16.xpose.msra.mxu1 %v1388_v18  ;;  %6555 = vmatprep.mubr.msk.bf16.mxu1 %vm7333_vm0, %v7332_v1 }
 0x5dd   :  { %6565 = vmatprep.subr.bf16.mxu1 %v7332_v1 }
 0x5e3   :  { %6556 = vmatmul.mubr.msk.bf16.vlgmr.msra.gmra.mrb[28].mxu1 %vm567_vm8, %v1381_v20 }
 0x5e4   :  { %6566 = vmatpush3.bf16.xpose.msra.mxu1 %v1513_v21  ;;  %6567 = vmatprep.mubr.msk.bf16.mxu1 %vm7333_vm0, %v7332_v1 }
 0x5eb   :  { %6568 = vmatmul.mubr.msk.bf16.vlgmr.msra.gmra.mrb[32].mxu1 %vm567_vm8, %v1506_v22 }
 0x686   :  { %v7725_v23 = vpop.f32.mrb[4].mxu1 }
 0x687   :  { %v6491_v24 = vpop.f32.mrb[5].mxu1 }
 0x688   :  { %v7727_v25 = vpop.f32.mrb[6].mxu1 }
 0x689   :  { %v6492_v26 = vpop.f32.mrb[7].mxu1 }
 0x68e   :  { %v737_v28 = vpop.f32.mrb[8].mxu1 }
 0x68f   :  { %v7729_v29 = vmul.f32 0.25, %v737_v28  ;;  %v6497_v30 = vpop.f32.mrb[9].mxu1 }
 0x690   :  { %v740_v31 = vpop.f32.mrb[10].mxu1 }
 0x691   :  { %v7731_v32 = vmul.f32 0.25, %v740_v31  ;;  %v6498_v33 = vpop.f32.mrb[11].mxu1  ;;  %v746_v34 = vsel %vm617_vm9, %v7729_v29, -inf }
 0x692   :  { %747 = vmax.xlane.f32.xlu0 %v746_v34 }
 0x693   :  { %v749_v35 = vsel %vm621_vm10, %v7731_v32, -inf }
 0x694   :  { %750 = vmax.xlane.f32.xlu1 %v749_v35 }
 0x696   :  { %v863_v36 = vpop.f32.mrb[12].mxu1 }
 0x697   :  { %v7737_v38 = vmul.f32 0.25, %v863_v36  ;;  %v6509_v39 = vpop.f32.mrb[13].mxu1 }
 0x698   :  { %v866_v40 = vpop.f32.mrb[14].mxu1 }
 0x699   :  { %v7739_v41 = vmul.f32 0.25, %v866_v40  ;;  %v6510_v42 = vpop.f32.mrb[15].mxu1  ;;  %v872_v43 = vsel %vm617_vm9, %v7737_v38, -inf }
 0x69a   :  { %873 = vmax.xlane.f32.xlu0 %v872_v43 }
 0x69b   :  { %v875_v44 = vsel %vm621_vm10, %v7739_v41, -inf }
 0x69e   :  { %876 = vmax.xlane.f32.xlu0 %v875_v44  ;;  %v988_v45 = vpop.f32.mrb[16].mxu1 }
 0x69f   :  { %v7745_v46 = vmul.f32 0.25, %v988_v45  ;;  %v6521_v47 = vpop.f32.mrb[17].mxu1 }
 0x6a0   :  { %v991_v48 = vpop.f32.mrb[18].mxu1 }
 0x6a1   :  { %v7747_v49 = vmul.f32 0.25, %v991_v48  ;;  %v6522_v50 = vpop.f32.mrb[19].mxu1  ;;  %v997_v52 = vsel %vm617_vm9, %v7745_v46, -inf }
 0x6a2   :  { %998 = vmax.xlane.f32.xlu0 %v997_v52 }
 0x6a3   :  { %v1000_v53 = vsel %vm621_vm10, %v7747_v49, -inf }
 0x6a4   :  { %1001 = vmax.xlane.f32.xlu1 %v1000_v53 }
 0x6a6   :  { %v1160_v54 = vpop.f32.mrb[20].mxu1 }
 0x6a7   :  { %v7753_v55 = vmul.f32 0.25, %v1160_v54  ;;  %v6533_v57 = vpop.f32.mrb[21].mxu1 }
 0x6a8   :  { %v1163_v58 = vpop.f32.mrb[22].mxu1 }
 0x6a9   :  { %v7755_v59 = vmul.f32 0.25, %v1163_v58  ;;  %v6534_v62 = vpop.f32.mrb[23].mxu1  ;;  %v1169_v63 = vsel %vm617_vm9, %v7753_v55, -inf }
 0x6aa   :  { %1170 = vmax.xlane.f32.xlu0 %v1169_v63 }
 0x6ab   :  { %v1172_v2 = vsel %vm621_vm10, %v7755_v59, -inf }
 0x6ac   :  { %1173 = vmax.xlane.f32.xlu1 %v1172_v2 }
 0x6ae   :  { %v1299_v3 = vpop.f32.mrb[24].mxu1 }
 0x6af   :  { %v7761_v4 = vmul.f32 0.25, %v1299_v3  ;;  %v6545_v5 = vpop.f32.mrb[25].mxu1 }
 0x6b0   :  { %v1302_v6 = vpop.f32.mrb[26].mxu1 }
 0x6b1   :  { %v7763_v7 = vmul.f32 0.25, %v1302_v6  ;;  %v6546_v8 = vpop.f32.mrb[27].mxu1  ;;  %v1308_v9 = vsel %vm617_vm9, %v7761_v4, -inf }
 0x6b2   :  { %1309 = vmax.xlane.f32.xlu0 %v1308_v9 }
 0x6b3   :  { %v1311_v11 = vsel %vm621_vm10, %v7763_v7, -inf }
 0x6b4   :  { %1312 = vmax.xlane.f32.xlu1 %v1311_v11 }
 0x6b6   :  { %v1424_v12 = vpop.f32.mrb[28].mxu1 }
 0x6b7   :  { %v7769_v13 = vmul.f32 0.25, %v1424_v12  ;;  %v6557_v14 = vpop.f32.mrb[29].mxu1 }
 0x6b8   :  { %v1427_v16 = vpop.f32.mrb[30].mxu1 }
 0x6b9   :  { %v7771_v17 = vmul.f32 0.25, %v1427_v16  ;;  %v6558_v18 = vpop.f32.mrb[31].mxu1  ;;  %v1433_v19 = vsel %vm617_vm9, %v7769_v13, -inf }
 0x6ba   :  { %1434 = vmax.xlane.f32.xlu0 %v1433_v19 }
 0x6bb   :  { %v1436_v20 = vsel %vm621_vm10, %v7771_v17, -inf }
 0x6bc   :  { %1437 = vmax.xlane.f32.xlu1 %v1436_v20 }
 0x6be   :  { %v1549_v21 = vpop.f32.mrb[32].mxu1 }
 0x6bf   :  { %v6569_v22 = vpop.f32.mrb[33].mxu1  ;;  %v7785_v31 = vmul.f32 0.25, %v1549_v21 }
 0x6c0   :  { %v1552_v24 = vpop.f32.mrb[34].mxu1 }
 0x6c1   :  { %v7777_v26 = vmul.f32 0.25, %v1552_v24  ;;  %v6570_v28 = vpop.f32.mrb[35].mxu1  ;;  %v1558_v33 = vsel %vm617_vm9, %v7785_v31, -inf }
 0x6c3   :  { %v1561_v30 = vsel %vm621_vm10, %v7777_v26, -inf }
 0x6c4   :  { %1562 = vmax.xlane.f32.xlu1 %v1561_v30 }
 0x6d0   :  { %770 = vrot.lane.b32.xlu0 %v7639_v10, %s7337_s27 }
 0x6d5   :  { %895 = vrot.lane.b32.xlu1 %v7639_v10, %s7339_s28 }
 0x6ef   :  { %1559 = vmax.xlane.f32.xlu0 %v1558_v33 }
 0x71f   :  { %v748_v34 = vpop.xlane.xlu0 %747 }
 0x720   :  { %v752_v35 = vsub.f32 %v7729_v29, %v748_v34 }
 0x721   :  { %v751_v36 = vpop.xlane.xlu1 %750 }
 0x722   :  { %v754_v39 = vmul.f32 1.442695, %v752_v35  ;;  %v753_v40 = vsub.f32 %v7731_v32, %v751_v36 }
 0x724   :  { %7076 = vpow2.f32 %v754_v39  ;;  %v756_v42 = vmul.f32 1.442695, %v753_v40 }
 0x726   :  { %7078 = vpow2.f32 %v756_v42 }
 0x727   :  { %v874_v43 = vpop.xlane.xlu0 %873 }
 0x728   :  { %v878_v44 = vsub.f32 %v7737_v38, %v874_v43 }
 0x72a   :  { %v880_v45 = vmul.f32 1.442695, %v878_v44 }
 0x72b   :  { %v877_v47 = vpop.xlane.xlu0 %876 }
 0x72c   :  { %7080 = vpow2.f32 %v880_v45  ;;  %v879_v48 = vsub.f32 %v7739_v41, %v877_v47 }
 0x72e   :  { %v7793_v50 = vpop.eup %7076  ;;  %v882_v52 = vmul.f32 1.442695, %v879_v48 }
 0x72f   :  { %v999_v53 = vpop.xlane.xlu0 %998  ;;  %v758_v29 = vsel %vm617_vm9, %v7793_v50, 0.0 }
 0x730   :  { %v7797_v54 = vpop.eup %7078  ;;  %7082 = vpow2.f32 %v882_v52  ;;  %v1003_v32 = vsub.f32 %v7745_v46, %v999_v53  ;;  %759 = vadd.xlane.f32.xlu0 %v758_v29 }
 0x731   :  { %v1002_v57 = vpop.xlane.xlu1 %1001  ;;  %v761_v38 = vsel %vm621_vm10, %v7797_v54, 0.0 }
 0x732   :  { %v1005_v58 = vmul.f32 1.442695, %v1003_v32  ;;  %v1004_v41 = vsub.f32 %v7747_v49, %v1002_v57  ;;  %762 = vadd.xlane.f32.xlu1 %v761_v38  ;;  %v563_v32 = vpack.c.bf16 %v7645_v15, %v7645_v15 }
 0x734   :  { %7084 = vpow2.f32 %v1005_v58  ;;  %v1007_v62 = vmul.f32 1.442695, %v1004_v41  ;;  %v1200_v41 = vshrl.u32 %v563_v32, 16 }
 0x736   :  { %v7803_v63 = vpop.eup %7080  ;;  %7086 = vpow2.f32 %v1007_v62  ;;  %v1203_v62 = vshll.u32 %v563_v32, 16 }
 0x737   :  { %v1171_v2 = vpop.xlane.xlu0 %1170  ;;  %v884_v3 = vsel %vm617_vm9, %v7803_v63, 0.0 }
 0x738   :  { %v1175_v46 = vsub.f32 %v7753_v55, %v1171_v2  ;;  %885 = vadd.xlane.f32.xlu0 %v884_v3  ;;  %v1192_v3 = vshrl.u32 %v7639_v10, 16 }
 0x739   :  { %v1174_v5 = vpop.xlane.xlu1 %1173 }
 0x73a   :  { %v7808_v6 = vpop.eup %7082  ;;  %v1177_v8 = vmul.f32 1.442695, %v1175_v46  ;;  %v1176_v9 = vsub.f32 %v7755_v59, %v1174_v5  ;;  %v1195_v46 = vshll.u32 %v7639_v10, 16  ;;  %v1202_v5 = vrot.slane %v1200_v41, 4 }
 0x73b   :  { %v887_v49 = vsel %vm621_vm10, %v7808_v6, 0.0 }
 0x73c   :  { %7088 = vpow2.f32 %v1177_v8  ;;  %v1179_v11 = vmul.f32 1.442695, %v1176_v9  ;;  %888 = vadd.xlane.f32.xlu1 %v887_v49  ;;  %v1205_v8 = vrot.slane %v1203_v62, 5  ;;  %v1194_v9 = vrot.slane %v1192_v3, 4 }
 0x73d   :  { %v1197_v49 = vrot.slane %v1195_v46, 5 }
 0x73e   :  { %v7813_v12 = vpop.eup %7084  ;;  %7090 = vpow2.f32 %v1179_v11  ;;  %v1206_v15 = vor.u32 %v1205_v8, %v1202_v5 }
 0x73f   :  { %v1009_v14 = vsel %vm617_vm9, %v7813_v12, 0.0  ;;  %v1310_v19 = vpop.xlane.xlu0 %1309  ;;  %v1198_v11 = vor.u32 %v1197_v49, %v1194_v9 }
 0x740   :  { %v7817_v55 = vpop.eup %7086  ;;  %1010 = vadd.xlane.f32.xlu0 %v1009_v14  ;;  %v1314_v47 = vsub.f32 %v7761_v4, %v1310_v19 }
 0x741   :  { %v1313_v16 = vpop.xlane.xlu1 %1312  ;;  %v1012_v18 = vsel %vm621_vm10, %v7817_v55, 0.0 }
 0x742   :  { %v1315_v59 = vsub.f32 %v7763_v7, %v1313_v16  ;;  %1013 = vadd.xlane.f32.xlu1 %v1012_v18  ;;  %v1316_v48 = vmul.f32 1.442695, %v1314_v47 }
 0x744   :  { %v1318_v20 = vmul.f32 1.442695, %v1315_v59 }
 0x746   :  { %v7822_v21 = vpop.eup %7088  ;;  %7092 = vpow2.f32 %v1318_v20 }
 0x747   :  { %v1435_v22 = vpop.xlane.xlu0 %1434  ;;  %v1181_v24 = vsel %vm617_vm9, %v7822_v21, 0.0 }
 0x748   :  { %v7826_v28 = vpop.eup %7090  ;;  %v1439_v30 = vsub.f32 %v7769_v13, %v1435_v22  ;;  %1182 = vadd.xlane.f32.xlu1 %v1181_v24 }
 0x749   :  { %v1438_v33 = vpop.xlane.xlu1 %1437  ;;  %v1184_v36 = vsel %vm621_vm10, %v7826_v28, 0.0 }
 0x74a   :  { %v1441_v34 = vmul.f32 1.442695, %v1439_v30  ;;  %v1440_v35 = vsub.f32 %v7771_v17, %v1438_v33 }
 0x74b   :  { %v771_v7 = vpop.permute.xlu0 %770 }
 0x74c   :  { %7094 = vpow2.f32 %v1441_v34  ;;  %v1443_v39 = vmul.f32 1.442695, %v1440_v35  ;;  %v776_v40 = vand.u32 %v771_v7, %v7637_v37  ;;  %1185 = vadd.xlane.f32.xlu1 %v1184_v36 }
 0x74e   :  { %7096 = vpow2.f32 %v1443_v39  ;;  %6500 = vmatpush3.bf16.msra.mxu0 %v776_v40 }
 0x74f   :  { %6511 = vmatprep.subr.bf16.mxu0 %v7332_v1  ;;  %7098 = vpow2.f32 %v1316_v48 }
 0x750   :  { %v7834_v42 = vpop.eup %7092 }
 0x751   :  { %v1323_v13 = vsel %vm621_vm10, %v7834_v42, 0.0  ;;  %v1563_v29 = vpop.xlane.xlu1 %1562 }
 0x752   :  { %1324 = vadd.xlane.f32.xlu1 %v1323_v13  ;;  %v1565_v57 = vsub.f32 %v7777_v26, %v1563_v29  ;;  %v1207_v26 = vsel %vm1101_vm7, %v1198_v11, %v1206_v15 }
 0x754   :  { %v1568_v4 = vmul.f32 1.442695, %v1565_v57 }
 0x755   :  { %v896_v18 = vpop.permute.xlu1 %895 }
 0x756   :  { %v7838_v17 = vpop.eup %7094  ;;  %1020 = vrot.lane.b32.xlu0 %v7639_v10, %s9117_s4  ;;  %v901_v36 = vand.u32 %v896_v18, %v7637_v37 }
 0x757   :  { %v1445_v43 = vsel %vm617_vm9, %v7838_v17, 0.0 }
 0x758   :  { %v7844_v44 = vpop.eup %7096  ;;  %1446 = vadd.xlane.f32.xlu1 %v1445_v43 }
 0x759   :  { %v1448_v45 = vsel %vm621_vm10, %v7844_v44, 0.0  ;;  %v7849_v52 = vpop.eup %7098 }
 0x75a   :  { %v1320_v53 = vsel %vm617_vm9, %v7849_v52, 0.0 }
 0x75c   :  { %1449 = vadd.xlane.f32.xlu1 %v1448_v45 }
 0x775   :  { %1321 = vadd.xlane.f32.xlu0 %v1320_v53 }
 0x77c   :  { %v1560_v38 = vpop.xlane.xlu0 %1559 }
 0x77d   :  { %v1564_v58 = vsub.f32 %v7785_v31, %v1560_v38  ;;  %v1212_v38 = vand.u32 %v1207_v26, %v7637_v37 }
 0x77f   :  { %v1566_v2 = vmul.f32 1.442695, %v1564_v58 }
 0x781   :  { %7100 = vpow2.f32 %v1566_v2 }
 0x782   :  { %7102 = vpow2.f32 %v1568_v4 }
 0x78b   :  { %v7860_v14 = vpop.eup %7100  ;;  %1331 = vrot.lane.b32.xlu0 %v1207_v26, %s7337_s27 }
 0x78c   :  { %v1570_v31 = vsel %vm617_vm9, %v7860_v14, 0.0  ;;  %v7865_v16 = vpop.eup %7102 }
 0x78d   :  { %1571 = vadd.xlane.f32.xlu1 %v1570_v31  ;;  %v1573_v10 = vsel %vm621_vm10, %v7865_v16, 0.0 }
 0x78f   :  { %1581 = vrot.lane.b32.xlu0 %v1207_v26, %s9117_s4 }
 0x791   :  { %1574 = vadd.xlane.f32.xlu1 %v1573_v10 }
 0x7a2   :  { %1456 = vrot.lane.b32.xlu1 %v1207_v26, %s7339_s28 }
 0x7bd   :  { %v760_v59 = vpop.xlane.xlu0 %759 }
 0x7be   :  { %7104 = vrcp.f32 %v760_v59 }
 0x7bf   :  { %v763_v19 = vpop.xlane.xlu1 %762 }
 0x7c0   :  { %7106 = vrcp.f32 %v763_v19 }
 0x7c5   :  { %v886_v20 = vpop.xlane.xlu0 %885 }
 0x7c6   :  { %7108 = vrcp.f32 %v886_v20 }
 0x7c8   :  { %v7105_v22 = vpop.eup %7104 }
 0x7c9   :  { %v889_v24 = vpop.xlane.xlu1 %888  ;;  %v766_v33 = vmul.f32 %v7105_v22, %v7793_v50 }
 0x7ca   :  { %v7107_v30 = vpop.eup %7106  ;;  %7110 = vrcp.f32 %v889_v24 }
 0x7cb   :  { %v767_v34 = vmul.f32 %v7107_v30, %v7797_v54 }
 0x7cd   :  { %v1011_v35 = vpop.xlane.xlu0 %1010  ;;  %v768_v7 = vpack.c.bf16 %v767_v34, %v766_v33 }
 0x7ce   :  { %7112 = vrcp.f32 %v1011_v35 }
 0x7cf   :  { %v1014_v39 = vpop.xlane.xlu1 %1013  ;;  %6502 = vmatmul.mubr.msk.bf16.vlgmr.msra.gmra.mrb[16].mxu0 %vm617_vm9, %v768_v7 }
 0x7d0   :  { %7114 = vrcp.f32 %v1014_v39  ;;  %6512 = vmatpush3.bf16.msra.mxu0 %v901_v36  ;;  %6513 = vmatprep.mubr.msk.bf16.mxu0 %vm7333_vm0, %v7332_v1  ;;  %v7109_v40 = vpop.eup %7108 }
 0x7d1   :  { %6523 = vmatprep.subr.bf16.mxu0 %v7332_v1  ;;  %v892_v50 = vmul.f32 %v7109_v40, %v7803_v63  ;;  %v1021_v43 = vpop.permute.xlu0 %1020 }
 0x7d2   :  { %v1026_v48 = vand.u32 %v1021_v43, %v7637_v37 }
 0x7d4   :  { %v7111_v13 = vpop.eup %7110 }
 0x7d5   :  { %v893_v54 = vmul.f32 %v7111_v13, %v7808_v6  ;;  %v1183_v45 = vpop.xlane.xlu1 %1182 }
 0x7d6   :  { %7116 = vrcp.f32 %v1183_v45 }
 0x7d7   :  { %v894_v47 = vpack.c.bf16 %v893_v54, %v892_v50 }
 0x7d8   :  { %v7113_v53 = vpop.eup %7112 }
 0x7d9   :  { %v1186_v29 = vpop.xlane.xlu1 %1185  ;;  %6514 = vmatmul.mubr.msk.bf16.vlgmr.msra.gmra.mrb[20].mxu0 %vm617_vm9, %v894_v47  ;;  %v1017_v6 = vmul.f32 %v7113_v53, %v7813_v12 }
 0x7da   :  { %v7115_v32 = vpop.eup %7114  ;;  %7118 = vrcp.f32 %v1186_v29  ;;  %6524 = vmatpush3.bf16.msra.mxu0 %v1026_v48  ;;  %6525 = vmatprep.mubr.msk.bf16.mxu0 %vm7333_vm0, %v7332_v1 }
 0x7db   :  { %v1018_v63 = vmul.f32 %v7115_v32, %v7817_v55  ;;  %6535 = vmatprep.subr.bf16.mxu0 %v7332_v1 }
 0x7dd   :  { %v1019_v57 = vpack.c.bf16 %v1018_v63, %v1017_v6 }
 0x7df   :  { %v1325_v12 = vpop.xlane.xlu1 %1324 }
 0x7e0   :  { %v7117_v58 = vpop.eup %7116  ;;  %7120 = vrcp.f32 %v1325_v12 }
 0x7e1   :  { %6526 = vmatmul.mubr.msk.bf16.vlgmr.msra.gmra.mrb[24].mxu0 %vm617_vm9, %v1019_v57  ;;  %v1189_v62 = vmul.f32 %v7117_v58, %v7822_v21 }
 0x7e2   :  { %6536 = vmatpush3.bf16.msra.mxu0 %v1212_v38  ;;  %6537 = vmatprep.mubr.msk.bf16.mxu0 %vm7333_vm0, %v7332_v1 }
 0x7e3   :  { %6547 = vmatprep.subr.bf16.mxu0 %v7332_v1 }
 0x7e4   :  { %v7119_v41 = vpop.eup %7118 }
 0x7e5   :  { %v1190_v55 = vmul.f32 %v7119_v41, %v7826_v28  ;;  %v1447_v21 = vpop.xlane.xlu1 %1446 }
 0x7e7   :  { %v1191_v4 = vpack.c.bf16 %v1190_v55, %v1189_v62  ;;  %v6942_v62 = vld [vmem:[%s9102_s10] sm:$0xff]   ;;  %v6943_v55 = vld [vmem:[%s9102_s10 + $0x8] sm:$0xff]  }
 0x7e8   :  { %6577 = vmatprep.subr.bf16.mxu1 %v6942_v62 }
 0x7e9   :  { %6538 = vmatmul.mubr.msk.bf16.vlgmr.msra.gmra.mrb[28].mxu0 %vm617_vm9, %v1191_v4  ;;  %v1450_v15 = vpop.xlane.xlu1 %1449  ;;  %6578 = vmatpush3.bf16.msra.mxu1 %v6942_v62 }
 0x7ea   :  { %6549 = vmatprep.mubr.msk.bf16.mxu0 %vm7333_vm0, %v7332_v1  ;;  %v7121_v5 = vpop.eup %7120  ;;  %6579 = vmatprep.subr.bf16.mxu1 %v6943_v55 }
 0x7eb   :  { %v1329_v28 = vmul.f32 %v7121_v5, %v7834_v42 }
 0x7ed   :  { %6580 = vmatpush3.bf16.msra.mxu1 %v6943_v55 }
 0x802   :  { %v1322_v2 = vpop.xlane.xlu0 %1321 }
 0x803   :  { %7122 = vrcp.f32 %v1322_v2 }
 0x804   :  { %7124 = vrcp.f32 %v1450_v15 }
 0x805   :  { %7126 = vrcp.f32 %v1447_v21  ;;  %v6945_v21 = vld [vmem:[%s9102_s10 + $0x18] sm:$0xff]  }
 0x806   :  { %v1332_v3 = vpop.permute.xlu0 %1331 }
 0x807   :  { %v1337_v46 = vand.u32 %v1332_v3, %v7637_v37  ;;  %v6944_v3 = vld [vmem:[%s9102_s10 + $0x10] sm:$0xff]  }
 0x808   :  { %6581 = vmatprep.subr.bf16.mxu1 %v6944_v3 }
 0x809   :  { %6548 = vmatpush3.bf16.msra.mxu0 %v1337_v46  ;;  %6582 = vmatpush3.bf16.msra.mxu1 %v6944_v3 }
 0x80a   :  { %6559 = vmatprep.subr.bf16.mxu0 %v7332_v1  ;;  %v1582_v19 = vpop.permute.xlu0 %1581  ;;  %6583 = vmatprep.subr.bf16.mxu1 %v6945_v21 }
 0x80b   :  { %v1587_v22 = vand.u32 %v1582_v19, %v7637_v37 }
 0x80d   :  { %v7123_v8 = vpop.eup %7122  ;;  %6584 = vmatpush3.bf16.msra.mxu1 %v6945_v21 }
 0x80e   :  { %v1328_v9 = vmul.f32 %v7123_v8, %v7849_v52  ;;  %v7125_v31 = vpop.eup %7124 }
 0x80f   :  { %v7127_v10 = vpop.eup %7126  ;;  %v1454_v18 = vmul.f32 %v7125_v31, %v7844_v44 }
 0x810   :  { %v1330_v49 = vpack.c.bf16 %v1329_v28, %v1328_v9  ;;  %v1453_v59 = vmul.f32 %v7127_v10, %v7838_v17 }
 0x812   :  { %6550 = vmatmul.mubr.msk.bf16.vlgmr.msra.gmra.mrb[32].mxu0 %vm617_vm9, %v1330_v49  ;;  %v1455_v20 = vpack.c.bf16 %v1454_v18, %v1453_v59 }
 0x813   :  { %6561 = vmatprep.mubr.msk.bf16.mxu0 %vm7333_vm0, %v7332_v1 }
 0x81a   :  { %v1572_v11 = vpop.xlane.xlu1 %1571 }
 0x81b   :  { %7128 = vrcp.f32 %v1572_v11 }
 0x81e   :  { %v1575_v26 = vpop.xlane.xlu1 %1574 }
 0x81f   :  { %7130 = vrcp.f32 %v1575_v26 }
 0x822   :  { %v1457_v42 = vpop.permute.xlu1 %1456 }
 0x823   :  { %v1462_v52 = vand.u32 %v1457_v42, %v7637_v37 }
 0x825   :  { %6560 = vmatpush3.bf16.msra.mxu0 %v1462_v52  ;;  %v7129_v24 = vpop.eup %7128 }
 0x826   :  { %6571 = vmatprep.subr.bf16.mxu0 %v7332_v1  ;;  %v1578_v33 = vmul.f32 %v7129_v24, %v7860_v14 }
 0x828   :  { %6562 = vmatmul.mubr.msk.bf16.vlgmr.msra.gmra.mrb[36].mxu0 %vm617_vm9, %v1455_v20 }
 0x829   :  { %v7131_v30 = vpop.eup %7130  ;;  %6572 = vmatpush3.bf16.msra.mxu0 %v1587_v22  ;;  %6573 = vmatprep.mubr.msk.bf16.mxu0 %vm7333_vm0, %v7332_v1 }
 0x82a   :  { %v1579_v44 = vmul.f32 %v7131_v30, %v7865_v16 }
 0x82c   :  { %v1580_v17 = vpack.c.bf16 %v1579_v44, %v1578_v33 }
 0x830   :  { %6574 = vmatmul.mubr.msk.bf16.vlgmr.msra.gmra.mrb[40].mxu0 %vm617_vm9, %v1580_v17 }
 0x831   :  { %1925 = vmatprep.mubr.bf16.mxu0 %v7334_v27 }
 0x8a2   :  { %v812_v34 = vpop.f32.mrb[16].mxu0 }
 0x8a3   :  { %v6503_v35 = vpop.f32.mrb[17].mxu0 }
 0x8a4   :  { %v815_v7 = vpop.f32.mrb[18].mxu0 }
 0x8a5   :  { %v6816_v36 = vpack.i.bf16 %v812_v34, %v815_v7  ;;  %v6504_v39 = vpop.f32.mrb[19].mxu0 }
 0x8a7   :  { %6817 = vrot.lane.b32.xlu0 %v6816_v36, %s9115_s30 }
 0x8ac   :  { %v937_v40 = vpop.f32.mrb[20].mxu0 }
 0x8ad   :  { %v6515_v13 = vpop.f32.mrb[21].mxu0 }
 0x8ae   :  { %v940_v50 = vpop.f32.mrb[22].mxu0 }
 0x8af   :  { %v6831_v54 = vpack.i.bf16 %v937_v40, %v940_v50  ;;  %v6516_v43 = vpop.f32.mrb[23].mxu0 }
 0x8b4   :  { %v1062_v16 = vpop.f32.mrb[24].mxu0 }
 0x8b5   :  { %v6527_v45 = vpop.f32.mrb[25].mxu0 }
 0x8b6   :  { %v1065_v14 = vpop.f32.mrb[26].mxu0 }
 0x8b7   :  { %v6841_v47 = vpack.i.bf16 %v1062_v16, %v1065_v14  ;;  %v6528_v48 = vpop.f32.mrb[27].mxu0 }
 0x8bc   :  { %v1248_v53 = vpop.f32.mrb[28].mxu0 }
 0x8bd   :  { %v6539_v29 = vpop.f32.mrb[29].mxu0 }
 0x8be   :  { %v1251_v32 = vpop.f32.mrb[30].mxu0 }
 0x8bf   :  { %v6540_v63 = vpop.f32.mrb[31].mxu0 }
 0x8e5   :  { %v1373_v6 = vpop.f32.mrb[32].mxu0 }
 0x8e6   :  { %v6551_v57 = vpop.f32.mrb[33].mxu0 }
 0x8e7   :  { %v1376_v38 = vpop.f32.mrb[34].mxu0 }
 0x8e8   :  { %v6821_v58 = vpack.i.bf16 %v1376_v38, %v1373_v6  ;;  %v6552_v41 = vpop.f32.mrb[35].mxu0 }
 0x8ea   :  { %6822 = vrot.lane.b32.xlu0 %v6821_v58, %s9115_s30 }
 0x8fb   :  { %v1498_v4 = vpop.f32.mrb[36].mxu0 }
 0x8fc   :  { %v6563_v12 = vpop.f32.mrb[37].mxu0 }
 0x8fd   :  { %v1501_v2 = vpop.f32.mrb[38].mxu0 }
 0x8fe   :  { %v6826_v46 = vpack.i.bf16 %v1501_v2, %v1498_v4  ;;  %v6564_v5 = vpop.f32.mrb[39].mxu0 }
 0x900   :  { %6827 = vrot.lane.b32.xlu0 %v6826_v46, %s7338_s0 }
 0x903   :  { %v1623_v8 = vpop.f32.mrb[40].mxu0 }
 0x904   :  { %6832 = vrot.lane.b32.xlu0 %v6831_v54, %s7338_s0  ;;  %v6575_v28 = vpop.f32.mrb[41].mxu0 }
 0x905   :  { %v1626_v9 = vpop.f32.mrb[42].mxu0 }
 0x906   :  { %v6836_v49 = vpack.i.bf16 %v1626_v9, %v1623_v8  ;;  %v6576_v15 = vpop.f32.mrb[43].mxu0 }
 0x908   :  { %6837 = vrot.lane.b32.xlu1 %v6836_v49, %s7341_s29 }
 0x90c   :  { %6842 = vrot.lane.b32.xlu1 %v6841_v47, %s7341_s29 }
 0x919   :  { %v6818_v11 = vpop.permute.xlu0 %6817 }
 0x91a   :  { %v6820_v19 = vunpack.i.h.bf16 %v6818_v11  ;;  %v6819_v20 = vunpack.i.l.bf16 %v6818_v11 }
 0x91c   :  { %v1093_v54 = vsel %vm567_vm8, %v7725_v23, %v6820_v19  ;;  %v1094_v43 = vsel %vm567_vm8, %v7727_v25, %v6819_v20  ;;  %v5938_v23 = vld [vmem:[%s9103_s11] ss:$0 sm:$0xff]  ;;  %v6948_v20 = vld [vmem:[%s9104_s14 + $0x4] ss:$8 sps:$4 sm:$0xff]  }
 0x91d   :  { %1893 = vmatprep.subr.bf16.mxu0 %v6948_v20 }
 0x95c   :  { %v6823_v26 = vpop.permute.xlu0 %6822 }
 0x95d   :  { %v6825_v10 = vunpack.i.h.bf16 %v6823_v26  ;;  %v6824_v18 = vunpack.i.l.bf16 %v6823_v26 }
 0x95f   :  { %v1655_v24 = vsel %vm567_vm8, %v1251_v32, %v6825_v10  ;;  %v1654_v30 = vsel %vm567_vm8, %v1248_v53, %v6824_v18 }
 0x972   :  { %v6828_v31 = vpop.permute.xlu0 %6827 }
 0x973   :  { %v6830_v42 = vunpack.i.h.bf16 %v6828_v31  ;;  %v6829_v52 = vunpack.i.l.bf16 %v6828_v31 }
 0x975   :  { %v1656_v17 = vsel %vm1095_vm11, %v1654_v30, %v6829_v52  ;;  %v1657_v34 = vsel %vm1095_vm11, %v1655_v24, %v6830_v42  ;;  %v6951_v24 = vld [vmem:[%s9104_s14 + $0x14] ss:$8 sps:$4 sm:$0xff]   ;;  %v6949_v30 = vld [vmem:[%s9104_s14 + $0x10] ss:$8 sps:$4 sm:$0xff]  }
 0x976   :  { %v6833_v59 = vpop.permute.xlu0 %6832 }
 0x977   :  { %v6835_v35 = vunpack.i.h.bf16 %v6833_v59  ;;  %v6834_v7 = vunpack.i.l.bf16 %v6833_v59 }
 0x979   :  { %v1096_v14 = vsel %vm1095_vm11, %v1093_v54, %v6835_v35  ;;  %v1097_v47 = vsel %vm1095_vm11, %v1094_v43, %v6834_v7 }
 0x97a   :  { %v6838_v22 = vpop.permute.xlu1 %6837 }
 0x97b   :  { %v6840_v44 = vunpack.i.h.bf16 %v6838_v22  ;;  %v6839_v33 = vunpack.i.l.bf16 %v6838_v22  ;;  %v6946_v22 = vld [vmem:[%s9104_s14] ss:$8 sps:$4 sm:$0xff]  }
 0x97c   :  { %1894 = vmatpush1.bf16.msra.mxu0 %v6946_v22 }
 0x97d   :  { %v1658_v36 = vsel %vm1098_vm12, %v1656_v17, %v6839_v33  ;;  %v1659_v39 = vsel %vm1098_vm12, %v1657_v34, %v6840_v44  ;;  %1895 = vmatprep.subr.bf16.mxu0 %v6951_v24  ;;  %v6954_v44 = vld [vmem:[%s9104_s14 + $0x24] ss:$8 sps:$4 sm:$0xff]   ;;  %v6952_v33 = vld [vmem:[%s9104_s14 + $0x20] ss:$8 sps:$4 sm:$0xff]   ;;  %v6955_v17 = vld [vmem:[%s9104_s14 + $0x30] ss:$8 sps:$4 sm:$0xff]  }
 0x97e   :  { %v1662_v40 = vrot.slane %v1658_v36, 7  ;;  %v1663_v13 = vrot.slane %v1659_v39, 7  ;;  %v6843_v50 = vpop.permute.xlu1 %6842  ;;  %v6957_v34 = vld [vmem:[%s9104_s14 + $0x34] ss:$8 sps:$4 sm:$0xff]  }
 0x97f   :  { %v6845_v16 = vunpack.i.h.bf16 %v6843_v50  ;;  %v6844_v45 = vunpack.i.l.bf16 %v6843_v50 }
 0x980   :  { %v1664_v48 = vsel %vm374_vm1, %v1662_v40, %v1663_v13  ;;  %1896 = vmatpush1.bf16.msra.mxu0 %v6949_v30 }
 0x981   :  { %v1099_v53 = vsel %vm1098_vm12, %v1096_v14, %v6845_v16  ;;  %v1100_v29 = vsel %vm1098_vm12, %v1097_v47, %v6844_v45  ;;  %v1669_v6 = vpack.c.bf16 %v1664_v48, %v1664_v48  ;;  %1897 = vmatprep.subr.bf16.mxu0 %v6954_v44  ;;  %v5945_v14 = vld [vmem:[%s9105_s12] ss:$0 sm:$0xff] }
 0x982   :  { %v1667_v32 = vsel %vm374_vm1, %v1100_v29, %v1662_v40 }
 0x983   :  { %v1668_v63 = vpack.c.bf16 %v1667_v32, %v1099_v53  ;;  %v5946_v32 = vld [vmem:[%s9106_s13] ss:$0 sm:$0xff] }
 0x984   :  { %1898 = vmatpush1.bf16.msra.mxu0 %v6952_v33 }
 0x985   :  { %6585 = vmatprep.mubr.msk.bf16.mxu1 %vm381_vm2, %v1668_v63  ;;  %1899 = vmatprep.subr.bf16.mxu0 %v6957_v34 }
 0x986   :  { %6586 = vmatmul.mubr.msk.bf16.vlgmr.msra.gmra.mrb[36].mxu1 %vm381_vm2, %v1669_v6 }
 0x988   :  { %1900 = vmatpush1.bf16.msra.mxu0 %v6955_v17 }
 0xa59   :  { %v6587_v25 = vpop.f32.mrb[36].mxu1 }
 0xa5a   :  { %v1749_v57 = vpop.f32.mrb[37].mxu1  ;;  %v1758_v38 = vadd.f32 %v6587_v25, %v5938_v23 }
 0xa5b   :  { %v1750_v58 = vadd.f32 %v5938_v23, %v1749_v57  ;;  %v6588_v41 = vpop.f32.mrb[38].mxu1 }
 0xa5c   :  { %v1752_v62 = vpop.f32.mrb[39].mxu1  ;;  %v7959_v12 = vadd.f32 %v1758_v38, %v7569_v60 }
 0xa5d   :  { %v7956_v55 = vadd.f32 %v1750_v58, %v7572_v61  ;;  %v1753_v4 = vadd.f32 %v5938_v23, %v1752_v62  ;;  %v6958_v62 = vld [vmem:[%s9107_s16 + $0x40] sm:$0xff]  }
 0xa5e   :  { %v1774_v5 = vsel %vm388_vm4, %v7959_v12, 0.0  ;;  %6301 = vmatprep.subr.bf16.mxu1 %v6958_v62 }
 0xa5f   :  { %v7962_v2 = vadd.f32 %v1753_v4, %v7578_v0  ;;  %v1768_v3 = vsel %vm381_vm2, %v7956_v55, 0.0  ;;  %v6959_v4 = vld [vmem:[%s9107_s16] sm:$0xff]  }
 0xa60   :  { %1769 = vadd.xlane.f32.xlu0 %v1768_v3  ;;  %6302 = vmatpush3.bf16.msra.mxu1 %v6959_v4  ;;  %v6960_v3 = vld [vmem:[%s9107_s16 + $0x48] sm:$0xff]  }
 0xa61   :  { %v1771_v46 = vsel %vm381_vm2, %v7962_v2, 0.0  ;;  %6303 = vmatprep.subr.bf16.mxu1 %v6960_v3 }
 0xa62   :  { %1772 = vadd.xlane.f32.xlu1 %v1771_v46  ;;  %v6961_v46 = vld [vmem:[%s9107_s16 + $0x8] sm:$0xff]  }
 0xa64   :  { %1775 = vadd.xlane.f32.xlu0 %v1774_v5  ;;  %6304 = vmatpush3.bf16.msra.mxu1 %v6961_v46  ;;  %v6962_v5 = vld [vmem:[%s9107_s16 + $0x50] sm:$0xff]  }
 0xa65   :  { %6305 = vmatprep.subr.bf16.mxu1 %v6962_v5 }
 0xaed   :  { %v1770_v21 = vpop.xlane.xlu0 %1769 }
 0xaee   :  { %v1777_v8 = vmul.f32 0.015625, %v1770_v21  ;;  %v6963_v21 = vld [vmem:[%s9107_s16 + $0x10] sm:$0xff]  }
 0xaef   :  { %v1773_v28 = vpop.xlane.xlu1 %1772  ;;  %6306 = vmatpush3.bf16.msra.mxu1 %v6963_v21 }
 0xaf0   :  { %v1780_v9 = vsub.f32 %v7956_v55, %v1777_v8  ;;  %v1778_v49 = vmul.f32 0.015625, %v1773_v28  ;;  %v6964_v8 = vld [vmem:[%s9107_s16 + $0x58] sm:$0xff]  }
 0xaf1   :  { %v1776_v15 = vpop.xlane.xlu0 %1775  ;;  %v6965_v28 = vld [vmem:[%s9107_s16 + $0x18] sm:$0xff]   ;;  %6307 = vmatprep.subr.bf16.mxu1 %v6964_v8 }
 0xaf2   :  { %v1781_v11 = vsub.f32 %v7962_v2, %v1778_v49  ;;  %v1779_v26 = vmul.f32 0.015625, %v1776_v15  ;;  %v1783_v31 = vmul.f32 %v1780_v9, %v1780_v9  ;;  %v6967_v49 = vld [vmem:[%s9107_s16 + $0x20] sm:$0xff]   ;;  %v6968_v15 = vld [vmem:[%s9107_s16 + $0x68] sm:$0xff]  }
 0xaf3   :  { %6308 = vmatpush3.bf16.msra.mxu1 %v6965_v28 }
 0xaf4   :  { %v1782_v10 = vsub.f32 %v7959_v12, %v1779_v26  ;;  %v1786_v18 = vsel %vm381_vm2, %v1783_v31, 0.0  ;;  %v1784_v42 = vmul.f32 %v1781_v11, %v1781_v11  ;;  %v6970_v26 = vld [vmem:[%s9107_s16 + $0x70] sm:$0xff]  }
 0xaf5   :  { %1787 = vadd.xlane.f32.xlu0 %v1786_v18  ;;  %v6971_v31 = vld [vmem:[%s9107_s16 + $0x30] sm:$0xff]   ;;  %v6973_v18 = vld [vmem:[%s9107_s16 + $0x38] sm:$0xff]  }
 0xaf6   :  { %v1785_v52 = vmul.f32 %v1782_v10, %v1782_v10  ;;  %v1789_v59 = vsel %vm381_vm2, %v1784_v42, 0.0  ;;  %v1835_v42 = vld [vmem:[%s9108_s15] sm:$0x3] }
 0xaf8   :  { %v1792_v19 = vsel %vm388_vm4, %v1785_v52, 0.0  ;;  %v1840_v52 = vrot.slane %v1835_v42, %v7563_v51 }
 0xaf9   :  { %1790 = vadd.xlane.f32.xlu0 %v1789_v59  ;;  %1793 = vadd.xlane.f32.xlu1 %v1792_v19  ;;  %v1844_v59 = vrot.slane %v1835_v42, %v7631_v56 }
 0xb82   :  { %v1788_v35 = vpop.xlane.xlu0 %1787 }
 0xb83   :  { %v1795_v7 = vmul.f32 0.015625, %v1788_v35 }
 0xb85   :  { %v1798_v36 = vadd.f32 1e-06, %v1795_v7 }
 0xb86   :  { %v1794_v39 = vpop.xlane.xlu1 %1793  ;;  %v1791_v40 = vpop.xlane.xlu0 %1790 }
 0xb87   :  { %7132 = vrsqrt.f32 %v1798_v36  ;;  %v1797_v13 = vmul.f32 0.015625, %v1794_v39  ;;  %v1796_v50 = vmul.f32 0.015625, %v1791_v40 }
 0xb89   :  { %v1800_v54 = vadd.f32 1e-06, %v1797_v13  ;;  %v1799_v43 = vadd.f32 1e-06, %v1796_v50 }
 0xb8b   :  { %7134 = vrsqrt.f32 %v1800_v54 }
 0xb8c   :  { %7136 = vrsqrt.f32 %v1799_v43 }
 0xb91   :  { %v7133_v16 = vpop.eup %7132 }
 0xb92   :  { %v1804_v45 = vmul.f32 %v7133_v16, %v1780_v9  ;;  %v6966_v9 = vld [vmem:[%s9107_s16 + $0x60] sm:$0xff]  }
 0xb93   :  { %6309 = vmatprep.subr.bf16.mxu1 %v6966_v9 }
 0xb94   :  { %v1813_v53 = vmul.f32 %v5945_v14, %v1804_v45  ;;  %6310 = vmatpush3.bf16.msra.mxu1 %v6967_v49 }
 0xb95   :  { %v7135_v47 = vpop.eup %7134  ;;  %6311 = vmatprep.subr.bf16.mxu1 %v6968_v15 }
 0xb96   :  { %v7137_v48 = vpop.eup %7136  ;;  %v1806_v6 = vmul.f32 %v7135_v47, %v1782_v10  ;;  %v1822_v23 = vadd.f32 %v5946_v32, %v1813_v53  ;;  %v6972_v10 = vld [vmem:[%s9107_s16 + $0x78] sm:$0xff]  }
 0xb97   :  { %v1805_v29 = vmul.f32 %v7137_v48, %v1781_v11  ;;  %v6969_v11 = vld [vmem:[%s9107_s16 + $0x28] sm:$0xff]  }
 0xb98   :  { %v1815_v38 = vmul.f32 %v5945_v14, %v1806_v6  ;;  %6312 = vmatpush3.bf16.msra.mxu1 %v6969_v11 }
 0xb99   :  { %v1814_v63 = vmul.f32 %v5945_v14, %v1805_v29  ;;  %6313 = vmatprep.subr.bf16.mxu1 %v6970_v26 }
 0xb9a   :  { %v1824_v58 = vadd.f32 %v5946_v32, %v1815_v38 }
 0xb9b   :  { %v1823_v25 = vadd.f32 %v5946_v32, %v1814_v63 }
 0xb9c   :  { %v1826_v41 = vpack.c.bf16 %v1824_v58, %v1824_v58  ;;  %6314 = vmatpush3.bf16.msra.mxu1 %v6971_v31 }
 0xb9d   :  { %v1825_v57 = vpack.c.bf16 %v1823_v25, %v1822_v23  ;;  %6315 = vmatprep.subr.bf16.mxu1 %v6972_v10 }
 0xb9f   :  { %5955 = vmatmul.mubr.msk.bf16.vlgmr.msra.gmra.mrb[44].mxu0 %vm381_vm2, %v1825_v57 }
 0xba0   :  { %1935 = vmatprep.mubr.bf16.mxu0 %v7334_v27  ;;  %6316 = vmatpush3.bf16.msra.mxu1 %v6973_v18 }
 0xba1   :  { %6601 = vmatprep.subr.bf16.mxu1 %v7332_v1 }
 0xba7   :  { %5956 = vmatmul.mubr.msk.bf16.gmra.mrb[48].mxu0 %vm381_vm2, %v1826_v41 }
 0xba8   :  { %2351 = vmatprep.mubr.bf16.mxu0 %v7334_v27 }
 0xc72   :  { %v1927_v19 = vpop.f32.mrb[44].mxu0 }
 0xc73   :  { %v1928_v20 = vadd.f32 %v1927_v19, %v1840_v52  ;;  %v1929_v22 = vpop.f32.mrb[45].mxu0 }
 0xc74   :  { %v1930_v24 = vadd.f32 %v1929_v22, %v1844_v59  ;;  %v1931_v30 = vpop.f32.mrb[46].mxu0 }
 0xc75   :  { %v1950_v44 = vmul.f32 0.044715, %v1928_v20  ;;  %v1932_v33 = vadd.f32 %v1931_v30, %v1840_v52  ;;  %v1933_v17 = vpop.f32.mrb[47].mxu0  ;;  %v1944_v42 = vmul.f32 0.5, %v1928_v20 }
 0xc76   :  { %v1951_v34 = vmul.f32 0.044715, %v1930_v24  ;;  %v1934_v35 = vadd.f32 %v1933_v17, %v1844_v59  ;;  %v1945_v19 = vmul.f32 0.5, %v1930_v24 }
 0xc77   :  { %v1956_v7 = vmul.f32 %v1950_v44, %v1928_v20  ;;  %v1952_v36 = vmul.f32 0.044715, %v1932_v33 }
 0xc78   :  { %v1957_v39 = vmul.f32 %v1951_v34, %v1930_v24  ;;  %v1953_v40 = vmul.f32 0.044715, %v1934_v35  ;;  %v1947_v22 = vmul.f32 0.5, %v1934_v35 }
 0xc79   :  { %v1962_v13 = vmul.f32 %v1956_v7, %v1928_v20  ;;  %v1958_v50 = vmul.f32 %v1952_v36, %v1932_v33 }
 0xc7a   :  { %v1963_v54 = vmul.f32 %v1957_v39, %v1930_v24  ;;  %v1959_v43 = vmul.f32 %v1953_v40, %v1934_v35  ;;  %v1937_v16 = vpop.f32.mrb[48].mxu0 }
 0xc7b   :  { %v1968_v45 = vadd.f32 %v1962_v13, %v1928_v20  ;;  %v1964_v14 = vmul.f32 %v1958_v50, %v1932_v33  ;;  %v1938_v47 = vadd.f32 %v1937_v16, %v1840_v52  ;;  %v1939_v48 = vpop.f32.mrb[49].mxu0  ;;  %v1946_v52 = vmul.f32 0.5, %v1932_v33 }
 0xc7c   :  { %v1965_v53 = vmul.f32 %v1959_v43, %v1934_v35  ;;  %v1940_v29 = vadd.f32 %v1939_v48, %v1844_v59  ;;  %v1941_v32 = vpop.f32.mrb[50].mxu0  ;;  %v1969_v63 = vadd.f32 %v1963_v54, %v1930_v24 }
 0xc7d   :  { %v1974_v6 = vmul.f32 0.7978846, %v1968_v45  ;;  %v1970_v23 = vadd.f32 %v1964_v14, %v1932_v33  ;;  %v1954_v25 = vmul.f32 0.044715, %v1938_v47  ;;  %v1942_v57 = vpop.f32.mrb[51].mxu0  ;;  %v1948_v16 = vmul.f32 0.5, %v1938_v47 }
 0xc7e   :  { %v1955_v38 = vmul.f32 0.044715, %v1940_v29  ;;  %v1971_v58 = vadd.f32 %v1965_v53, %v1934_v35  ;;  %v1975_v41 = vmul.f32 0.7978846, %v1969_v63  ;;  %v1949_v54 = vmul.f32 0.5, %v1940_v29 }
 0xc7f   :  { %7138 = vtanh.f32 %v1974_v6  ;;  %v1976_v62 = vmul.f32 0.7978846, %v1970_v23  ;;  %v1960_v4 = vmul.f32 %v1954_v25, %v1938_v47  ;;  %v5957_v14 = vld [vmem:[%s9109_s17] ss:$0 sm:$0xff] }
 0xc80   :  { %v1961_v3 = vmul.f32 %v1955_v38, %v1940_v29  ;;  %v1977_v46 = vmul.f32 0.7978846, %v1971_v58  ;;  %7140 = vtanh.f32 %v1975_v41 }
 0xc81   :  { %7142 = vtanh.f32 %v1976_v62  ;;  %v1966_v5 = vmul.f32 %v1960_v4, %v1938_v47 }
 0xc82   :  { %7144 = vtanh.f32 %v1977_v46  ;;  %v1967_v21 = vmul.f32 %v1961_v3, %v1940_v29 }
 0xc83   :  { %v1972_v8 = vadd.f32 %v1966_v5, %v1938_v47 }
 0xc84   :  { %v1973_v28 = vadd.f32 %v1967_v21, %v1940_v29 }
 0xc85   :  { %v1978_v9 = vmul.f32 0.7978846, %v1972_v8 }
 0xc86   :  { %v1979_v49 = vmul.f32 0.7978846, %v1973_v28 }
 0xc87   :  { %7146 = vtanh.f32 %v1978_v9 }
 0xc88   :  { %7148 = vtanh.f32 %v1979_v49 }
 0xc89   :  { %v7139_v15 = vpop.eup %7138 }
 0xc8a   :  { %v7141_v11 = vpop.eup %7140  ;;  %v1986_v26 = vadd.f32 1.0, %v7139_v15 }
 0xc8b   :  { %v7143_v31 = vpop.eup %7142  ;;  %v1987_v10 = vadd.f32 1.0, %v7141_v11 }
 0xc8c   :  { %v7145_v18 = vpop.eup %7144  ;;  %v1988_v59 = vadd.f32 1.0, %v7143_v31  ;;  %v1992_v44 = vmul.f32 %v1986_v26, %v1944_v42 }
 0xc8d   :  { %v1989_v30 = vadd.f32 1.0, %v7145_v18  ;;  %v1993_v34 = vmul.f32 %v1987_v10, %v1945_v19  ;;  %v6974_v19 = vld [vmem:[%s9098_s8 + $0x40] ss:$8 sps:$4 sm:$0xff]  }
 0xc8e   :  { %v1994_v17 = vmul.f32 %v1988_v59, %v1946_v52  ;;  %v6976_v59 = vld [vmem:[%s9098_s8 + $0x44] ss:$8 sps:$4 sm:$0xff]  }
 0xc8f   :  { %v1995_v7 = vmul.f32 %v1989_v30, %v1947_v22  ;;  %2319 = vmatprep.subr.bf16.mxu0 %v6976_v59  ;;  %v6979_v22 = vld [vmem:[%s9098_s8 + $0x54] ss:$8 sps:$4 sm:$0xff]   ;;  %v6977_v30 = vld [vmem:[%s9098_s8 + $0x50] ss:$8 sps:$4 sm:$0xff]  }
 0xc90   :  { %v1998_v36 = vpack.c.bf16 %v1994_v17, %v1992_v44  ;;  %2320 = vmatpush1.bf16.msra.mxu0 %v6974_v19  ;;  %v6982_v44 = vld [vmem:[%s9098_s8 + $0x64] ss:$8 sps:$4 sm:$0xff]   ;;  %v6980_v17 = vld [vmem:[%s9098_s8 + $0x60] ss:$8 sps:$4 sm:$0xff]  }
 0xc91   :  { %v7147_v39 = vpop.eup %7146  ;;  %v1999_v40 = vpack.c.bf16 %v1995_v7, %v1993_v34  ;;  %2321 = vmatprep.subr.bf16.mxu0 %v6979_v22  ;;  %v6985_v34 = vld [vmem:[%s9098_s8 + $0x74] ss:$8 sps:$4 sm:$0xff]   ;;  %v6983_v7 = vld [vmem:[%s9098_s8 + $0x70] ss:$8 sps:$4 sm:$0xff]  }
 0xc92   :  { %v7149_v13 = vpop.eup %7148  ;;  %v1990_v50 = vadd.f32 1.0, %v7147_v39 }
 0xc93   :  { %2169 = vmatprep.mubr.bf16.mxu1 %v1999_v40  ;;  %v1991_v43 = vadd.f32 1.0, %v7149_v13 }
 0xc94   :  { %2170 = vmatmul.mubr.bf16.vlgmr.msra.gmra.mrb[40].mxu1 %v1998_v36  ;;  %v1996_v33 = vmul.f32 %v1990_v50, %v1948_v16  ;;  %2322 = vmatpush1.bf16.msra.mxu0 %v6977_v30 }
 0xc95   :  { %v1997_v20 = vmul.f32 %v1991_v43, %v1949_v54  ;;  %2323 = vmatprep.subr.bf16.mxu0 %v6982_v44 }
 0xc96   :  { %v2000_v24 = vpack.c.bf16 %v1996_v33, %v1996_v33 }
 0xc97   :  { %v2001_v45 = vpack.c.bf16 %v1997_v20, %v1997_v20 }
 0xc98   :  { %2324 = vmatpush1.bf16.msra.mxu0 %v6980_v17 }
 0xc99   :  { %2177 = vmatprep.mubr.bf16.mxu1 %v2001_v45  ;;  %2325 = vmatprep.subr.bf16.mxu0 %v6985_v34  ;;  %v5976_v45 = vld [vmem:[%s9099_s6 + $0x1] ss:$0 sm:$0xff] }
 0xc9c   :  { %2178 = vmatmul.mubr.bf16.gmra.mrb[44].mxu1 %v2000_v24  ;;  %2326 = vmatpush1.bf16.msra.mxu0 %v6983_v7 }
 0xc9d   :  { %6603 = vmatprep.mubr.msk.bf16.mxu1 %vm7333_vm0, %v7332_v1  ;;  %6589 = vmatprep.subr.bf16.mxu0 %v7332_v1 }
 0xd67   :  { %v6317_v35 = vpop.f32.mrb[40].mxu1 }
 0xd68   :  { %v6318_v48 = vpop.f32.mrb[41].mxu1 }
 0xd69   :  { %v6319_v53 = vadd.f32 %v6318_v48, %v6317_v35  ;;  %v6320_v29 = vpop.f32.mrb[42].mxu1 }
 0xd6a   :  { %v6321_v32 = vpop.f32.mrb[43].mxu1 }
 0xd6b   :  { %v2172_v63 = vadd.f32 %v6319_v53, %v5957_v14  ;;  %v6322_v47 = vadd.f32 %v6321_v32, %v6320_v29  ;;  %v5977_v53 = vld [vmem:[%s9100_s7 + $0x1] ss:$0 sm:$0xff] }
 0xd6d   :  { %v8070_v6 = vadd.f32 %v2172_v63, %v7956_v55  ;;  %v2175_v23 = vadd.f32 %v6322_v47, %v5957_v14 }
 0xd6f   :  { %v8073_v25 = vadd.f32 %v2175_v23, %v7962_v2  ;;  %v6323_v57 = vpop.f32.mrb[44].mxu1  ;;  %v2192_v38 = vsel %vm381_vm2, %v8070_v6, 0.0 }
 0xd70   :  { %v6324_v58 = vpop.f32.mrb[45].mxu1  ;;  %2193 = vadd.xlane.f32.xlu0 %v2192_v38 }
 0xd71   :  { %v6325_v41 = vadd.f32 %v6324_v58, %v6323_v57  ;;  %v6326_v62 = vpop.f32.mrb[46].mxu1  ;;  %v2195_v4 = vsel %vm381_vm2, %v8073_v25, 0.0 }
 0xd72   :  { %v6327_v3 = vpop.f32.mrb[47].mxu1  ;;  %2196 = vadd.xlane.f32.xlu1 %v2195_v4  ;;  %v5986_v62 = vld [vmem:[%s9101_s9 + $0x2] sm:$0x3] }
 0xd73   :  { %v2180_v46 = vadd.f32 %v6325_v41, %v5957_v14  ;;  %v2266_v4 = vrot.slane %v5986_v62, %v7563_v51 }
 0xd75   :  { %v8080_v55 = vadd.f32 %v2180_v46, %v7959_v12  ;;  %v2270_v46 = vrot.slane %v5986_v62, %v7631_v56 }
 0xd77   :  { %v2198_v2 = vsel %vm388_vm4, %v8080_v55, 0.0 }
 0xd78   :  { %2199 = vadd.xlane.f32.xlu0 %v2198_v2 }
 0xdfd   :  { %v2194_v5 = vpop.xlane.xlu0 %2193 }
 0xdfe   :  { %v2201_v21 = vmul.f32 0.015625, %v2194_v5 }
 0xdff   :  { %v2197_v8 = vpop.xlane.xlu1 %2196 }
 0xe00   :  { %v2204_v28 = vsub.f32 %v8070_v6, %v2201_v21  ;;  %v2202_v9 = vmul.f32 0.015625, %v2197_v8 }
 0xe02   :  { %v2205_v49 = vsub.f32 %v8073_v25, %v2202_v9  ;;  %v2207_v15 = vmul.f32 %v2204_v28, %v2204_v28 }
 0xe04   :  { %v2210_v11 = vsel %vm381_vm2, %v2207_v15, 0.0  ;;  %v2208_v26 = vmul.f32 %v2205_v49, %v2205_v49 }
 0xe05   :  { %2211 = vadd.xlane.f32.xlu1 %v2210_v11  ;;  %v2200_v31 = vpop.xlane.xlu0 %2199 }
 0xe06   :  { %v2203_v12 = vmul.f32 0.015625, %v2200_v31  ;;  %v2213_v10 = vsel %vm381_vm2, %v2208_v26, 0.0 }
 0xe07   :  { %2214 = vadd.xlane.f32.xlu0 %v2213_v10 }
 0xe08   :  { %v2206_v18 = vsub.f32 %v8080_v55, %v2203_v12 }
 0xe0a   :  { %v2209_v42 = vmul.f32 %v2206_v18, %v2206_v18 }
 0xe0c   :  { %v2216_v52 = vsel %vm388_vm4, %v2209_v42, 0.0 }
 0xe0d   :  { %2217 = vadd.xlane.f32.xlu1 %v2216_v52 }
 0xe92   :  { %v2212_v36 = vpop.xlane.xlu1 %2211 }
 0xe93   :  { %v2219_v39 = vmul.f32 0.015625, %v2212_v36 }
 0xe94   :  { %v2215_v40 = vpop.xlane.xlu0 %2214 }
 0xe95   :  { %v2222_v13 = vadd.f32 1e-06, %v2219_v39  ;;  %v2220_v50 = vmul.f32 0.015625, %v2215_v40 }
 0xe97   :  { %7150 = vrsqrt.f32 %v2222_v13  ;;  %v2223_v54 = vadd.f32 1e-06, %v2220_v50 }
 0xe99   :  { %7152 = vrsqrt.f32 %v2223_v54 }
 0xe9a   :  { %v2218_v43 = vpop.xlane.xlu1 %2217 }
 0xe9b   :  { %v2221_v16 = vmul.f32 0.015625, %v2218_v43 }
 0xe9d   :  { %v2224_v20 = vadd.f32 1e-06, %v2221_v16 }
 0xe9f   :  { %7154 = vrsqrt.f32 %v2224_v20 }
 0xea1   :  { %v7151_v33 = vpop.eup %7150 }
 0xea2   :  { %v2228_v24 = vmul.f32 %v7151_v33, %v2204_v28 }
 0xea3   :  { %v7153_v35 = vpop.eup %7152 }
 0xea4   :  { %v2237_v14 = vmul.f32 %v5976_v45, %v2228_v24  ;;  %v2229_v48 = vmul.f32 %v7153_v35, %v2205_v49 }
 0xea6   :  { %v2238_v29 = vmul.f32 %v5976_v45, %v2229_v48  ;;  %v2246_v32 = vadd.f32 %v5977_v53, %v2237_v14 }
 0xea8   :  { %v2247_v63 = vadd.f32 %v5977_v53, %v2238_v29 }
 0xea9   :  { %v7155_v47 = vpop.eup %7154 }
 0xeaa   :  { %v2249_v23 = vpack.c.bf16 %v2247_v63, %v2246_v32  ;;  %v2230_v57 = vmul.f32 %v7155_v47, %v2206_v18 }
 0xeac   :  { %5995 = vmatmul.mubr.msk.bf16.vlgmr.msra.gmra.mrb[52].mxu0 %vm381_vm2, %v2249_v23  ;;  %v2239_v38 = vmul.f32 %v5976_v45, %v2230_v57 }
 0xead   :  { %2361 = vmatprep.mubr.bf16.mxu0 %v7334_v27 }
 0xeae   :  { %v2248_v58 = vadd.f32 %v5977_v53, %v2239_v38 }
 0xeb0   :  { %v2250_v41 = vpack.c.bf16 %v2248_v58, %v2248_v58 }
 0xeb4   :  { %5996 = vmatmul.mubr.msk.bf16.gmra.mrb[56].mxu0 %vm381_vm2, %v2250_v41 }
 0xeb5   :  { %6591 = vmatprep.mubr.msk.bf16.mxu0 %vm7333_vm0, %v7332_v1 }
 0xf7f   :  { %v2353_v3 = vpop.f32.mrb[52].mxu0 }
 0xf80   :  { %v2355_v2 = vpop.f32.mrb[53].mxu0  ;;  %v2354_v21 = vadd.f32 %v2353_v3, %v2266_v4 }
 0xf81   :  { %v2357_v5 = vpop.f32.mrb[54].mxu0  ;;  %v2356_v9 = vadd.f32 %v2355_v2, %v2270_v46 }
 0xf82   :  { %v2358_v8 = vadd.f32 %v2357_v5, %v2266_v4  ;;  %v2359_v28 = vpop.f32.mrb[55].mxu0 }
 0xf83   :  { %v2360_v49 = vadd.f32 %v2359_v28, %v2270_v46 }
 0xf84   :  { %v2370_v15 = vpack.c.bf16 %v2358_v8, %v2354_v21 }
 0xf85   :  { %v8131_v11 = vpack.c.bf16 %v2360_v49, %v2356_v9 }
 0xf86   :  { %2498 = vrot.lane.b32.xlu1 %v2370_v15, %s7341_s29  ;;  %2375 = vrot.lane.b32.xlu0 %v2370_v15, %s7336_s26  ;;  %v2902_v12 = vshrl.u32 %v2370_v15, 16  ;;  %v2905_v10 = vshll.u32 %v2370_v15, 16 }
 0xf87   :  { %v2363_v26 = vpop.f32.mrb[56].mxu0  ;;  %v2453_v33 = vand.u32 %v8131_v11, %v7637_v37 }
 0xf88   :  { %v2364_v31 = vadd.f32 %v2363_v26, %v2266_v4  ;;  %v2365_v18 = vpop.f32.mrb[57].mxu0  ;;  %v2904_v22 = vrot.slane %v2902_v12, 4  ;;  %v2907_v30 = vrot.slane %v2905_v10, 5 }
 0xf89   :  { %v8135_v42 = vadd.f32 %v2365_v18, %v2270_v46  ;;  %v2367_v52 = vpop.f32.mrb[58].mxu0 }
 0xf8a   :  { %v2372_v59 = vpack.c.bf16 %v2364_v31, %v2364_v31  ;;  %v2368_v19 = vpop.f32.mrb[59].mxu0  ;;  %2496 = vrot.lane.b32.xlu1 %v2370_v15, %s7337_s27  ;;  %2622 = vrot.lane.b32.xlu0 %v2370_v15, %s7339_s28  ;;  %v2908_v36 = vor.u32 %v2907_v30, %v2904_v22 }
 0xf8c   :  { %v2910_v44 = vshrl.u32 %v2372_v59, 16  ;;  %v2913_v17 = vshll.u32 %v2372_v59, 16 }
 0xf8e   :  { %v2912_v34 = vrot.slane %v2910_v44, 4  ;;  %v2915_v7 = vrot.slane %v2913_v17, 5  ;;  %2624 = vrot.lane.b32.xlu1 %v2370_v15, %s7338_s0  ;;  %2747 = vrot.lane.b32.xlu0 %v2370_v15, %s9117_s4 }
 0xf90   :  { %v2916_v39 = vor.u32 %v2915_v7, %v2912_v34 }
 0xf92   :  { %v2917_v40 = vsel %vm1101_vm7, %v2908_v36, %v2916_v39  ;;  %2749 = vrot.lane.b32.xlu1 %v2370_v15, %s9129_s23 }
 0xf93   :  { %3057 = vrot.lane.b32.xlu0 %v2917_v40, %s7341_s29 }
 0xf96   :  { %2918 = vrot.lane.b32.xlu1 %v2917_v40, %s7336_s26 }
 0xf97   :  { %3182 = vrot.lane.b32.xlu0 %v2917_v40, %s7338_s0 }
 0xf9a   :  { %3055 = vrot.lane.b32.xlu1 %v2917_v40, %s7337_s27 }
 0xf9b   :  { %3307 = vrot.lane.b32.xlu0 %v2917_v40, %s9129_s23 }
 0xf9e   :  { %3180 = vrot.lane.b32.xlu1 %v2917_v40, %s7339_s28 }
 0xfa2   :  { %3305 = vrot.lane.b32.xlu1 %v2917_v40, %s9117_s4 }
 0xff8   :  { %v2499_v13 = vpop.permute.xlu1 %2498  ;;  %v2376_v50 = vpop.permute.xlu0 %2375 }
 0xff9   :  { %v2504_v54 = vsel %vm567_vm8, %v2499_v13, 0  ;;  %v2381_v43 = vsel %vm567_vm8, %v2376_v50, 0 }
 0xffa   :  { %6590 = vmatpush3.bf16.xpose.msra.mxu0 %v2381_v43  ;;  %6602 = vmatpush3.bf16.xpose.msra.mxu1 %v2504_v54 }
 0xffb   :  { %6595 = vmatprep.subr.bf16.mxu0 %v7332_v1  ;;  %6613 = vmatprep.subr.bf16.mxu1 %v7332_v1 }
 0xffc   :  { %v2497_v16 = vpop.permute.xlu1 %2496  ;;  %v2623_v35 = vpop.permute.xlu0 %2622 }
0x1000   :  { %v2625_v20 = vpop.permute.xlu1 %2624  ;;  %v2748_v53 = vpop.permute.xlu0 %2747 }
0x1001   :  { %v2630_v45 = vsel %vm567_vm8, %v2625_v20, 0  ;;  %6592 = vmatmul.mubr.msk.bf16.vlgmr.msra.gmra.mrb[60].mxu0 %vm567_vm8, %v2370_v15  ;;  %6604 = vmatmul.mubr.msk.bf16.vlgmr.msra.gmra.mrb[48].mxu1 %vm567_vm8, %v2497_v16 }
0x1002   :  { %6596 = vmatpush3.bf16.msra.mxu0 %v2453_v33  ;;  %6614 = vmatpush3.bf16.xpose.msra.mxu1 %v2630_v45 }
0x1003   :  { %6615 = vmatprep.mubr.msk.bf16.mxu1 %vm7333_vm0, %v7332_v1  ;;  %6625 = vmatprep.subr.bf16.mxu1 %v7332_v1 }
0x1004   :  { %6597 = vmatprep.mubr.msk.bf16.mxu0 %vm7333_vm0, %v7332_v1  ;;  %6607 = vmatprep.subr.bf16.mxu0 %v7332_v1  ;;  %v2750_v24 = vpop.permute.xlu1 %2749 }
0x1005   :  { %v2755_v14 = vsel %vm567_vm8, %v2750_v24, 0  ;;  %v3058_v32 = vpop.permute.xlu0 %3057 }
0x1006   :  { %v3063_v63 = vsel %vm567_vm8, %v3058_v32, 0 }
0x1008   :  { %v2919_v48 = vpop.permute.xlu1 %2918 }
0x1009   :  { %6616 = vmatmul.mubr.msk.bf16.vlgmr.msra.gmra.mrb[52].mxu1 %vm567_vm8, %v2623_v35  ;;  %v2924_v29 = vsel %vm567_vm8, %v2919_v48, 0  ;;  %v3183_v47 = vpop.permute.xlu0 %3182 }
0x100a   :  { %6626 = vmatpush3.bf16.xpose.msra.mxu1 %v2755_v14  ;;  %6627 = vmatprep.mubr.msk.bf16.mxu1 %vm7333_vm0, %v7332_v1  ;;  %v3188_v57 = vsel %vm567_vm8, %v3183_v47, 0 }
0x100b   :  { %6637 = vmatprep.subr.bf16.mxu1 %v7332_v1 }
0x100c   :  { %v3056_v23 = vpop.permute.xlu1 %3055 }
0x100d   :  { %v3308_v38 = vpop.permute.xlu0 %3307 }
0x100e   :  { %v3313_v41 = vsel %vm567_vm8, %v3308_v38, 0 }
0x1010   :  { %v3181_v58 = vpop.permute.xlu1 %3180 }
0x1011   :  { %6628 = vmatmul.mubr.msk.bf16.vlgmr.msra.gmra.mrb[56].mxu1 %vm567_vm8, %v2748_v53 }
0x1012   :  { %6638 = vmatpush3.bf16.xpose.msra.mxu1 %v2924_v29  ;;  %6639 = vmatprep.mubr.msk.bf16.mxu1 %vm7333_vm0, %v7332_v1 }
0x1013   :  { %6649 = vmatprep.subr.bf16.mxu1 %v7332_v1 }
0x1014   :  { %v3306_v62 = vpop.permute.xlu1 %3305 }
0x1019   :  { %6640 = vmatmul.mubr.msk.bf16.vlgmr.msra.gmra.mrb[60].mxu1 %vm567_vm8, %v2917_v40 }
0x101a   :  { %6650 = vmatpush3.bf16.xpose.msra.mxu1 %v3063_v63  ;;  %6651 = vmatprep.mubr.msk.bf16.mxu1 %vm7333_vm0, %v7332_v1 }
0x101b   :  { %6661 = vmatprep.subr.bf16.mxu1 %v7332_v1 }
0x1021   :  { %6652 = vmatmul.mubr.msk.bf16.vlgmr.msra.gmra.mrb[64].mxu1 %vm567_vm8, %v3056_v23 }
0x1022   :  { %6662 = vmatpush3.bf16.xpose.msra.mxu1 %v3188_v57  ;;  %6663 = vmatprep.mubr.msk.bf16.mxu1 %vm7333_vm0, %v7332_v1 }
0x1023   :  { %6673 = vmatprep.subr.bf16.mxu1 %v7332_v1 }
0x1029   :  { %6664 = vmatmul.mubr.msk.bf16.vlgmr.msra.gmra.mrb[68].mxu1 %vm567_vm8, %v3181_v58 }
0x102a   :  { %6674 = vmatpush3.bf16.xpose.msra.mxu1 %v3313_v41  ;;  %6675 = vmatprep.mubr.msk.bf16.mxu1 %vm7333_vm0, %v7332_v1 }
0x1031   :  { %6676 = vmatmul.mubr.msk.bf16.vlgmr.msra.gmra.mrb[72].mxu1 %vm567_vm8, %v3306_v62 }
0x10d4   :  { %v2417_v4 = vpop.f32.mrb[60].mxu0  ;;  %v2540_v3 = vpop.f32.mrb[48].mxu1 }
0x10d5   :  { %v8190_v46 = vmul.f32 0.25, %v2417_v4  ;;  %v6593_v2 = vpop.f32.mrb[61].mxu0  ;;  %v6605_v5 = vpop.f32.mrb[49].mxu1  ;;  %v8192_v28 = vmul.f32 0.25, %v2540_v3 }
0x10d6   :  { %v2420_v21 = vpop.f32.mrb[62].mxu0  ;;  %v2543_v8 = vpop.f32.mrb[50].mxu1 }
0x10d7   :  { %v8194_v9 = vmul.f32 0.25, %v2420_v21  ;;  %v6594_v49 = vpop.f32.mrb[63].mxu0  ;;  %v6606_v15 = vpop.f32.mrb[51].mxu1  ;;  %v2426_v26 = vsel %vm617_vm9, %v8190_v46, -inf  ;;  %v8200_v12 = vmul.f32 0.25, %v2543_v8  ;;  %v2549_v10 = vsel %vm617_vm9, %v8192_v28, -inf }
0x10d8   :  { %2427 = vmax.xlane.f32.xlu0 %v2426_v26 }
0x10d9   :  { %v2429_v31 = vsel %vm621_vm10, %v8194_v9, -inf  ;;  %v2552_v44 = vsel %vm621_vm10, %v8200_v12, -inf }
0x10da   :  { %2430 = vmax.xlane.f32.xlu1 %v2429_v31 }
0x10dc   :  { %v2666_v18 = vpop.f32.mrb[52].mxu1  ;;  %2550 = vmax.xlane.f32.xlu0 %v2549_v10 }
0x10dd   :  { %v6617_v52 = vpop.f32.mrb[53].mxu1  ;;  %v8204_v19 = vmul.f32 0.25, %v2666_v18 }
0x10de   :  { %v2669_v59 = vpop.f32.mrb[54].mxu1 }
0x10df   :  { %v8206_v22 = vmul.f32 0.25, %v2669_v59  ;;  %v6618_v30 = vpop.f32.mrb[55].mxu1  ;;  %v2675_v34 = vsel %vm617_vm9, %v8204_v19, -inf }
0x10e0   :  { %2553 = vmax.xlane.f32.xlu0 %v2552_v44 }
0x10e1   :  { %v2678_v17 = vsel %vm621_vm10, %v8206_v22, -inf }
0x10e2   :  { %2679 = vmax.xlane.f32.xlu1 %v2678_v17 }
0x10e4   :  { %v2791_v7 = vpop.f32.mrb[56].mxu1  ;;  %2676 = vmax.xlane.f32.xlu0 %v2675_v34 }
0x10e5   :  { %v8214_v36 = vmul.f32 0.25, %v2791_v7  ;;  %v6629_v39 = vpop.f32.mrb[57].mxu1 }
0x10e6   :  { %v2794_v40 = vpop.f32.mrb[58].mxu1 }
0x10e7   :  { %v8216_v13 = vmul.f32 0.25, %v2794_v40  ;;  %v6630_v50 = vpop.f32.mrb[59].mxu1  ;;  %v2800_v54 = vsel %vm617_vm9, %v8214_v36, -inf }
0x10e8   :  { %2801 = vmax.xlane.f32.xlu0 %v2800_v54 }
0x10e9   :  { %v2803_v43 = vsel %vm621_vm10, %v8216_v13, -inf }
0x10ea   :  { %2804 = vmax.xlane.f32.xlu1 %v2803_v43 }
0x10ec   :  { %v2960_v16 = vpop.f32.mrb[60].mxu1 }
0x10ed   :  { %v8222_v20 = vmul.f32 0.25, %v2960_v16  ;;  %v6641_v33 = vpop.f32.mrb[61].mxu1 }
0x10ee   :  { %v2963_v45 = vpop.f32.mrb[62].mxu1 }
0x10ef   :  { %v8224_v24 = vmul.f32 0.25, %v2963_v45  ;;  %v6642_v35 = vpop.f32.mrb[63].mxu1  ;;  %v2969_v14 = vsel %vm617_vm9, %v8222_v20, -inf }
0x10f0   :  { %2970 = vmax.xlane.f32.xlu0 %v2969_v14 }
0x10f1   :  { %v2972_v48 = vsel %vm621_vm10, %v8224_v24, -inf }
0x10f2   :  { %2973 = vmax.xlane.f32.xlu1 %v2972_v48 }
0x10f4   :  { %v3099_v53 = vpop.f32.mrb[64].mxu1 }
0x10f5   :  { %v8230_v29 = vmul.f32 0.25, %v3099_v53  ;;  %v6653_v32 = vpop.f32.mrb[65].mxu1 }
0x10f6   :  { %v3102_v63 = vpop.f32.mrb[66].mxu1 }
0x10f7   :  { %v8232_v47 = vmul.f32 0.25, %v3102_v63  ;;  %v6654_v23 = vpop.f32.mrb[67].mxu1  ;;  %v3108_v57 = vsel %vm617_vm9, %v8230_v29, -inf }
0x10f8   :  { %3109 = vmax.xlane.f32.xlu0 %v3108_v57 }
0x10f9   :  { %v3111_v38 = vsel %vm621_vm10, %v8232_v47, -inf }
0x10fa   :  { %3112 = vmax.xlane.f32.xlu1 %v3111_v38 }
0x10fc   :  { %v3224_v58 = vpop.f32.mrb[68].mxu1 }
0x10fd   :  { %v6665_v41 = vpop.f32.mrb[69].mxu1  ;;  %v8250_v31 = vmul.f32 0.25, %v3224_v58 }
0x10fe   :  { %v3227_v62 = vpop.f32.mrb[70].mxu1 }
0x10ff   :  { %v8238_v4 = vmul.f32 0.25, %v3227_v62  ;;  %v6666_v3 = vpop.f32.mrb[71].mxu1  ;;  %v3233_v18 = vsel %vm617_vm9, %v8250_v31, -inf }
0x1101   :  { %v3236_v2 = vsel %vm621_vm10, %v8238_v4, -inf }
0x1102   :  { %3237 = vmax.xlane.f32.xlu1 %v3236_v2 }
0x1104   :  { %v3349_v5 = vpop.f32.mrb[72].mxu1 }
0x1105   :  { %v6677_v21 = vpop.f32.mrb[73].mxu1  ;;  %v8252_v10 = vmul.f32 0.25, %v3349_v5 }
0x1106   :  { %v3352_v8 = vpop.f32.mrb[74].mxu1 }
0x1107   :  { %v8242_v49 = vmul.f32 0.25, %v3352_v8  ;;  %v6678_v15 = vpop.f32.mrb[75].mxu1  ;;  %v3358_v52 = vsel %vm617_vm9, %v8252_v10, -inf }
0x1109   :  { %v3361_v26 = vsel %vm621_vm10, %v8242_v49, -inf }
0x110a   :  { %3362 = vmax.xlane.f32.xlu1 %v3361_v26 }
0x110e   :  { %2573 = vrot.lane.b32.xlu0 %v8131_v11, %s7337_s27 }
0x111b   :  { %2698 = vrot.lane.b32.xlu1 %v8131_v11, %s7339_s28 }
0x112d   :  { %3234 = vmax.xlane.f32.xlu0 %v3233_v18 }
0x1131   :  { %3359 = vmax.xlane.f32.xlu0 %v3358_v52 }
0x1165   :  { %v2428_v59 = vpop.xlane.xlu0 %2427 }
0x1166   :  { %v2432_v30 = vsub.f32 %v8190_v46, %v2428_v59 }
0x1167   :  { %v2431_v44 = vpop.xlane.xlu1 %2430 }
0x1168   :  { %v2434_v17 = vmul.f32 1.442695, %v2432_v30  ;;  %v2433_v34 = vsub.f32 %v8194_v9, %v2431_v44 }
0x1169   :  { %v2551_v7 = vpop.xlane.xlu0 %2550 }
0x116a   :  { %7156 = vpow2.f32 %v2434_v17  ;;  %v2436_v39 = vmul.f32 1.442695, %v2433_v34  ;;  %v2555_v40 = vsub.f32 %v8192_v28, %v2551_v7 }
0x116c   :  { %7158 = vpow2.f32 %v2436_v39  ;;  %v2557_v50 = vmul.f32 1.442695, %v2555_v40 }
0x116d   :  { %v2554_v54 = vpop.xlane.xlu0 %2553 }
0x116e   :  { %7160 = vpow2.f32 %v2557_v50  ;;  %v2556_v43 = vsub.f32 %v8200_v12, %v2554_v54 }
0x116f   :  { %v2680_v16 = vpop.xlane.xlu1 %2679 }
0x1170   :  { %v2559_v33 = vmul.f32 1.442695, %v2556_v43  ;;  %v2682_v45 = vsub.f32 %v8206_v22, %v2680_v16 }
0x1171   :  { %v2677_v46 = vpop.xlane.xlu0 %2676 }
0x1172   :  { %7162 = vpow2.f32 %v2559_v33  ;;  %v2685_v35 = vmul.f32 1.442695, %v2682_v45  ;;  %v2681_v9 = vsub.f32 %v8204_v19, %v2677_v46 }
0x1174   :  { %v8264_v14 = vpop.eup %7156  ;;  %7164 = vpow2.f32 %v2685_v35  ;;  %v2683_v48 = vmul.f32 1.442695, %v2681_v9 }
0x1175   :  { %v2802_v28 = vpop.xlane.xlu0 %2801  ;;  %v2438_v53 = vsel %vm617_vm9, %v8264_v14, 0.0 }
0x1176   :  { %v8268_v32 = vpop.eup %7158  ;;  %7166 = vpow2.f32 %v2683_v48  ;;  %v2806_v12 = vsub.f32 %v8214_v36, %v2802_v28  ;;  %2439 = vadd.xlane.f32.xlu0 %v2438_v53 }
0x1177   :  { %v2805_v22 = vpop.xlane.xlu1 %2804  ;;  %v2441_v63 = vsel %vm621_vm10, %v8268_v32, 0.0 }
0x1178   :  { %v8273_v23 = vpop.eup %7160  ;;  %v2808_v19 = vmul.f32 1.442695, %v2806_v12  ;;  %v2807_v57 = vsub.f32 %v8216_v13, %v2805_v22  ;;  %2442 = vadd.xlane.f32.xlu1 %v2441_v63 }
0x1179   :  { %v2561_v38 = vsel %vm617_vm9, %v8273_v23, 0.0 }
0x117a   :  { %7168 = vpow2.f32 %v2808_v19  ;;  %v2810_v58 = vmul.f32 1.442695, %v2807_v57  ;;  %2562 = vadd.xlane.f32.xlu0 %v2561_v38  ;;  %v2373_v19 = vpack.c.bf16 %v8135_v42, %v8135_v42 }
0x117c   :  { %v8278_v41 = vpop.eup %7162  ;;  %7170 = vpow2.f32 %v2810_v58  ;;  %v3000_v38 = vshrl.u32 %v2373_v19, 16  ;;  %v3003_v58 = vshll.u32 %v2373_v19, 16 }
0x117d   :  { %v2971_v36 = vpop.xlane.xlu0 %2970  ;;  %v2564_v62 = vsel %vm621_vm10, %v8278_v41, 0.0 }
0x117e   :  { %v8282_v3 = vpop.eup %7164  ;;  %v2975_v2 = vsub.f32 %v8222_v20, %v2971_v36  ;;  %2565 = vadd.xlane.f32.xlu1 %v2564_v62  ;;  %v2995_v62 = vshll.u32 %v8131_v11, 16 }
0x117f   :  { %v2974_v13 = vpop.xlane.xlu1 %2973  ;;  %v2690_v26 = vsel %vm621_vm10, %v8282_v3, 0.0 }
0x1180   :  { %v8285_v5 = vpop.eup %7166  ;;  %v2977_v21 = vmul.f32 1.442695, %v2975_v2  ;;  %v2976_v8 = vsub.f32 %v8224_v24, %v2974_v13  ;;  %v3002_v2 = vrot.slane %v3000_v38, 4  ;;  %v3005_v13 = vrot.slane %v3003_v58, 5 }
0x1181   :  { %v2687_v15 = vsel %vm617_vm9, %v8285_v5, 0.0 }
0x1182   :  { %7172 = vpow2.f32 %v2977_v21  ;;  %v2979_v18 = vmul.f32 1.442695, %v2976_v8  ;;  %2688 = vadd.xlane.f32.xlu0 %v2687_v15  ;;  %2691 = vadd.xlane.f32.xlu1 %v2690_v26  ;;  %v2997_v8 = vrot.slane %v2995_v62, 5  ;;  %v3006_v15 = vor.u32 %v3005_v13, %v3002_v2 }
0x1184   :  { %v8292_v52 = vpop.eup %7168  ;;  %7174 = vpow2.f32 %v2979_v18 }
0x1185   :  { %v2812_v20 = vsel %vm617_vm9, %v8292_v52, 0.0  ;;  %v3110_v54 = vpop.xlane.xlu0 %3109 }
0x1186   :  { %v8296_v59 = vpop.eup %7170  ;;  %2813 = vadd.xlane.f32.xlu0 %v2812_v20  ;;  %v3114_v43 = vsub.f32 %v8230_v29, %v3110_v54 }
0x1187   :  { %v3113_v24 = vpop.xlane.xlu1 %3112  ;;  %v2815_v30 = vsel %vm621_vm10, %v8296_v59, 0.0 }
0x1188   :  { %v3115_v44 = vsub.f32 %v8232_v47, %v3113_v24  ;;  %2816 = vadd.xlane.f32.xlu1 %v2815_v30  ;;  %v3116_v16 = vmul.f32 1.442695, %v3114_v43 }
0x1189   :  { %v8316_v33 = vpop.permute.xlu0 %2573 }
0x118a   :  { %v3118_v17 = vmul.f32 1.442695, %v3115_v44 }
0x118c   :  { %v8301_v34 = vpop.eup %7172  ;;  %7176 = vpow2.f32 %v3118_v17 }
0x118d   :  { %v2981_v7 = vsel %vm617_vm9, %v8301_v34, 0.0  ;;  %7178 = vpow2.f32 %v3116_v16 }
0x118e   :  { %v8305_v39 = vpop.eup %7174  ;;  %2982 = vadd.xlane.f32.xlu1 %v2981_v7 }
0x118f   :  { %v2984_v40 = vsel %vm621_vm10, %v8305_v39, 0.0  ;;  %v3238_v45 = vpop.xlane.xlu1 %3237 }
0x1190   :  { %v3240_v35 = vsub.f32 %v8238_v4, %v3238_v45 }
0x1192   :  { %2985 = vadd.xlane.f32.xlu1 %v2984_v40  ;;  %v3243_v53 = vmul.f32 1.442695, %v3240_v35 }
0x1196   :  { %v8309_v50 = vpop.eup %7176 }
0x1197   :  { %v3123_v47 = vsel %vm621_vm10, %v8309_v50, 0.0  ;;  %v8318_v46 = vpop.eup %7178  ;;  %v3363_v22 = vpop.xlane.xlu1 %3362 }
0x1198   :  { %3124 = vadd.xlane.f32.xlu1 %v3123_v47  ;;  %v3120_v48 = vsel %vm617_vm9, %v8318_v46, 0.0  ;;  %v3365_v4 = vsub.f32 %v8242_v49, %v3363_v22 }
0x119a   :  { %v3368_v36 = vmul.f32 1.442695, %v3365_v4 }
0x119b   :  { %v2699_v17 = vpop.permute.xlu1 %2698 }
0x119c   :  { %2823 = vrot.lane.b32.xlu0 %v8131_v11, %s9117_s4  ;;  %v2704_v38 = vand.u32 %v2699_v17, %v7637_v37 }
0x11ba   :  { %v3235_v9 = vpop.xlane.xlu0 %3234 }
0x11bb   :  { %v3239_v28 = vsub.f32 %v8250_v31, %v3235_v9  ;;  %3121 = vadd.xlane.f32.xlu0 %v3120_v48  ;;  %v2992_v31 = vshrl.u32 %v8131_v11, 16 }
0x11bd   :  { %v3241_v12 = vmul.f32 1.442695, %v3239_v28 }
0x11be   :  { %v3360_v29 = vpop.xlane.xlu0 %3359 }
0x11bf   :  { %7180 = vpow2.f32 %v3241_v12  ;;  %v3364_v63 = vsub.f32 %v8252_v10, %v3360_v29  ;;  %v2994_v10 = vrot.slane %v2992_v31, 4 }
0x11c0   :  { %7182 = vpow2.f32 %v3243_v53  ;;  %v2579_v53 = vand.u32 %v8316_v33, %v7637_v37 }
0x11c1   :  { %v3366_v57 = vmul.f32 1.442695, %v3364_v63  ;;  %v2998_v18 = vor.u32 %v2997_v8, %v2994_v10 }
0x11c3   :  { %7184 = vpow2.f32 %v3366_v57  ;;  %v8341_v11 = vsel %vm1101_vm7, %v2998_v18, %v3006_v15 }
0x11c4   :  { %7186 = vpow2.f32 %v3368_v36  ;;  %v3012_v8 = vand.u32 %v8341_v11, %v7637_v37 }
0x11c9   :  { %v8330_v21 = vpop.eup %7180 }
0x11ca   :  { %v3245_v42 = vsel %vm617_vm9, %v8330_v21, 0.0  ;;  %v8334_v49 = vpop.eup %7182 }
0x11cb   :  { %3246 = vadd.xlane.f32.xlu1 %v3245_v42  ;;  %v3248_v26 = vsel %vm621_vm10, %v8334_v49, 0.0 }
0x11cd   :  { %v8338_v20 = vpop.eup %7184 }
0x11ce   :  { %v3370_v24 = vsel %vm617_vm9, %v8338_v20, 0.0  ;;  %v8347_v30 = vpop.eup %7186 }
0x11cf   :  { %3249 = vadd.xlane.f32.xlu1 %v3248_v26  ;;  %v3373_v44 = vsel %vm621_vm10, %v8347_v30, 0.0 }
0x11d1   :  { %3131 = vrot.lane.b32.xlu0 %v8341_v11, %s7337_s27 }
0x11d3   :  { %3371 = vadd.xlane.f32.xlu1 %v3370_v24 }
0x11d5   :  { %3381 = vrot.lane.b32.xlu0 %v8341_v11, %s9117_s4 }
0x11d7   :  { %3374 = vadd.xlane.f32.xlu1 %v3373_v44 }
0x11e8   :  { %3256 = vrot.lane.b32.xlu1 %v8341_v11, %s7339_s28 }
0x1203   :  { %v2440_v7 = vpop.xlane.xlu0 %2439 }
0x1204   :  { %7188 = vrcp.f32 %v2440_v7 }
0x1205   :  { %v2443_v40 = vpop.xlane.xlu1 %2442 }
0x1206   :  { %7190 = vrcp.f32 %v2443_v40 }
0x1207   :  { %v2563_v47 = vpop.xlane.xlu0 %2562 }
0x1208   :  { %7192 = vrcp.f32 %v2563_v47 }
0x120b   :  { %v2566_v54 = vpop.xlane.xlu1 %2565 }
0x120c   :  { %7194 = vrcp.f32 %v2566_v54 }
0x120e   :  { %v7189_v43 = vpop.eup %7188 }
0x120f   :  { %v2689_v16 = vpop.xlane.xlu0 %2688  ;;  %v2692_v45 = vpop.xlane.xlu1 %2691  ;;  %v2446_v9 = vmul.f32 %v7189_v43, %v8264_v14 }
0x1210   :  { %v7191_v35 = vpop.eup %7190  ;;  %7196 = vrcp.f32 %v2689_v16 }
0x1211   :  { %v2447_v48 = vmul.f32 %v7191_v35, %v8268_v32  ;;  %7198 = vrcp.f32 %v2692_v45 }
0x1212   :  { %v7193_v12 = vpop.eup %7192 }
0x1213   :  { %v2448_v28 = vpack.c.bf16 %v2447_v48, %v2446_v9  ;;  %v2569_v14 = vmul.f32 %v7193_v12, %v8273_v23  ;;  %v2814_v32 = vpop.xlane.xlu0 %2813 }
0x1215   :  { %6598 = vmatmul.mubr.msk.bf16.vlgmr.msra.gmra.mrb[64].mxu0 %vm617_vm9, %v2448_v28  ;;  %v2817_v63 = vpop.xlane.xlu1 %2816 }
0x1216   :  { %v7195_v22 = vpop.eup %7194  ;;  %6608 = vmatpush3.bf16.msra.mxu0 %v2579_v53  ;;  %6609 = vmatprep.mubr.msk.bf16.mxu0 %vm7333_vm0, %v7332_v1  ;;  %7200 = vrcp.f32 %v2817_v63 }
0x1217   :  { %v2570_v29 = vmul.f32 %v7195_v22, %v8278_v41  ;;  %6619 = vmatprep.subr.bf16.mxu0 %v7332_v1  ;;  %7202 = vrcp.f32 %v2814_v32  ;;  %v2824_v36 = vpop.permute.xlu0 %2823 }
0x1218   :  { %v2829_v2 = vand.u32 %v2824_v36, %v7637_v37 }
0x1219   :  { %v2571_v33 = vpack.c.bf16 %v2570_v29, %v2569_v14 }
0x121a   :  { %v7197_v19 = vpop.eup %7196 }
0x121b   :  { %v2983_v4 = vpop.xlane.xlu1 %2982  ;;  %v7199_v57 = vpop.eup %7198  ;;  %v2695_v41 = vmul.f32 %v7197_v19, %v8285_v5 }
0x121c   :  { %v2696_v58 = vmul.f32 %v7199_v57, %v8282_v3 }
0x121d   :  { %6610 = vmatmul.mubr.msk.bf16.vlgmr.msra.gmra.mrb[68].mxu0 %vm617_vm9, %v2571_v33 }
0x121e   :  { %6620 = vmatpush3.bf16.msra.mxu0 %v2704_v38  ;;  %6621 = vmatprep.mubr.msk.bf16.mxu0 %vm7333_vm0, %v7332_v1  ;;  %v2697_v31 = vpack.c.bf16 %v2696_v58, %v2695_v41 }
0x121f   :  { %v2986_v23 = vpop.xlane.xlu1 %2985  ;;  %6631 = vmatprep.subr.bf16.mxu0 %v7332_v1 }
0x1220   :  { %7204 = vrcp.f32 %v2986_v23  ;;  %v7201_v62 = vpop.eup %7200 }
0x1221   :  { %7206 = vrcp.f32 %v2983_v4  ;;  %v7203_v13 = vpop.eup %7202  ;;  %v2821_v5 = vmul.f32 %v7201_v62, %v8296_v59 }
0x1222   :  { %v2820_v3 = vmul.f32 %v7203_v13, %v8292_v52 }
0x1224   :  { %v2822_v42 = vpack.c.bf16 %v2821_v5, %v2820_v3 }
0x1225   :  { %6622 = vmatmul.mubr.msk.bf16.vlgmr.msra.gmra.mrb[72].mxu0 %vm617_vm9, %v2697_v31  ;;  %v3125_v52 = vpop.xlane.xlu1 %3124 }
0x1226   :  { %6632 = vmatpush3.bf16.msra.mxu0 %v2829_v2  ;;  %6633 = vmatprep.mubr.msk.bf16.mxu0 %vm7333_vm0, %v7332_v1  ;;  %7208 = vrcp.f32 %v3125_v52 }
0x1227   :  { %6643 = vmatprep.subr.bf16.mxu0 %v7332_v1 }
0x122a   :  { %v7205_v10 = vpop.eup %7204 }
0x122b   :  { %v7207_v15 = vpop.eup %7206  ;;  %v2990_v26 = vmul.f32 %v7205_v10, %v8305_v39 }
0x122c   :  { %v2989_v59 = vmul.f32 %v7207_v15, %v8301_v34 }
0x122d   :  { %6634 = vmatmul.mubr.msk.bf16.vlgmr.msra.gmra.mrb[76].mxu0 %vm617_vm9, %v2822_v42 }
0x122e   :  { %6644 = vmatpush3.bf16.msra.mxu0 %v3012_v8  ;;  %6645 = vmatprep.mubr.msk.bf16.mxu0 %vm7333_vm0, %v7332_v1  ;;  %v2991_v18 = vpack.c.bf16 %v2990_v26, %v2989_v59 }
0x122f   :  { %6655 = vmatprep.subr.bf16.mxu0 %v7332_v1 }
0x1230   :  { %v7209_v39 = vpop.eup %7208 }
0x1231   :  { %v3129_v34 = vmul.f32 %v7209_v39, %v8309_v50 }
0x1235   :  { %6646 = vmatmul.mubr.msk.bf16.vlgmr.msra.gmra.mrb[80].mxu0 %vm617_vm9, %v2991_v18 }
0x1236   :  { %6657 = vmatprep.mubr.msk.bf16.mxu0 %vm7333_vm0, %v7332_v1 }
0x1248   :  { %v3122_v11 = vpop.xlane.xlu0 %3121 }
0x1249   :  { %7210 = vrcp.f32 %v3122_v11 }
0x124c   :  { %v3132_v24 = vpop.permute.xlu0 %3131 }
0x124d   :  { %v3137_v44 = vand.u32 %v3132_v24, %v7637_v37  ;;  %v6986_v24 = vld [vmem:[%s9102_s10 + $0x20] sm:$0xff]  }
0x124e   :  { %6685 = vmatprep.subr.bf16.mxu1 %v6986_v24 }
0x124f   :  { %6656 = vmatpush3.bf16.msra.mxu0 %v3137_v44  ;;  %6686 = vmatpush3.bf16.msra.mxu1 %v6986_v24  ;;  %v6987_v44 = vld [vmem:[%s9102_s10 + $0x28] sm:$0xff]  }
0x1250   :  { %6667 = vmatprep.subr.bf16.mxu0 %v7332_v1  ;;  %v3382_v48 = vpop.permute.xlu0 %3381  ;;  %6687 = vmatprep.subr.bf16.mxu1 %v6987_v44 }
0x1251   :  { %v3387_v12 = vand.u32 %v3382_v48, %v7637_v37 }
0x1253   :  { %v7211_v17 = vpop.eup %7210  ;;  %6688 = vmatpush3.bf16.msra.mxu1 %v6987_v44 }
0x1254   :  { %v3128_v7 = vmul.f32 %v7211_v17, %v8318_v46 }
0x1256   :  { %v3130_v40 = vpack.c.bf16 %v3129_v34, %v3128_v7  ;;  %v6988_v7 = vld [vmem:[%s9102_s10 + $0x30] sm:$0xff]  }
0x1257   :  { %6689 = vmatprep.subr.bf16.mxu1 %v6988_v7 }
0x1258   :  { %6658 = vmatmul.mubr.msk.bf16.vlgmr.msra.gmra.mrb[84].mxu0 %vm617_vm9, %v3130_v40  ;;  %v3247_v47 = vpop.xlane.xlu1 %3246  ;;  %6690 = vmatpush3.bf16.msra.mxu1 %v6988_v7 }
0x1259   :  { %6669 = vmatprep.mubr.msk.bf16.mxu0 %vm7333_vm0, %v7332_v1  ;;  %7212 = vrcp.f32 %v3247_v47 }
0x125c   :  { %v3250_v54 = vpop.xlane.xlu1 %3249 }
0x125d   :  { %7214 = vrcp.f32 %v3250_v54  ;;  %v6989_v54 = vld [vmem:[%s9102_s10 + $0x38] sm:$0xff]  }
0x125e   :  { %6691 = vmatprep.subr.bf16.mxu1 %v6989_v54 }
0x125f   :  { %6692 = vmatpush3.bf16.msra.mxu1 %v6989_v54 }
0x1260   :  { %v3372_v43 = vpop.xlane.xlu1 %3371 }
0x1261   :  { %7216 = vrcp.f32 %v3372_v43 }
0x1263   :  { %v7213_v45 = vpop.eup %7212 }
0x1264   :  { %v3375_v16 = vpop.xlane.xlu1 %3374  ;;  %v3253_v28 = vmul.f32 %v7213_v45, %v8330_v21 }
0x1265   :  { %7218 = vrcp.f32 %v3375_v16 }
0x1267   :  { %v7215_v35 = vpop.eup %7214 }
0x1268   :  { %v3254_v50 = vmul.f32 %v7215_v35, %v8334_v49  ;;  %v3257_v9 = vpop.permute.xlu1 %3256 }
0x1269   :  { %v3262_v46 = vand.u32 %v3257_v9, %v7637_v37 }
0x126a   :  { %v3255_v53 = vpack.c.bf16 %v3254_v50, %v3253_v28 }
0x126b   :  { %6668 = vmatpush3.bf16.msra.mxu0 %v3262_v46  ;;  %v7217_v22 = vpop.eup %7216 }
0x126c   :  { %6679 = vmatprep.subr.bf16.mxu0 %v7332_v1  ;;  %v3378_v63 = vmul.f32 %v7217_v22, %v8338_v20 }
0x126e   :  { %6670 = vmatmul.mubr.msk.bf16.vlgmr.msra.gmra.mrb[88].mxu0 %vm617_vm9, %v3255_v53 }
0x126f   :  { %v7219_v29 = vpop.eup %7218  ;;  %6680 = vmatpush3.bf16.msra.mxu0 %v3387_v12  ;;  %6681 = vmatprep.mubr.msk.bf16.mxu0 %vm7333_vm0, %v7332_v1 }
0x1270   :  { %v3379_v49 = vmul.f32 %v7219_v29, %v8347_v30 }
0x1272   :  { %v3380_v14 = vpack.c.bf16 %v3379_v49, %v3378_v63 }
0x1276   :  { %6682 = vmatmul.mubr.msk.bf16.vlgmr.msra.gmra.mrb[92].mxu0 %vm617_vm9, %v3380_v14 }
0x1277   :  { %3731 = vmatprep.mubr.bf16.mxu0 %v7334_v27 }
0x12e8   :  { %v8409_v21 = vpop.f32.mrb[64].mxu0 }
0x12e9   :  { %v6599_v32 = vpop.f32.mrb[65].mxu0 }
0x12ea   :  { %v8411_v19 = vpop.f32.mrb[66].mxu0 }
0x12eb   :  { %v6600_v4 = vpop.f32.mrb[67].mxu0 }
0x12f0   :  { %v2615_v33 = vpop.f32.mrb[68].mxu0 }
0x12f1   :  { %v6611_v57 = vpop.f32.mrb[69].mxu0 }
0x12f2   :  { %v2618_v38 = vpop.f32.mrb[70].mxu0 }
0x12f3   :  { %v6846_v41 = vpack.i.bf16 %v2615_v33, %v2618_v38  ;;  %v6612_v58 = vpop.f32.mrb[71].mxu0 }
0x12f5   :  { %6847 = vrot.lane.b32.xlu0 %v6846_v41, %s9129_s23 }
0x12f8   :  { %v2740_v30 = vpop.f32.mrb[72].mxu0 }
0x12f9   :  { %v6623_v20 = vpop.f32.mrb[73].mxu0 }
0x12fa   :  { %v2743_v23 = vpop.f32.mrb[74].mxu0 }
0x12fb   :  { %v6861_v36 = vpack.i.bf16 %v2740_v30, %v2743_v23  ;;  %v6624_v31 = vpop.f32.mrb[75].mxu0 }
0x1300   :  { %v2865_v62 = vpop.f32.mrb[76].mxu0 }
0x1301   :  { %v6635_v2 = vpop.f32.mrb[77].mxu0 }
0x1302   :  { %v2868_v13 = vpop.f32.mrb[78].mxu0 }
0x1303   :  { %v6871_v5 = vpack.i.bf16 %v2865_v62, %v2868_v13  ;;  %v6636_v3 = vpop.f32.mrb[79].mxu0 }
0x1308   :  { %v3048_v42 = vpop.f32.mrb[80].mxu0 }
0x1309   :  { %v6647_v10 = vpop.f32.mrb[81].mxu0 }
0x130a   :  { %v3051_v8 = vpop.f32.mrb[82].mxu0 }
0x130b   :  { %v6648_v15 = vpop.f32.mrb[83].mxu0 }
0x132b   :  { %v3173_v26 = vpop.f32.mrb[84].mxu0 }
0x132c   :  { %v6659_v59 = vpop.f32.mrb[85].mxu0 }
0x132d   :  { %v3176_v18 = vpop.f32.mrb[86].mxu0 }
0x132e   :  { %v6851_v52 = vpack.i.bf16 %v3176_v18, %v3173_v26  ;;  %v6660_v11 = vpop.f32.mrb[87].mxu0 }
0x1330   :  { %6852 = vrot.lane.b32.xlu0 %v6851_v52, %s9129_s23 }
0x1341   :  { %v3298_v39 = vpop.f32.mrb[88].mxu0 }
0x1342   :  { %v6671_v17 = vpop.f32.mrb[89].mxu0 }
0x1343   :  { %v3301_v34 = vpop.f32.mrb[90].mxu0 }
0x1344   :  { %v6856_v40 = vpack.i.bf16 %v3301_v34, %v3298_v39  ;;  %v6672_v47 = vpop.f32.mrb[91].mxu0 }
0x1346   :  { %6857 = vrot.lane.b32.xlu0 %v6856_v40, %s7338_s0 }
0x1349   :  { %v3423_v43 = vpop.f32.mrb[92].mxu0 }
0x134a   :  { %6862 = vrot.lane.b32.xlu0 %v6861_v36, %s7338_s0  ;;  %v6683_v16 = vpop.f32.mrb[93].mxu0 }
0x134b   :  { %v3426_v45 = vpop.f32.mrb[94].mxu0 }
0x134c   :  { %v6866_v35 = vpack.i.bf16 %v3426_v45, %v3423_v43  ;;  %v6684_v50 = vpop.f32.mrb[95].mxu0 }
0x134e   :  { %6867 = vrot.lane.b32.xlu1 %v6866_v35, %s7341_s29 }
0x1352   :  { %6872 = vrot.lane.b32.xlu1 %v6871_v5, %s7341_s29 }
0x1367   :  { %v6848_v9 = vpop.permute.xlu0 %6847 }
0x1368   :  { %v6850_v49 = vunpack.i.h.bf16 %v6848_v9  ;;  %v6849_v63 = vunpack.i.l.bf16 %v6848_v9 }
0x136a   :  { %v2896_v2 = vsel %vm567_vm8, %v8409_v21, %v6850_v49  ;;  %v2897_v13 = vsel %vm567_vm8, %v8411_v19, %v6849_v63  ;;  %v6022_v21 = vld [vmem:[%s9103_s11 + $0x1] ss:$0 sm:$0xff]  ;;  %v6992_v63 = vld [vmem:[%s9104_s14 + $0x44] ss:$8 sps:$4 sm:$0xff]  }
0x136b   :  { %3699 = vmatprep.subr.bf16.mxu0 %v6992_v63 }
0x13a2   :  { %v6853_v46 = vpop.permute.xlu0 %6852 }
0x13a3   :  { %v6855_v28 = vunpack.i.h.bf16 %v6853_v46  ;;  %v6854_v53 = vunpack.i.l.bf16 %v6853_v46 }
0x13a5   :  { %v3455_v32 = vsel %vm567_vm8, %v3051_v8, %v6855_v28  ;;  %v3454_v4 = vsel %vm567_vm8, %v3048_v42, %v6854_v53 }
0x13b8   :  { %v6858_v48 = vpop.permute.xlu0 %6857 }
0x13b9   :  { %v6860_v12 = vunpack.i.h.bf16 %v6858_v48  ;;  %v6859_v22 = vunpack.i.l.bf16 %v6858_v48 }
0x13bb   :  { %v3457_v38 = vsel %vm1095_vm11, %v3455_v32, %v6860_v12  ;;  %v3456_v41 = vsel %vm1095_vm11, %v3454_v4, %v6859_v22  ;;  %v6995_v32 = vld [vmem:[%s9104_s14 + $0x54] ss:$8 sps:$4 sm:$0xff]   ;;  %v6993_v4 = vld [vmem:[%s9104_s14 + $0x50] ss:$8 sps:$4 sm:$0xff]  }
0x13bc   :  { %v6863_v29 = vpop.permute.xlu0 %6862 }
0x13bd   :  { %v6865_v58 = vunpack.i.h.bf16 %v6863_v29  ;;  %v6864_v30 = vunpack.i.l.bf16 %v6863_v29 }
0x13bf   :  { %v2898_v42 = vsel %vm1095_vm11, %v2896_v2, %v6865_v58  ;;  %v2899_v10 = vsel %vm1095_vm11, %v2897_v13, %v6864_v30 }
0x13c0   :  { %v6868_v14 = vpop.permute.xlu1 %6867 }
0x13c1   :  { %v6870_v33 = vunpack.i.h.bf16 %v6868_v14  ;;  %v6869_v57 = vunpack.i.l.bf16 %v6868_v14  ;;  %v6990_v14 = vld [vmem:[%s9104_s14 + $0x40] ss:$8 sps:$4 sm:$0xff]  }
0x13c2   :  { %3700 = vmatpush1.bf16.msra.mxu0 %v6990_v14 }
0x13c3   :  { %v3459_v20 = vsel %vm1098_vm12, %v3457_v38, %v6870_v33  ;;  %v3458_v23 = vsel %vm1098_vm12, %v3456_v41, %v6869_v57  ;;  %3701 = vmatprep.subr.bf16.mxu0 %v6995_v32  ;;  %v6998_v33 = vld [vmem:[%s9104_s14 + $0x64] ss:$8 sps:$4 sm:$0xff]   ;;  %v6996_v57 = vld [vmem:[%s9104_s14 + $0x60] ss:$8 sps:$4 sm:$0xff]   ;;  %v6999_v38 = vld [vmem:[%s9104_s14 + $0x70] ss:$8 sps:$4 sm:$0xff]  }
0x13c4   :  { %v3463_v36 = vrot.slane %v3459_v20, 7  ;;  %v3462_v31 = vrot.slane %v3458_v23, 7  ;;  %v6873_v62 = vpop.permute.xlu1 %6872  ;;  %v7001_v41 = vld [vmem:[%s9104_s14 + $0x74] ss:$8 sps:$4 sm:$0xff]  }
0x13c5   :  { %v6875_v5 = vunpack.i.h.bf16 %v6873_v62  ;;  %v6874_v3 = vunpack.i.l.bf16 %v6873_v62 }
0x13c6   :  { %v3464_v8 = vsel %vm374_vm1, %v3462_v31, %v3463_v36  ;;  %3702 = vmatpush1.bf16.msra.mxu0 %v6993_v4 }
0x13c7   :  { %v2900_v15 = vsel %vm1098_vm12, %v2898_v42, %v6875_v5  ;;  %v2901_v26 = vsel %vm1098_vm12, %v2899_v10, %v6874_v3  ;;  %v3469_v52 = vpack.c.bf16 %v3464_v8, %v3464_v8  ;;  %3703 = vmatprep.subr.bf16.mxu0 %v6998_v33  ;;  %v6031_v42 = vld [vmem:[%s9105_s12 + $0x1] ss:$0 sm:$0xff] }
0x13c8   :  { %v3467_v59 = vsel %vm374_vm1, %v2901_v26, %v3462_v31 }
0x13c9   :  { %v3468_v18 = vpack.c.bf16 %v3467_v59, %v2900_v15  ;;  %v6032_v59 = vld [vmem:[%s9106_s13 + $0x1] ss:$0 sm:$0xff] }
0x13ca   :  { %3704 = vmatpush1.bf16.msra.mxu0 %v6996_v57 }
0x13cb   :  { %6693 = vmatprep.mubr.msk.bf16.mxu1 %vm381_vm2, %v3468_v18  ;;  %3705 = vmatprep.subr.bf16.mxu0 %v7001_v41 }
0x13cc   :  { %6694 = vmatmul.mubr.msk.bf16.vlgmr.msra.gmra.mrb[76].mxu1 %vm381_vm2, %v3469_v52 }
0x13ce   :  { %3706 = vmatpush1.bf16.msra.mxu0 %v6999_v38 }
0x149f   :  { %v6695_v19 = vpop.f32.mrb[76].mxu1 }
0x14a0   :  { %v3551_v11 = vpop.f32.mrb[77].mxu1  ;;  %v3560_v24 = vadd.f32 %v6695_v19, %v6022_v21 }
0x14a1   :  { %v3552_v44 = vadd.f32 %v6022_v21, %v3551_v11  ;;  %v6696_v39 = vpop.f32.mrb[78].mxu1 }
0x14a2   :  { %v3554_v17 = vpop.f32.mrb[79].mxu1  ;;  %v8456_v40 = vadd.f32 %v3560_v24, %v8080_v55 }
0x14a3   :  { %v8453_v34 = vadd.f32 %v3552_v44, %v8070_v6  ;;  %v3555_v7 = vadd.f32 %v6022_v21, %v3554_v17  ;;  %v7002_v17 = vld [vmem:[%s9107_s16 + $0xc0] sm:$0xff]  }
0x14a4   :  { %v3578_v16 = vsel %vm388_vm4, %v8456_v40, 0.0  ;;  %6367 = vmatprep.subr.bf16.mxu1 %v7002_v17 }
0x14a5   :  { %v8459_v47 = vadd.f32 %v3555_v7, %v8073_v25  ;;  %v3572_v54 = vsel %vm381_vm2, %v8453_v34, 0.0  ;;  %v7003_v7 = vld [vmem:[%s9107_s16 + $0x80] sm:$0xff]  }
0x14a6   :  { %3573 = vadd.xlane.f32.xlu0 %v3572_v54  ;;  %6368 = vmatpush3.bf16.msra.mxu1 %v7003_v7  ;;  %v7004_v54 = vld [vmem:[%s9107_s16 + $0xc8] sm:$0xff]  }
0x14a7   :  { %v3575_v43 = vsel %vm381_vm2, %v8459_v47, 0.0  ;;  %6369 = vmatprep.subr.bf16.mxu1 %v7004_v54 }
0x14a8   :  { %3576 = vadd.xlane.f32.xlu1 %v3575_v43  ;;  %v7005_v43 = vld [vmem:[%s9107_s16 + $0x88] sm:$0xff]  }
0x14aa   :  { %3579 = vadd.xlane.f32.xlu0 %v3578_v16  ;;  %6370 = vmatpush3.bf16.msra.mxu1 %v7005_v43  ;;  %v7006_v16 = vld [vmem:[%s9107_s16 + $0xd0] sm:$0xff]  }
0x14ab   :  { %6371 = vmatprep.subr.bf16.mxu1 %v7006_v16 }
0x1533   :  { %v3574_v6 = vpop.xlane.xlu0 %3573 }
0x1534   :  { %v3581_v45 = vmul.f32 0.015625, %v3574_v6  ;;  %v7007_v6 = vld [vmem:[%s9107_s16 + $0x90] sm:$0xff]  }
0x1535   :  { %v3577_v35 = vpop.xlane.xlu1 %3576  ;;  %6372 = vmatpush3.bf16.msra.mxu1 %v7007_v6 }
0x1536   :  { %v3584_v55 = vsub.f32 %v8453_v34, %v3581_v45  ;;  %v3582_v50 = vmul.f32 0.015625, %v3577_v35  ;;  %v7008_v45 = vld [vmem:[%s9107_s16 + $0xd8] sm:$0xff]  }
0x1537   :  { %v3580_v25 = vpop.xlane.xlu0 %3579  ;;  %v7009_v35 = vld [vmem:[%s9107_s16 + $0x98] sm:$0xff]   ;;  %6373 = vmatprep.subr.bf16.mxu1 %v7008_v45 }
0x1538   :  { %v3585_v9 = vsub.f32 %v8459_v47, %v3582_v50  ;;  %v3583_v46 = vmul.f32 0.015625, %v3580_v25  ;;  %v3587_v48 = vmul.f32 %v3584_v55, %v3584_v55  ;;  %v7011_v50 = vld [vmem:[%s9107_s16 + $0xa0] sm:$0xff]   ;;  %v7012_v25 = vld [vmem:[%s9107_s16 + $0xe8] sm:$0xff]  }
0x1539   :  { %6374 = vmatpush3.bf16.msra.mxu1 %v7009_v35 }
0x153a   :  { %v3586_v28 = vsub.f32 %v8456_v40, %v3583_v46  ;;  %v3590_v53 = vsel %vm381_vm2, %v3587_v48, 0.0  ;;  %v3588_v12 = vmul.f32 %v3585_v9, %v3585_v9  ;;  %v7014_v46 = vld [vmem:[%s9107_s16 + $0xf0] sm:$0xff]  }
0x153b   :  { %3591 = vadd.xlane.f32.xlu0 %v3590_v53  ;;  %v7015_v48 = vld [vmem:[%s9107_s16 + $0xb0] sm:$0xff]   ;;  %v7017_v53 = vld [vmem:[%s9107_s16 + $0xb8] sm:$0xff]  }
0x153c   :  { %v3589_v22 = vmul.f32 %v3586_v28, %v3586_v28  ;;  %v3593_v29 = vsel %vm381_vm2, %v3588_v12, 0.0  ;;  %v6041_v12 = vld [vmem:[%s9108_s15 + $0x2] sm:$0x3] }
0x153e   :  { %v3596_v49 = vsel %vm388_vm4, %v3589_v22, 0.0  ;;  %v3646_v22 = vrot.slane %v6041_v12, %v7563_v51 }
0x153f   :  { %3594 = vadd.xlane.f32.xlu0 %v3593_v29  ;;  %3597 = vadd.xlane.f32.xlu1 %v3596_v49  ;;  %v3650_v29 = vrot.slane %v6041_v12, %v7631_v56 }
0x15c8   :  { %v3592_v58 = vpop.xlane.xlu0 %3591 }
0x15c9   :  { %v3599_v30 = vmul.f32 0.015625, %v3592_v58 }
0x15cb   :  { %v3602_v20 = vadd.f32 1e-06, %v3599_v30 }
0x15cc   :  { %v3598_v23 = vpop.xlane.xlu1 %3597  ;;  %v3595_v36 = vpop.xlane.xlu0 %3594 }
0x15cd   :  { %7220 = vrsqrt.f32 %v3602_v20  ;;  %v3601_v31 = vmul.f32 0.015625, %v3598_v23  ;;  %v3600_v62 = vmul.f32 0.015625, %v3595_v36 }
0x15cf   :  { %v3604_v2 = vadd.f32 1e-06, %v3601_v31  ;;  %v3603_v13 = vadd.f32 1e-06, %v3600_v62 }
0x15d1   :  { %7222 = vrsqrt.f32 %v3604_v2 }
0x15d2   :  { %7224 = vrsqrt.f32 %v3603_v13 }
0x15d7   :  { %v7221_v5 = vpop.eup %7220 }
0x15d8   :  { %v3608_v3 = vmul.f32 %v7221_v5, %v3584_v55  ;;  %v7010_v55 = vld [vmem:[%s9107_s16 + $0xe0] sm:$0xff]  }
0x15d9   :  { %6375 = vmatprep.subr.bf16.mxu1 %v7010_v55 }
0x15da   :  { %v3617_v15 = vmul.f32 %v6031_v42, %v3608_v3  ;;  %6376 = vmatpush3.bf16.msra.mxu1 %v7011_v50 }
0x15db   :  { %v7223_v10 = vpop.eup %7222  ;;  %6377 = vmatprep.subr.bf16.mxu1 %v7012_v25 }
0x15dc   :  { %v7225_v8 = vpop.eup %7224  ;;  %v3610_v52 = vmul.f32 %v7223_v10, %v3586_v28  ;;  %v3626_v21 = vadd.f32 %v6032_v59, %v3617_v15  ;;  %v7016_v28 = vld [vmem:[%s9107_s16 + $0xf8] sm:$0xff]  }
0x15dd   :  { %v3609_v26 = vmul.f32 %v7225_v8, %v3585_v9  ;;  %v7013_v9 = vld [vmem:[%s9107_s16 + $0xa8] sm:$0xff]  }
0x15de   :  { %v3619_v24 = vmul.f32 %v6031_v42, %v3610_v52  ;;  %6378 = vmatpush3.bf16.msra.mxu1 %v7013_v9 }
0x15df   :  { %v3618_v18 = vmul.f32 %v6031_v42, %v3609_v26  ;;  %6379 = vmatprep.subr.bf16.mxu1 %v7014_v46 }
0x15e0   :  { %v3628_v44 = vadd.f32 %v6032_v59, %v3619_v24 }
0x15e1   :  { %v3627_v19 = vadd.f32 %v6032_v59, %v3618_v18 }
0x15e2   :  { %v3630_v39 = vpack.c.bf16 %v3628_v44, %v3628_v44  ;;  %6380 = vmatpush3.bf16.msra.mxu1 %v7015_v48 }
0x15e3   :  { %v3629_v11 = vpack.c.bf16 %v3627_v19, %v3626_v21  ;;  %6381 = vmatprep.subr.bf16.mxu1 %v7016_v28 }
0x15e5   :  { %6050 = vmatmul.mubr.msk.bf16.vlgmr.msra.gmra.mrb[96].mxu0 %vm381_vm2, %v3629_v11 }
0x15e6   :  { %3741 = vmatprep.mubr.bf16.mxu0 %v7334_v27  ;;  %6382 = vmatpush3.bf16.msra.mxu1 %v7017_v53 }
0x15e7   :  { %6709 = vmatprep.subr.bf16.mxu1 %v7332_v1 }
0x15ed   :  { %6051 = vmatmul.mubr.msk.bf16.gmra.mrb[100].mxu0 %vm381_vm2, %v3630_v39 }
0x15ee   :  { %4159 = vmatprep.mubr.bf16.mxu0 %v7334_v27 }
0x16b8   :  { %v3733_v49 = vpop.f32.mrb[96].mxu0 }
0x16b9   :  { %v3734_v63 = vadd.f32 %v3733_v49, %v3646_v22  ;;  %v3735_v14 = vpop.f32.mrb[97].mxu0 }
0x16ba   :  { %v3736_v32 = vadd.f32 %v3735_v14, %v3650_v29  ;;  %v3737_v4 = vpop.f32.mrb[98].mxu0 }
0x16bb   :  { %v3756_v33 = vmul.f32 0.044715, %v3734_v63  ;;  %v3738_v57 = vadd.f32 %v3737_v4, %v3646_v22  ;;  %v3739_v38 = vpop.f32.mrb[99].mxu0  ;;  %v3750_v12 = vmul.f32 0.5, %v3734_v63 }
0x16bc   :  { %v3757_v41 = vmul.f32 0.044715, %v3736_v32  ;;  %v3740_v58 = vadd.f32 %v3739_v38, %v3650_v29  ;;  %v3751_v49 = vmul.f32 0.5, %v3736_v32 }
0x16bd   :  { %v3762_v30 = vmul.f32 %v3756_v33, %v3734_v63  ;;  %v3758_v20 = vmul.f32 0.044715, %v3738_v57 }
0x16be   :  { %v3763_v23 = vmul.f32 %v3757_v41, %v3736_v32  ;;  %v3759_v36 = vmul.f32 0.044715, %v3740_v58  ;;  %v3753_v14 = vmul.f32 0.5, %v3740_v58 }
0x16bf   :  { %v3768_v31 = vmul.f32 %v3762_v30, %v3734_v63  ;;  %v3764_v62 = vmul.f32 %v3758_v20, %v3738_v57 }
0x16c0   :  { %v3769_v2 = vmul.f32 %v3763_v23, %v3736_v32  ;;  %v3765_v13 = vmul.f32 %v3759_v36, %v3740_v58  ;;  %v3743_v5 = vpop.f32.mrb[100].mxu0 }
0x16c1   :  { %v3774_v3 = vadd.f32 %v3768_v31, %v3734_v63  ;;  %v3770_v42 = vmul.f32 %v3764_v62, %v3738_v57  ;;  %v3744_v10 = vadd.f32 %v3743_v5, %v3646_v22  ;;  %v3745_v8 = vpop.f32.mrb[101].mxu0  ;;  %v3752_v22 = vmul.f32 0.5, %v3738_v57 }
0x16c2   :  { %v3771_v15 = vmul.f32 %v3765_v13, %v3740_v58  ;;  %v3746_v26 = vadd.f32 %v3745_v8, %v3650_v29  ;;  %v3747_v59 = vpop.f32.mrb[102].mxu0  ;;  %v3775_v18 = vadd.f32 %v3769_v2, %v3736_v32 }
0x16c3   :  { %v3780_v52 = vmul.f32 0.7978846, %v3774_v3  ;;  %v3776_v21 = vadd.f32 %v3770_v42, %v3738_v57  ;;  %v3760_v19 = vmul.f32 0.044715, %v3744_v10  ;;  %v3748_v11 = vpop.f32.mrb[103].mxu0  ;;  %v3754_v5 = vmul.f32 0.5, %v3744_v10 }
0x16c4   :  { %v3761_v24 = vmul.f32 0.044715, %v3746_v26  ;;  %v3777_v44 = vadd.f32 %v3771_v15, %v3740_v58  ;;  %v3781_v39 = vmul.f32 0.7978846, %v3775_v18  ;;  %v3755_v2 = vmul.f32 0.5, %v3746_v26 }
0x16c5   :  { %7226 = vtanh.f32 %v3780_v52  ;;  %v3782_v17 = vmul.f32 0.7978846, %v3776_v21  ;;  %v3766_v7 = vmul.f32 %v3760_v19, %v3744_v10  ;;  %v6085_v42 = vld [vmem:[%s9109_s17 + $0x1] ss:$0 sm:$0xff] }
0x16c6   :  { %v3767_v54 = vmul.f32 %v3761_v24, %v3746_v26  ;;  %v3783_v43 = vmul.f32 0.7978846, %v3777_v44  ;;  %7228 = vtanh.f32 %v3781_v39 }
0x16c7   :  { %7230 = vtanh.f32 %v3782_v17  ;;  %v3772_v16 = vmul.f32 %v3766_v7, %v3744_v10 }
0x16c8   :  { %7232 = vtanh.f32 %v3783_v43  ;;  %v3773_v6 = vmul.f32 %v3767_v54, %v3746_v26 }
0x16c9   :  { %v3778_v45 = vadd.f32 %v3772_v16, %v3744_v10 }
0x16ca   :  { %v3779_v35 = vadd.f32 %v3773_v6, %v3746_v26 }
0x16cb   :  { %v3784_v55 = vmul.f32 0.7978846, %v3778_v45 }
0x16cc   :  { %v3785_v50 = vmul.f32 0.7978846, %v3779_v35 }
0x16cd   :  { %7234 = vtanh.f32 %v3784_v55 }
0x16ce   :  { %7236 = vtanh.f32 %v3785_v50 }
0x16cf   :  { %v7227_v25 = vpop.eup %7226 }
0x16d0   :  { %v7229_v9 = vpop.eup %7228  ;;  %v3792_v46 = vadd.f32 1.0, %v7227_v25 }
0x16d1   :  { %v7231_v48 = vpop.eup %7230  ;;  %v3793_v28 = vadd.f32 1.0, %v7229_v9 }
0x16d2   :  { %v7233_v53 = vpop.eup %7232  ;;  %v3794_v29 = vadd.f32 1.0, %v7231_v48  ;;  %v3798_v33 = vmul.f32 %v3792_v46, %v3750_v12 }
0x16d3   :  { %v3795_v4 = vadd.f32 1.0, %v7233_v53  ;;  %v3799_v41 = vmul.f32 %v3793_v28, %v3751_v49  ;;  %v7018_v49 = vld [vmem:[%s9098_s8 + $0x80] ss:$8 sps:$4 sm:$0xff]  }
0x16d4   :  { %v3800_v38 = vmul.f32 %v3794_v29, %v3752_v22  ;;  %v7020_v29 = vld [vmem:[%s9098_s8 + $0x84] ss:$8 sps:$4 sm:$0xff]  }
0x16d5   :  { %v3801_v30 = vmul.f32 %v3795_v4, %v3753_v14  ;;  %4127 = vmatprep.subr.bf16.mxu0 %v7020_v29  ;;  %v7023_v14 = vld [vmem:[%s9098_s8 + $0x94] ss:$8 sps:$4 sm:$0xff]   ;;  %v7021_v4 = vld [vmem:[%s9098_s8 + $0x90] ss:$8 sps:$4 sm:$0xff]  }
0x16d6   :  { %v3804_v20 = vpack.c.bf16 %v3800_v38, %v3798_v33  ;;  %4128 = vmatpush1.bf16.msra.mxu0 %v7018_v49  ;;  %v7026_v33 = vld [vmem:[%s9098_s8 + $0xa4] ss:$8 sps:$4 sm:$0xff]   ;;  %v7024_v38 = vld [vmem:[%s9098_s8 + $0xa0] ss:$8 sps:$4 sm:$0xff]  }
0x16d7   :  { %v7235_v23 = vpop.eup %7234  ;;  %v3805_v36 = vpack.c.bf16 %v3801_v30, %v3799_v41  ;;  %4129 = vmatprep.subr.bf16.mxu0 %v7023_v14  ;;  %v7029_v41 = vld [vmem:[%s9098_s8 + $0xb4] ss:$8 sps:$4 sm:$0xff]   ;;  %v7027_v30 = vld [vmem:[%s9098_s8 + $0xb0] ss:$8 sps:$4 sm:$0xff]  }
0x16d8   :  { %v7237_v31 = vpop.eup %7236  ;;  %v3796_v62 = vadd.f32 1.0, %v7235_v23 }
0x16d9   :  { %3977 = vmatprep.mubr.bf16.mxu1 %v3805_v36  ;;  %v3797_v13 = vadd.f32 1.0, %v7237_v31 }
0x16da   :  { %3978 = vmatmul.mubr.bf16.vlgmr.msra.gmra.mrb[80].mxu1 %v3804_v20  ;;  %v3802_v57 = vmul.f32 %v3796_v62, %v3754_v5  ;;  %4130 = vmatpush1.bf16.msra.mxu0 %v7021_v4 }
0x16db   :  { %v3803_v63 = vmul.f32 %v3797_v13, %v3755_v2  ;;  %4131 = vmatprep.subr.bf16.mxu0 %v7026_v33 }
0x16dc   :  { %v3806_v32 = vpack.c.bf16 %v3802_v57, %v3802_v57 }
0x16dd   :  { %v3807_v3 = vpack.c.bf16 %v3803_v63, %v3803_v63 }
0x16de   :  { %4132 = vmatpush1.bf16.msra.mxu0 %v7024_v38 }
0x16df   :  { %3985 = vmatprep.mubr.bf16.mxu1 %v3807_v3  ;;  %4133 = vmatprep.subr.bf16.mxu0 %v7029_v41  ;;  %v6104_v3 = vld [vmem:[%s9099_s6 + $0x2] ss:$0 sm:$0xff] }
0x16e2   :  { %3986 = vmatmul.mubr.bf16.gmra.mrb[84].mxu1 %v3806_v32  ;;  %4134 = vmatpush1.bf16.msra.mxu0 %v7027_v30 }
0x16e3   :  { %6711 = vmatprep.mubr.msk.bf16.mxu1 %vm7333_vm0, %v7332_v1  ;;  %6697 = vmatprep.subr.bf16.mxu0 %v7332_v1 }
0x17ad   :  { %v6383_v58 = vpop.f32.mrb[80].mxu1 }
0x17ae   :  { %v6384_v8 = vpop.f32.mrb[81].mxu1 }
0x17af   :  { %v6385_v15 = vadd.f32 %v6384_v8, %v6383_v58  ;;  %v6386_v26 = vpop.f32.mrb[82].mxu1 }
0x17b0   :  { %v6387_v59 = vpop.f32.mrb[83].mxu1 }
0x17b1   :  { %v3980_v18 = vadd.f32 %v6385_v15, %v6085_v42  ;;  %v6388_v10 = vadd.f32 %v6387_v59, %v6386_v26  ;;  %v6105_v15 = vld [vmem:[%s9100_s7 + $0x2] ss:$0 sm:$0xff] }
0x17b3   :  { %v8567_v52 = vadd.f32 %v3980_v18, %v8453_v34  ;;  %v3983_v21 = vadd.f32 %v6388_v10, %v6085_v42 }
0x17b5   :  { %v8570_v19 = vadd.f32 %v3983_v21, %v8459_v47  ;;  %v6389_v11 = vpop.f32.mrb[84].mxu1  ;;  %v4000_v24 = vsel %vm381_vm2, %v8567_v52, 0.0 }
0x17b6   :  { %v6390_v44 = vpop.f32.mrb[85].mxu1  ;;  %4001 = vadd.xlane.f32.xlu0 %v4000_v24 }
0x17b7   :  { %v6391_v39 = vadd.f32 %v6390_v44, %v6389_v11  ;;  %v6392_v17 = vpop.f32.mrb[86].mxu1  ;;  %v4003_v7 = vsel %vm381_vm2, %v8570_v19, 0.0 }
0x17b8   :  { %v6393_v54 = vpop.f32.mrb[87].mxu1  ;;  %4004 = vadd.xlane.f32.xlu1 %v4003_v7  ;;  %v6114_v17 = vld [vmem:[%s9101_s9 + $0x4] sm:$0x3]  ;;  %s9130_s9 = smov 80  }
0x17b9   :  { %v3988_v43 = vadd.f32 %v6391_v39, %v6085_v42  ;;  %v4074_v7 = vrot.slane %v6114_v17, %v7563_v51 }
0x17bb   :  { %v8577_v34 = vadd.f32 %v3988_v43, %v8456_v40  ;;  %v4078_v43 = vrot.slane %v6114_v17, %v7631_v56 }
0x17bd   :  { %v4006_v47 = vsel %vm388_vm4, %v8577_v34, 0.0 }
0x17be   :  { %4007 = vadd.xlane.f32.xlu0 %v4006_v47 }
0x1843   :  { %v4002_v16 = vpop.xlane.xlu0 %4001 }
0x1844   :  { %v4009_v6 = vmul.f32 0.015625, %v4002_v16 }
0x1845   :  { %v4005_v45 = vpop.xlane.xlu1 %4004 }
0x1846   :  { %v4012_v35 = vsub.f32 %v8567_v52, %v4009_v6  ;;  %v4010_v55 = vmul.f32 0.015625, %v4005_v45 }
0x1848   :  { %v4013_v50 = vsub.f32 %v8570_v19, %v4010_v55  ;;  %v4015_v25 = vmul.f32 %v4012_v35, %v4012_v35 }
0x184a   :  { %v4018_v9 = vsel %vm381_vm2, %v4015_v25, 0.0  ;;  %v4016_v46 = vmul.f32 %v4013_v50, %v4013_v50 }
0x184b   :  { %4019 = vadd.xlane.f32.xlu1 %v4018_v9  ;;  %v4008_v48 = vpop.xlane.xlu0 %4007 }
0x184c   :  { %v4011_v40 = vmul.f32 0.015625, %v4008_v48  ;;  %v4021_v28 = vsel %vm381_vm2, %v4016_v46, 0.0 }
0x184d   :  { %4022 = vadd.xlane.f32.xlu0 %v4021_v28 }
0x184e   :  { %v4014_v53 = vsub.f32 %v8577_v34, %v4011_v40 }
0x1850   :  { %v4017_v12 = vmul.f32 %v4014_v53, %v4014_v53 }
0x1852   :  { %v4024_v22 = vsel %vm388_vm4, %v4017_v12, 0.0 }
0x1853   :  { %4025 = vadd.xlane.f32.xlu1 %v4024_v22 }
0x18d8   :  { %v4020_v20 = vpop.xlane.xlu1 %4019 }
0x18d9   :  { %v4027_v23 = vmul.f32 0.015625, %v4020_v20 }
0x18da   :  { %v4023_v36 = vpop.xlane.xlu0 %4022 }
0x18db   :  { %v4030_v31 = vadd.f32 1e-06, %v4027_v23  ;;  %v4028_v62 = vmul.f32 0.015625, %v4023_v36 }
0x18dd   :  { %7238 = vrsqrt.f32 %v4030_v31  ;;  %v4031_v2 = vadd.f32 1e-06, %v4028_v62 }
0x18df   :  { %7240 = vrsqrt.f32 %v4031_v2 }
0x18e0   :  { %v4026_v13 = vpop.xlane.xlu1 %4025 }
0x18e1   :  { %v4029_v5 = vmul.f32 0.015625, %v4026_v13 }
0x18e3   :  { %v4032_v63 = vadd.f32 1e-06, %v4029_v5 }
0x18e5   :  { %7242 = vrsqrt.f32 %v4032_v63 }
0x18e7   :  { %v7239_v57 = vpop.eup %7238 }
0x18e8   :  { %v4036_v32 = vmul.f32 %v7239_v57, %v4012_v35 }
0x18e9   :  { %v7241_v58 = vpop.eup %7240 }
0x18ea   :  { %v4045_v42 = vmul.f32 %v6104_v3, %v4036_v32  ;;  %v4037_v8 = vmul.f32 %v7241_v58, %v4013_v50 }
0x18ec   :  { %v4046_v26 = vmul.f32 %v6104_v3, %v4037_v8  ;;  %v4054_v59 = vadd.f32 %v6105_v15, %v4045_v42 }
0x18ee   :  { %v4055_v18 = vadd.f32 %v6105_v15, %v4046_v26 }
0x18ef   :  { %v7243_v10 = vpop.eup %7242 }
0x18f0   :  { %v4057_v21 = vpack.c.bf16 %v4055_v18, %v4054_v59  ;;  %v4038_v11 = vmul.f32 %v7243_v10, %v4014_v53 }
0x18f2   :  { %6123 = vmatmul.mubr.msk.bf16.vlgmr.msra.gmra.mrb[104].mxu0 %vm381_vm2, %v4057_v21  ;;  %v4047_v24 = vmul.f32 %v6104_v3, %v4038_v11 }
0x18f3   :  { %4169 = vmatprep.mubr.bf16.mxu0 %v7334_v27 }
0x18f4   :  { %v4056_v44 = vadd.f32 %v6105_v15, %v4047_v24 }
0x18f6   :  { %v4058_v39 = vpack.c.bf16 %v4056_v44, %v4056_v44 }
0x18fa   :  { %6124 = vmatmul.mubr.msk.bf16.gmra.mrb[108].mxu0 %vm381_vm2, %v4058_v39 }
0x18fb   :  { %6699 = vmatprep.mubr.msk.bf16.mxu0 %vm7333_vm0, %v7332_v1 }
0x19c5   :  { %v4161_v54 = vpop.f32.mrb[104].mxu0 }
0x19c6   :  { %v4163_v47 = vpop.f32.mrb[105].mxu0  ;;  %v4162_v6 = vadd.f32 %v4161_v54, %v4074_v7 }
0x19c7   :  { %v4165_v16 = vpop.f32.mrb[106].mxu0  ;;  %v4164_v55 = vadd.f32 %v4163_v47, %v4078_v43 }
0x19c8   :  { %v4166_v45 = vadd.f32 %v4165_v16, %v4074_v7  ;;  %v4167_v35 = vpop.f32.mrb[107].mxu0 }
0x19c9   :  { %v4168_v50 = vadd.f32 %v4167_v35, %v4078_v43 }
0x19ca   :  { %v4178_v25 = vpack.c.bf16 %v4166_v45, %v4162_v6 }
0x19cb   :  { %v8628_v9 = vpack.c.bf16 %v4168_v50, %v4164_v55 }
0x19cc   :  { %4306 = vrot.lane.b32.xlu1 %v4178_v25, %s7341_s29  ;;  %4183 = vrot.lane.b32.xlu0 %v4178_v25, %s7336_s26  ;;  %v4710_v40 = vshrl.u32 %v4178_v25, 16  ;;  %v4713_v28 = vshll.u32 %v4178_v25, 16 }
0x19cd   :  { %v4171_v46 = vpop.f32.mrb[108].mxu0  ;;  %v4261_v57 = vand.u32 %v8628_v9, %v7637_v37 }
0x19ce   :  { %v4172_v48 = vadd.f32 %v4171_v46, %v4074_v7  ;;  %v4173_v53 = vpop.f32.mrb[109].mxu0  ;;  %v4712_v14 = vrot.slane %v4710_v40, 4  ;;  %v4715_v4 = vrot.slane %v4713_v28, 5 }
0x19cf   :  { %v8632_v12 = vadd.f32 %v4173_v53, %v4078_v43  ;;  %v4175_v22 = vpop.f32.mrb[110].mxu0 }
0x19d0   :  { %v4180_v29 = vpack.c.bf16 %v4172_v48, %v4172_v48  ;;  %v4176_v49 = vpop.f32.mrb[111].mxu0  ;;  %4304 = vrot.lane.b32.xlu1 %v4178_v25, %s7337_s27  ;;  %4430 = vrot.lane.b32.xlu0 %v4178_v25, %s7339_s28  ;;  %v4716_v20 = vor.u32 %v4715_v4, %v4712_v14 }
0x19d2   :  { %v4718_v33 = vshrl.u32 %v4180_v29, 16  ;;  %v4721_v38 = vshll.u32 %v4180_v29, 16 }
0x19d4   :  { %v4720_v41 = vrot.slane %v4718_v33, 4  ;;  %v4723_v30 = vrot.slane %v4721_v38, 5  ;;  %4432 = vrot.lane.b32.xlu1 %v4178_v25, %s7338_s0  ;;  %4555 = vrot.lane.b32.xlu0 %v4178_v25, %s9130_s9 }
0x19d6   :  { %v4724_v23 = vor.u32 %v4723_v30, %v4720_v41 }
0x19d8   :  { %v4725_v36 = vsel %vm1101_vm7, %v4716_v20, %v4724_v23  ;;  %4557 = vrot.lane.b32.xlu1 %v4178_v25, %s9129_s23 }
0x19d9   :  { %4865 = vrot.lane.b32.xlu0 %v4725_v36, %s7341_s29 }
0x19dc   :  { %4726 = vrot.lane.b32.xlu1 %v4725_v36, %s7336_s26 }
0x19dd   :  { %4990 = vrot.lane.b32.xlu0 %v4725_v36, %s7338_s0 }
0x19e0   :  { %4863 = vrot.lane.b32.xlu1 %v4725_v36, %s7337_s27 }
0x19e1   :  { %5115 = vrot.lane.b32.xlu0 %v4725_v36, %s9129_s23 }
0x19e4   :  { %4988 = vrot.lane.b32.xlu1 %v4725_v36, %s7339_s28 }
0x19e8   :  { %5113 = vrot.lane.b32.xlu1 %v4725_v36, %s9130_s9 }
0x1a3e   :  { %v4307_v31 = vpop.permute.xlu1 %4306  ;;  %v4184_v62 = vpop.permute.xlu0 %4183 }
0x1a3f   :  { %v4312_v2 = vsel %vm567_vm8, %v4307_v31, 0  ;;  %v4189_v13 = vsel %vm567_vm8, %v4184_v62, 0 }
0x1a40   :  { %6698 = vmatpush3.bf16.xpose.msra.mxu0 %v4189_v13  ;;  %6710 = vmatpush3.bf16.xpose.msra.mxu1 %v4312_v2 }
0x1a41   :  { %6703 = vmatprep.subr.bf16.mxu0 %v7332_v1  ;;  %6721 = vmatprep.subr.bf16.mxu1 %v7332_v1 }
0x1a42   :  { %v4305_v5 = vpop.permute.xlu1 %4304  ;;  %v4431_v58 = vpop.permute.xlu0 %4430 }
0x1a46   :  { %v4433_v63 = vpop.permute.xlu1 %4432  ;;  %v4556_v15 = vpop.permute.xlu0 %4555 }
0x1a47   :  { %v4438_v3 = vsel %vm567_vm8, %v4433_v63, 0  ;;  %6700 = vmatmul.mubr.msk.bf16.vlgmr.msra.gmra.mrb[112].mxu0 %vm567_vm8, %v4178_v25  ;;  %6712 = vmatmul.mubr.msk.bf16.vlgmr.msra.gmra.mrb[88].mxu1 %vm567_vm8, %v4305_v5 }
0x1a48   :  { %6704 = vmatpush3.bf16.msra.mxu0 %v4261_v57  ;;  %6722 = vmatpush3.bf16.xpose.msra.mxu1 %v4438_v3 }
0x1a49   :  { %6723 = vmatprep.mubr.msk.bf16.mxu1 %vm7333_vm0, %v7332_v1  ;;  %6733 = vmatprep.subr.bf16.mxu1 %v7332_v1 }
0x1a4a   :  { %6705 = vmatprep.mubr.msk.bf16.mxu0 %vm7333_vm0, %v7332_v1  ;;  %6715 = vmatprep.subr.bf16.mxu0 %v7332_v1  ;;  %v4558_v32 = vpop.permute.xlu1 %4557 }
0x1a4b   :  { %v4563_v42 = vsel %vm567_vm8, %v4558_v32, 0  ;;  %v4866_v59 = vpop.permute.xlu0 %4865 }
0x1a4c   :  { %v4871_v18 = vsel %vm567_vm8, %v4866_v59, 0 }
0x1a4e   :  { %v4727_v8 = vpop.permute.xlu1 %4726 }
0x1a4f   :  { %6724 = vmatmul.mubr.msk.bf16.vlgmr.msra.gmra.mrb[92].mxu1 %vm567_vm8, %v4431_v58  ;;  %v4732_v26 = vsel %vm567_vm8, %v4727_v8, 0  ;;  %v4991_v10 = vpop.permute.xlu0 %4990 }
0x1a50   :  { %6734 = vmatpush3.bf16.xpose.msra.mxu1 %v4563_v42  ;;  %6735 = vmatprep.mubr.msk.bf16.mxu1 %vm7333_vm0, %v7332_v1  ;;  %v4996_v11 = vsel %vm567_vm8, %v4991_v10, 0 }
0x1a51   :  { %6745 = vmatprep.subr.bf16.mxu1 %v7332_v1 }
0x1a52   :  { %v4864_v21 = vpop.permute.xlu1 %4863 }
0x1a53   :  { %v5116_v24 = vpop.permute.xlu0 %5115 }
0x1a54   :  { %v5121_v39 = vsel %vm567_vm8, %v5116_v24, 0 }
0x1a56   :  { %v4989_v44 = vpop.permute.xlu1 %4988 }
0x1a57   :  { %6736 = vmatmul.mubr.msk.bf16.vlgmr.msra.gmra.mrb[96].mxu1 %vm567_vm8, %v4556_v15 }
0x1a58   :  { %6746 = vmatpush3.bf16.xpose.msra.mxu1 %v4732_v26  ;;  %6747 = vmatprep.mubr.msk.bf16.mxu1 %vm7333_vm0, %v7332_v1 }
0x1a59   :  { %6757 = vmatprep.subr.bf16.mxu1 %v7332_v1 }
0x1a5a   :  { %v5114_v17 = vpop.permute.xlu1 %5113 }
0x1a5f   :  { %6748 = vmatmul.mubr.msk.bf16.vlgmr.msra.gmra.mrb[100].mxu1 %vm567_vm8, %v4725_v36 }
0x1a60   :  { %6758 = vmatpush3.bf16.xpose.msra.mxu1 %v4871_v18  ;;  %6759 = vmatprep.mubr.msk.bf16.mxu1 %vm7333_vm0, %v7332_v1 }
0x1a61   :  { %6769 = vmatprep.subr.bf16.mxu1 %v7332_v1 }
0x1a67   :  { %6760 = vmatmul.mubr.msk.bf16.vlgmr.msra.gmra.mrb[104].mxu1 %vm567_vm8, %v4864_v21 }
0x1a68   :  { %6770 = vmatpush3.bf16.xpose.msra.mxu1 %v4996_v11  ;;  %6771 = vmatprep.mubr.msk.bf16.mxu1 %vm7333_vm0, %v7332_v1 }
0x1a69   :  { %6781 = vmatprep.subr.bf16.mxu1 %v7332_v1 }
0x1a6f   :  { %6772 = vmatmul.mubr.msk.bf16.vlgmr.msra.gmra.mrb[108].mxu1 %vm567_vm8, %v4989_v44 }
0x1a70   :  { %6782 = vmatpush3.bf16.xpose.msra.mxu1 %v5121_v39  ;;  %6783 = vmatprep.mubr.msk.bf16.mxu1 %vm7333_vm0, %v7332_v1 }
0x1a77   :  { %6784 = vmatmul.mubr.msk.bf16.vlgmr.msra.gmra.mrb[112].mxu1 %vm567_vm8, %v5114_v17 }
0x1b1a   :  { %v4225_v7 = vpop.f32.mrb[112].mxu0  ;;  %v4348_v54 = vpop.f32.mrb[88].mxu1 }
0x1b1b   :  { %v8687_v43 = vmul.f32 0.25, %v4225_v7  ;;  %v6701_v47 = vpop.f32.mrb[113].mxu0  ;;  %v6713_v16 = vpop.f32.mrb[89].mxu1  ;;  %v8689_v35 = vmul.f32 0.25, %v4348_v54 }
0x1b1c   :  { %v4228_v6 = vpop.f32.mrb[114].mxu0  ;;  %v4351_v45 = vpop.f32.mrb[90].mxu1 }
0x1b1d   :  { %v8691_v55 = vmul.f32 0.25, %v4228_v6  ;;  %v6702_v50 = vpop.f32.mrb[115].mxu0  ;;  %v6714_v25 = vpop.f32.mrb[91].mxu1  ;;  %v4234_v46 = vsel %vm617_vm9, %v8687_v43, -inf  ;;  %v8697_v40 = vmul.f32 0.25, %v4351_v45  ;;  %v4357_v28 = vsel %vm617_vm9, %v8689_v35, -inf }
0x1b1e   :  { %4235 = vmax.xlane.f32.xlu0 %v4234_v46 }
0x1b1f   :  { %v4237_v48 = vsel %vm621_vm10, %v8691_v55, -inf  ;;  %v4360_v33 = vsel %vm621_vm10, %v8697_v40, -inf }
0x1b20   :  { %4238 = vmax.xlane.f32.xlu1 %v4237_v48 }
0x1b22   :  { %v4474_v53 = vpop.f32.mrb[92].mxu1  ;;  %4358 = vmax.xlane.f32.xlu0 %v4357_v28 }
0x1b23   :  { %v6725_v22 = vpop.f32.mrb[93].mxu1  ;;  %v8701_v49 = vmul.f32 0.25, %v4474_v53 }
0x1b24   :  { %v4477_v29 = vpop.f32.mrb[94].mxu1 }
0x1b25   :  { %v8703_v14 = vmul.f32 0.25, %v4477_v29  ;;  %v6726_v4 = vpop.f32.mrb[95].mxu1  ;;  %v4483_v41 = vsel %vm617_vm9, %v8701_v49, -inf }
0x1b26   :  { %4361 = vmax.xlane.f32.xlu0 %v4360_v33 }
0x1b27   :  { %v4486_v38 = vsel %vm621_vm10, %v8703_v14, -inf }
0x1b28   :  { %4487 = vmax.xlane.f32.xlu1 %v4486_v38 }
0x1b2a   :  { %v4599_v30 = vpop.f32.mrb[96].mxu1  ;;  %4484 = vmax.xlane.f32.xlu0 %v4483_v41 }
0x1b2b   :  { %v8711_v20 = vmul.f32 0.25, %v4599_v30  ;;  %v6737_v23 = vpop.f32.mrb[97].mxu1 }
0x1b2c   :  { %v4602_v36 = vpop.f32.mrb[98].mxu1 }
0x1b2d   :  { %v8713_v31 = vmul.f32 0.25, %v4602_v36  ;;  %v6738_v62 = vpop.f32.mrb[99].mxu1  ;;  %v4608_v2 = vsel %vm617_vm9, %v8711_v20, -inf }
0x1b2e   :  { %4609 = vmax.xlane.f32.xlu0 %v4608_v2 }
0x1b2f   :  { %v4611_v13 = vsel %vm621_vm10, %v8713_v31, -inf }
0x1b30   :  { %4612 = vmax.xlane.f32.xlu1 %v4611_v13 }
0x1b32   :  { %v4768_v5 = vpop.f32.mrb[100].mxu1 }
0x1b33   :  { %v8719_v63 = vmul.f32 0.25, %v4768_v5  ;;  %v6749_v57 = vpop.f32.mrb[101].mxu1 }
0x1b34   :  { %v4771_v3 = vpop.f32.mrb[102].mxu1 }
0x1b35   :  { %v8721_v32 = vmul.f32 0.25, %v4771_v3  ;;  %v6750_v58 = vpop.f32.mrb[103].mxu1  ;;  %v4777_v42 = vsel %vm617_vm9, %v8719_v63, -inf }
0x1b36   :  { %4778 = vmax.xlane.f32.xlu0 %v4777_v42 }
0x1b37   :  { %v4780_v8 = vsel %vm621_vm10, %v8721_v32, -inf }
0x1b38   :  { %4781 = vmax.xlane.f32.xlu1 %v4780_v8 }
0x1b3a   :  { %v4907_v15 = vpop.f32.mrb[104].mxu1 }
0x1b3b   :  { %v8727_v26 = vmul.f32 0.25, %v4907_v15  ;;  %v6761_v59 = vpop.f32.mrb[105].mxu1 }
0x1b3c   :  { %v4910_v18 = vpop.f32.mrb[106].mxu1 }
0x1b3d   :  { %v8729_v10 = vmul.f32 0.25, %v4910_v18  ;;  %v6762_v21 = vpop.f32.mrb[107].mxu1  ;;  %v4916_v11 = vsel %vm617_vm9, %v8727_v26, -inf }
0x1b3e   :  { %4917 = vmax.xlane.f32.xlu0 %v4916_v11 }
0x1b3f   :  { %v4919_v24 = vsel %vm621_vm10, %v8729_v10, -inf }
0x1b40   :  { %4920 = vmax.xlane.f32.xlu1 %v4919_v24 }
0x1b42   :  { %v5032_v44 = vpop.f32.mrb[108].mxu1 }
0x1b43   :  { %v6773_v39 = vpop.f32.mrb[109].mxu1  ;;  %v8747_v48 = vmul.f32 0.25, %v5032_v44 }
0x1b44   :  { %v5035_v17 = vpop.f32.mrb[110].mxu1 }
0x1b45   :  { %v8735_v7 = vmul.f32 0.25, %v5035_v17  ;;  %v6774_v54 = vpop.f32.mrb[111].mxu1  ;;  %v5041_v53 = vsel %vm617_vm9, %v8747_v48, -inf }
0x1b47   :  { %v5044_v47 = vsel %vm621_vm10, %v8735_v7, -inf }
0x1b48   :  { %5045 = vmax.xlane.f32.xlu1 %v5044_v47 }
0x1b4a   :  { %v5157_v16 = vpop.f32.mrb[112].mxu1 }
0x1b4b   :  { %v6785_v6 = vpop.f32.mrb[113].mxu1  ;;  %v8749_v28 = vmul.f32 0.25, %v5157_v16 }
0x1b4c   :  { %v5160_v45 = vpop.f32.mrb[114].mxu1 }
0x1b4d   :  { %v8739_v50 = vmul.f32 0.25, %v5160_v45  ;;  %v6786_v25 = vpop.f32.mrb[115].mxu1  ;;  %v5166_v22 = vsel %vm617_vm9, %v8749_v28, -inf }
0x1b4f   :  { %v5169_v46 = vsel %vm621_vm10, %v8739_v50, -inf }
0x1b50   :  { %5170 = vmax.xlane.f32.xlu1 %v5169_v46 }
0x1b54   :  { %4381 = vrot.lane.b32.xlu0 %v8628_v9, %s7337_s27 }
0x1b61   :  { %4506 = vrot.lane.b32.xlu1 %v8628_v9, %s7339_s28 }
0x1b73   :  { %5042 = vmax.xlane.f32.xlu0 %v5041_v53 }
0x1b77   :  { %5167 = vmax.xlane.f32.xlu0 %v5166_v22 }
0x1bab   :  { %v4236_v29 = vpop.xlane.xlu0 %4235 }
0x1bac   :  { %v4240_v4 = vsub.f32 %v8687_v43, %v4236_v29 }
0x1bad   :  { %v4239_v33 = vpop.xlane.xlu1 %4238 }
0x1bae   :  { %v4242_v38 = vmul.f32 1.442695, %v4240_v4  ;;  %v4241_v41 = vsub.f32 %v8691_v55, %v4239_v33 }
0x1baf   :  { %v4359_v30 = vpop.xlane.xlu0 %4358 }
0x1bb0   :  { %7244 = vpow2.f32 %v4242_v38  ;;  %v4244_v23 = vmul.f32 1.442695, %v4241_v41  ;;  %v4363_v36 = vsub.f32 %v8689_v35, %v4359_v30 }
0x1bb2   :  { %7246 = vpow2.f32 %v4244_v23  ;;  %v4365_v62 = vmul.f32 1.442695, %v4363_v36 }
0x1bb3   :  { %v4362_v2 = vpop.xlane.xlu0 %4361 }
0x1bb4   :  { %7248 = vpow2.f32 %v4365_v62  ;;  %v4364_v13 = vsub.f32 %v8697_v40, %v4362_v2 }
0x1bb5   :  { %v4488_v5 = vpop.xlane.xlu1 %4487 }
0x1bb6   :  { %v4367_v57 = vmul.f32 1.442695, %v4364_v13  ;;  %v4490_v3 = vsub.f32 %v8703_v14, %v4488_v5 }
0x1bb7   :  { %v4485_v43 = vpop.xlane.xlu0 %4484 }
0x1bb8   :  { %7250 = vpow2.f32 %v4367_v57  ;;  %v4493_v58 = vmul.f32 1.442695, %v4490_v3  ;;  %v4489_v55 = vsub.f32 %v8701_v49, %v4485_v43 }
0x1bba   :  { %v8761_v42 = vpop.eup %7244  ;;  %7252 = vpow2.f32 %v4493_v58  ;;  %v4491_v8 = vmul.f32 1.442695, %v4489_v55 }
0x1bbb   :  { %v4610_v35 = vpop.xlane.xlu0 %4609  ;;  %v4246_v15 = vsel %vm617_vm9, %v8761_v42, 0.0 }
0x1bbc   :  { %v8765_v59 = vpop.eup %7246  ;;  %7254 = vpow2.f32 %v4491_v8  ;;  %v4614_v40 = vsub.f32 %v8711_v20, %v4610_v35  ;;  %4247 = vadd.xlane.f32.xlu0 %v4246_v15 }
0x1bbd   :  { %v4613_v14 = vpop.xlane.xlu1 %4612  ;;  %v4249_v18 = vsel %vm621_vm10, %v8765_v59, 0.0 }
0x1bbe   :  { %v8770_v21 = vpop.eup %7248  ;;  %v4616_v49 = vmul.f32 1.442695, %v4614_v40  ;;  %v4615_v11 = vsub.f32 %v8713_v31, %v4613_v14  ;;  %4250 = vadd.xlane.f32.xlu1 %v4249_v18 }
0x1bbf   :  { %v4369_v24 = vsel %vm617_vm9, %v8770_v21, 0.0 }
0x1bc0   :  { %7256 = vpow2.f32 %v4616_v49  ;;  %v4618_v44 = vmul.f32 1.442695, %v4615_v11  ;;  %4370 = vadd.xlane.f32.xlu0 %v4369_v24  ;;  %v4181_v49 = vpack.c.bf16 %v8632_v12, %v8632_v12 }
0x1bc2   :  { %v8775_v39 = vpop.eup %7250  ;;  %7258 = vpow2.f32 %v4618_v44  ;;  %v4808_v24 = vshrl.u32 %v4181_v49, 16  ;;  %v4811_v44 = vshll.u32 %v4181_v49, 16 }
0x1bc3   :  { %v4779_v20 = vpop.xlane.xlu0 %4778  ;;  %v4372_v17 = vsel %vm621_vm10, %v8775_v39, 0.0 }
0x1bc4   :  { %v8779_v54 = vpop.eup %7252  ;;  %v4783_v47 = vsub.f32 %v8719_v63, %v4779_v20  ;;  %4373 = vadd.xlane.f32.xlu1 %v4372_v17  ;;  %v4803_v17 = vshll.u32 %v8628_v9, 16 }
0x1bc5   :  { %v4782_v31 = vpop.xlane.xlu1 %4781  ;;  %v4498_v46 = vsel %vm621_vm10, %v8779_v54, 0.0 }
0x1bc6   :  { %v8782_v16 = vpop.eup %7254  ;;  %v4785_v6 = vmul.f32 1.442695, %v4783_v47  ;;  %v4784_v45 = vsub.f32 %v8721_v32, %v4782_v31  ;;  %v4810_v47 = vrot.slane %v4808_v24, 4  ;;  %v4813_v31 = vrot.slane %v4811_v44, 5 }
0x1bc7   :  { %v4495_v25 = vsel %vm617_vm9, %v8782_v16, 0.0 }
0x1bc8   :  { %7260 = vpow2.f32 %v4785_v6  ;;  %v4787_v53 = vmul.f32 1.442695, %v4784_v45  ;;  %4496 = vadd.xlane.f32.xlu0 %v4495_v25  ;;  %4499 = vadd.xlane.f32.xlu1 %v4498_v46  ;;  %v4805_v45 = vrot.slane %v4803_v17, 5  ;;  %v4814_v25 = vor.u32 %v4813_v31, %v4810_v47 }
0x1bca   :  { %v8789_v22 = vpop.eup %7256  ;;  %7262 = vpow2.f32 %v4787_v53 }
0x1bcb   :  { %v4620_v63 = vsel %vm617_vm9, %v8789_v22, 0.0  ;;  %v4918_v2 = vpop.xlane.xlu0 %4917 }
0x1bcc   :  { %v8793_v29 = vpop.eup %7258  ;;  %4621 = vadd.xlane.f32.xlu0 %v4620_v63  ;;  %v4922_v13 = vsub.f32 %v8727_v26, %v4918_v2 }
0x1bcd   :  { %v4921_v32 = vpop.xlane.xlu1 %4920  ;;  %v4623_v4 = vsel %vm621_vm10, %v8793_v29, 0.0 }
0x1bce   :  { %v4923_v33 = vsub.f32 %v8729_v10, %v4921_v32  ;;  %4624 = vadd.xlane.f32.xlu1 %v4623_v4  ;;  %v4924_v5 = vmul.f32 1.442695, %v4922_v13 }
0x1bcf   :  { %v8813_v57 = vpop.permute.xlu0 %4381 }
0x1bd0   :  { %v4926_v38 = vmul.f32 1.442695, %v4923_v33 }
0x1bd2   :  { %v8798_v41 = vpop.eup %7260  ;;  %7264 = vpow2.f32 %v4926_v38 }
0x1bd3   :  { %v4789_v30 = vsel %vm617_vm9, %v8798_v41, 0.0  ;;  %7266 = vpow2.f32 %v4924_v5 }
0x1bd4   :  { %v8802_v23 = vpop.eup %7262  ;;  %4790 = vadd.xlane.f32.xlu1 %v4789_v30 }
0x1bd5   :  { %v4792_v36 = vsel %vm621_vm10, %v8802_v23, 0.0  ;;  %v5046_v3 = vpop.xlane.xlu1 %5045 }
0x1bd6   :  { %v5048_v58 = vsub.f32 %v8735_v7, %v5046_v3 }
0x1bd8   :  { %4793 = vadd.xlane.f32.xlu1 %v4792_v36  ;;  %v5051_v15 = vmul.f32 1.442695, %v5048_v58 }
0x1bdc   :  { %v8806_v62 = vpop.eup %7264 }
0x1bdd   :  { %v4931_v10 = vsel %vm621_vm10, %v8806_v62, 0.0  ;;  %v8815_v43 = vpop.eup %7266  ;;  %v5171_v14 = vpop.xlane.xlu1 %5170 }
0x1bde   :  { %4932 = vadd.xlane.f32.xlu1 %v4931_v10  ;;  %v4928_v8 = vsel %vm617_vm9, %v8815_v43, 0.0  ;;  %v5173_v7 = vsub.f32 %v8739_v50, %v5171_v14 }
0x1be0   :  { %v5176_v20 = vmul.f32 1.442695, %v5173_v7 }
0x1be1   :  { %v4507_v38 = vpop.permute.xlu1 %4506 }
0x1be2   :  { %4631 = vrot.lane.b32.xlu0 %v8628_v9, %s9130_s9  ;;  %v4512_v24 = vand.u32 %v4507_v38, %v7637_v37 }
0x1c00   :  { %v5043_v55 = vpop.xlane.xlu0 %5042 }
0x1c01   :  { %v5047_v35 = vsub.f32 %v8747_v48, %v5043_v55  ;;  %4929 = vadd.xlane.f32.xlu0 %v4928_v8  ;;  %v4800_v48 = vshrl.u32 %v8628_v9, 16 }
0x1c03   :  { %v5049_v40 = vmul.f32 1.442695, %v5047_v35 }
0x1c04   :  { %v5168_v26 = vpop.xlane.xlu0 %5167 }
0x1c05   :  { %7268 = vpow2.f32 %v5049_v40  ;;  %v5172_v18 = vsub.f32 %v8749_v28, %v5168_v26  ;;  %v4802_v28 = vrot.slane %v4800_v48, 4 }
0x1c06   :  { %7270 = vpow2.f32 %v5051_v15  ;;  %v4387_v15 = vand.u32 %v8813_v57, %v7637_v37 }
0x1c07   :  { %v5174_v11 = vmul.f32 1.442695, %v5172_v18  ;;  %v4806_v53 = vor.u32 %v4805_v45, %v4802_v28 }
0x1c09   :  { %7272 = vpow2.f32 %v5174_v11  ;;  %v8838_v9 = vsel %vm1101_vm7, %v4806_v53, %v4814_v25 }
0x1c0a   :  { %7274 = vpow2.f32 %v5176_v20  ;;  %v4820_v45 = vand.u32 %v8838_v9, %v7637_v37 }
0x1c0f   :  { %v8827_v6 = vpop.eup %7268 }
0x1c10   :  { %v5053_v12 = vsel %vm617_vm9, %v8827_v6, 0.0  ;;  %v8831_v50 = vpop.eup %7270 }
0x1c11   :  { %5054 = vadd.xlane.f32.xlu1 %v5053_v12  ;;  %v5056_v46 = vsel %vm621_vm10, %v8831_v50, 0.0 }
0x1c13   :  { %v8835_v63 = vpop.eup %7272 }
0x1c14   :  { %v5178_v32 = vsel %vm617_vm9, %v8835_v63, 0.0  ;;  %v8844_v4 = vpop.eup %7274 }
0x1c15   :  { %5057 = vadd.xlane.f32.xlu1 %v5056_v46  ;;  %v5181_v33 = vsel %vm621_vm10, %v8844_v4, 0.0 }
0x1c17   :  { %4939 = vrot.lane.b32.xlu0 %v8838_v9, %s7337_s27 }
0x1c19   :  { %5179 = vadd.xlane.f32.xlu1 %v5178_v32 }
0x1c1b   :  { %5189 = vrot.lane.b32.xlu0 %v8838_v9, %s9130_s9 }
0x1c1d   :  { %5182 = vadd.xlane.f32.xlu1 %v5181_v33 }
0x1c2e   :  { %5064 = vrot.lane.b32.xlu1 %v8838_v9, %s7339_s28 }
0x1c49   :  { %v4248_v30 = vpop.xlane.xlu0 %4247 }
0x1c4a   :  { %7276 = vrcp.f32 %v4248_v30 }
0x1c4b   :  { %v4251_v36 = vpop.xlane.xlu1 %4250 }
0x1c4c   :  { %7278 = vrcp.f32 %v4251_v36 }
0x1c4d   :  { %v4371_v10 = vpop.xlane.xlu0 %4370 }
0x1c4e   :  { %7280 = vrcp.f32 %v4371_v10 }
0x1c51   :  { %v4374_v2 = vpop.xlane.xlu1 %4373 }
0x1c52   :  { %7282 = vrcp.f32 %v4374_v2 }
0x1c54   :  { %v7277_v13 = vpop.eup %7276 }
0x1c55   :  { %v4497_v5 = vpop.xlane.xlu0 %4496  ;;  %v4500_v3 = vpop.xlane.xlu1 %4499  ;;  %v4254_v55 = vmul.f32 %v7277_v13, %v8761_v42 }
0x1c56   :  { %v7279_v58 = vpop.eup %7278  ;;  %7284 = vrcp.f32 %v4497_v5 }
0x1c57   :  { %v4255_v8 = vmul.f32 %v7279_v58, %v8765_v59  ;;  %7286 = vrcp.f32 %v4500_v3 }
0x1c58   :  { %v7281_v40 = vpop.eup %7280 }
0x1c59   :  { %v4256_v35 = vpack.c.bf16 %v4255_v8, %v4254_v55  ;;  %v4377_v42 = vmul.f32 %v7281_v40, %v8770_v21  ;;  %v4622_v59 = vpop.xlane.xlu0 %4621 }
0x1c5b   :  { %6706 = vmatmul.mubr.msk.bf16.vlgmr.msra.gmra.mrb[116].mxu0 %vm617_vm9, %v4256_v35  ;;  %v4625_v18 = vpop.xlane.xlu1 %4624 }
0x1c5c   :  { %v7283_v14 = vpop.eup %7282  ;;  %6716 = vmatpush3.bf16.msra.mxu0 %v4387_v15  ;;  %6717 = vmatprep.mubr.msk.bf16.mxu0 %vm7333_vm0, %v7332_v1  ;;  %7288 = vrcp.f32 %v4625_v18 }
0x1c5d   :  { %v4378_v26 = vmul.f32 %v7283_v14, %v8775_v39  ;;  %6727 = vmatprep.subr.bf16.mxu0 %v7332_v1  ;;  %7290 = vrcp.f32 %v4622_v59  ;;  %v4632_v20 = vpop.permute.xlu0 %4631 }
0x1c5e   :  { %v4637_v47 = vand.u32 %v4632_v20, %v7637_v37 }
0x1c5f   :  { %v4379_v57 = vpack.c.bf16 %v4378_v26, %v4377_v42 }
0x1c60   :  { %v7285_v49 = vpop.eup %7284 }
0x1c61   :  { %v4791_v7 = vpop.xlane.xlu1 %4790  ;;  %v7287_v11 = vpop.eup %7286  ;;  %v4503_v39 = vmul.f32 %v7285_v49, %v8782_v16 }
0x1c62   :  { %v4504_v44 = vmul.f32 %v7287_v11, %v8779_v54 }
0x1c63   :  { %6718 = vmatmul.mubr.msk.bf16.vlgmr.msra.gmra.mrb[120].mxu0 %vm617_vm9, %v4379_v57 }
0x1c64   :  { %6728 = vmatpush3.bf16.msra.mxu0 %v4512_v24  ;;  %6729 = vmatprep.mubr.msk.bf16.mxu0 %vm7333_vm0, %v7332_v1  ;;  %v4505_v48 = vpack.c.bf16 %v4504_v44, %v4503_v39 }
0x1c65   :  { %v4794_v21 = vpop.xlane.xlu1 %4793  ;;  %6739 = vmatprep.subr.bf16.mxu0 %v7332_v1 }
0x1c66   :  { %7292 = vrcp.f32 %v4794_v21  ;;  %v7289_v17 = vpop.eup %7288 }
0x1c67   :  { %7294 = vrcp.f32 %v4791_v7  ;;  %v7291_v31 = vpop.eup %7290  ;;  %v4629_v16 = vmul.f32 %v7289_v17, %v8793_v29 }
0x1c68   :  { %v4628_v54 = vmul.f32 %v7291_v31, %v8789_v22 }
0x1c6a   :  { %v4630_v12 = vpack.c.bf16 %v4629_v16, %v4628_v54 }
0x1c6b   :  { %6730 = vmatmul.mubr.msk.bf16.vlgmr.msra.gmra.mrb[124].mxu0 %vm617_vm9, %v4505_v48  ;;  %v4933_v22 = vpop.xlane.xlu1 %4932 }
0x1c6c   :  { %6740 = vmatpush3.bf16.msra.mxu0 %v4637_v47  ;;  %6741 = vmatprep.mubr.msk.bf16.mxu0 %vm7333_vm0, %v7332_v1  ;;  %7296 = vrcp.f32 %v4933_v22  ;;  %v7030_v22 = vld [vmem:[%s9102_s10 + $0x40] sm:$0xff]  }
0x1c6d   :  { %6751 = vmatprep.subr.bf16.mxu0 %v7332_v1  ;;  %6793 = vmatprep.subr.bf16.mxu1 %v7030_v22 }
0x1c6e   :  { %6794 = vmatpush3.bf16.msra.mxu1 %v7030_v22 }
0x1c70   :  { %v7293_v28 = vpop.eup %7292 }
0x1c71   :  { %v7295_v25 = vpop.eup %7294  ;;  %v4798_v46 = vmul.f32 %v7293_v28, %v8802_v23 }
0x1c72   :  { %v4797_v29 = vmul.f32 %v7295_v25, %v8798_v41 }
0x1c73   :  { %6742 = vmatmul.mubr.msk.bf16.vlgmr.msra.gmra.mrb[128].mxu0 %vm617_vm9, %v4630_v12 }
0x1c74   :  { %6752 = vmatpush3.bf16.msra.mxu0 %v4820_v45  ;;  %6753 = vmatprep.mubr.msk.bf16.mxu0 %vm7333_vm0, %v7332_v1  ;;  %v4799_v53 = vpack.c.bf16 %v4798_v46, %v4797_v29 }
0x1c75   :  { %6763 = vmatprep.subr.bf16.mxu0 %v7332_v1 }
0x1c76   :  { %v7297_v23 = vpop.eup %7296 }
0x1c77   :  { %v4937_v41 = vmul.f32 %v7297_v23, %v8806_v62 }
0x1c7b   :  { %6754 = vmatmul.mubr.msk.bf16.vlgmr.msra.gmra.mrb[132].mxu0 %vm617_vm9, %v4799_v53 }
0x1c7c   :  { %6765 = vmatprep.mubr.msk.bf16.mxu0 %vm7333_vm0, %v7332_v1 }
0x1c8e   :  { %v4930_v9 = vpop.xlane.xlu0 %4929 }
0x1c8f   :  { %7298 = vrcp.f32 %v4930_v9  ;;  %v7031_v9 = vld [vmem:[%s9102_s10 + $0x48] sm:$0xff]  }
0x1c90   :  { %6795 = vmatprep.subr.bf16.mxu1 %v7031_v9 }
0x1c91   :  { %6796 = vmatpush3.bf16.msra.mxu1 %v7031_v9 }
0x1c92   :  { %v4940_v32 = vpop.permute.xlu0 %4939 }
0x1c93   :  { %v4945_v33 = vand.u32 %v4940_v32, %v7637_v37 }
0x1c95   :  { %6764 = vmatpush3.bf16.msra.mxu0 %v4945_v33 }
0x1c96   :  { %6775 = vmatprep.subr.bf16.mxu0 %v7332_v1  ;;  %v5190_v8 = vpop.permute.xlu0 %5189 }
0x1c97   :  { %v5195_v40 = vand.u32 %v5190_v8, %v7637_v37 }
0x1c99   :  { %v7299_v38 = vpop.eup %7298 }
0x1c9a   :  { %v4936_v30 = vmul.f32 %v7299_v38, %v8815_v43  ;;  %v7032_v38 = vld [vmem:[%s9102_s10 + $0x50] sm:$0xff]  }
0x1c9b   :  { %6797 = vmatprep.subr.bf16.mxu1 %v7032_v38 }
0x1c9c   :  { %v4938_v36 = vpack.c.bf16 %v4937_v41, %v4936_v30  ;;  %6798 = vmatpush3.bf16.msra.mxu1 %v7032_v38 }
0x1c9e   :  { %6766 = vmatmul.mubr.msk.bf16.vlgmr.msra.gmra.mrb[136].mxu0 %vm617_vm9, %v4938_v36  ;;  %v5055_v10 = vpop.xlane.xlu1 %5054  ;;  %v7033_v36 = vld [vmem:[%s9102_s10 + $0x58] sm:$0xff]  }
0x1c9f   :  { %6777 = vmatprep.mubr.msk.bf16.mxu0 %vm7333_vm0, %v7332_v1  ;;  %7300 = vrcp.f32 %v5055_v10  ;;  %6799 = vmatprep.subr.bf16.mxu1 %v7033_v36 }
0x1ca0   :  { %6800 = vmatpush3.bf16.msra.mxu1 %v7033_v36 }
0x1ca2   :  { %v5058_v2 = vpop.xlane.xlu1 %5057 }
0x1ca3   :  { %7302 = vrcp.f32 %v5058_v2 }
0x1ca6   :  { %v5180_v13 = vpop.xlane.xlu1 %5179 }
0x1ca7   :  { %7304 = vrcp.f32 %v5180_v13 }
0x1ca9   :  { %v7301_v3 = vpop.eup %7300 }
0x1caa   :  { %v5183_v5 = vpop.xlane.xlu1 %5182  ;;  %v5061_v35 = vmul.f32 %v7301_v3, %v8827_v6 }
0x1cab   :  { %7306 = vrcp.f32 %v5183_v5 }
0x1cad   :  { %v7303_v58 = vpop.eup %7302 }
0x1cae   :  { %v5062_v62 = vmul.f32 %v7303_v58, %v8831_v50  ;;  %v5065_v55 = vpop.permute.xlu1 %5064 }
0x1caf   :  { %v5070_v43 = vand.u32 %v5065_v55, %v7637_v37 }
0x1cb0   :  { %v5063_v15 = vpack.c.bf16 %v5062_v62, %v5061_v35 }
0x1cb1   :  { %6776 = vmatpush3.bf16.msra.mxu0 %v5070_v43  ;;  %v7305_v14 = vpop.eup %7304 }
0x1cb2   :  { %6787 = vmatprep.subr.bf16.mxu0 %v7332_v1  ;;  %v5186_v18 = vmul.f32 %v7305_v14, %v8835_v63 }
0x1cb4   :  { %6778 = vmatmul.mubr.msk.bf16.vlgmr.msra.gmra.mrb[140].mxu0 %vm617_vm9, %v5063_v15 }
0x1cb5   :  { %v7307_v26 = vpop.eup %7306  ;;  %6788 = vmatpush3.bf16.msra.mxu0 %v5195_v40  ;;  %6789 = vmatprep.mubr.msk.bf16.mxu0 %vm7333_vm0, %v7332_v1 }
0x1cb6   :  { %v5187_v50 = vmul.f32 %v7307_v26, %v8844_v4 }
0x1cb8   :  { %v5188_v42 = vpack.c.bf16 %v5187_v50, %v5186_v18 }
0x1cbc   :  { %6790 = vmatmul.mubr.msk.bf16.vlgmr.msra.gmra.mrb[144].mxu0 %vm617_vm9, %v5188_v42 }
0x1cbd   :  { %5539 = vmatprep.mubr.bf16.mxu0 %v7334_v27 }
0x1d2e   :  { %v8906_v6 = vpop.f32.mrb[116].mxu0 }
0x1d2f   :  { %v6707_v37 = vpop.f32.mrb[117].mxu0 }
0x1d30   :  { %v8908_v59 = vpop.f32.mrb[118].mxu0 }
0x1d31   :  { %v6708_v49 = vpop.f32.mrb[119].mxu0 }
0x1d36   :  { %v4423_v7 = vpop.f32.mrb[120].mxu0 }
0x1d37   :  { %v6719_v57 = vpop.f32.mrb[121].mxu0 }
0x1d38   :  { %v4426_v11 = vpop.f32.mrb[122].mxu0 }
0x1d39   :  { %v6876_v24 = vpack.i.bf16 %v4423_v7, %v4426_v11  ;;  %v6720_v1 = vpop.f32.mrb[123].mxu0 }
0x1d3b   :  { %6877 = vrot.lane.b32.xlu0 %v6876_v24, %s9129_s23 }
0x1d3e   :  { %v4548_v4 = vpop.f32.mrb[124].mxu0 }
0x1d3f   :  { %v6731_v63 = vpop.f32.mrb[125].mxu0 }
0x1d40   :  { %v4551_v39 = vpop.f32.mrb[126].mxu0 }
0x1d41   :  { %v6891_v44 = vpack.i.bf16 %v4548_v4, %v4551_v39  ;;  %v6732_v21 = vpop.f32.mrb[127].mxu0 }
0x1d46   :  { %v4673_v20 = vpop.f32.mrb[128].mxu0 }
0x1d47   :  { %v6743_v48 = vpop.f32.mrb[129].mxu0 }
0x1d48   :  { %v4676_v17 = vpop.f32.mrb[130].mxu0 }
0x1d49   :  { %v6901_v47 = vpack.i.bf16 %v4673_v20, %v4676_v17  ;;  %v6744_v31 = vpop.f32.mrb[131].mxu0 }
0x1d4e   :  { %v4856_v16 = vpop.f32.mrb[132].mxu0 }
0x1d4f   :  { %v6755_v54 = vpop.f32.mrb[133].mxu0 }
0x1d50   :  { %v4859_v12 = vpop.f32.mrb[134].mxu0 }
0x1d51   :  { %v6756_v28 = vpop.f32.mrb[135].mxu0 }
0x1d71   :  { %v4981_v45 = vpop.f32.mrb[136].mxu0 }
0x1d72   :  { %v6767_v25 = vpop.f32.mrb[137].mxu0 }
0x1d73   :  { %v4984_v46 = vpop.f32.mrb[138].mxu0 }
0x1d74   :  { %v6881_v29 = vpack.i.bf16 %v4984_v46, %v4981_v45  ;;  %v6768_v53 = vpop.f32.mrb[139].mxu0 }
0x1d76   :  { %6882 = vrot.lane.b32.xlu0 %v6881_v29, %s9129_s23 }
0x1d87   :  { %v5106_v32 = vpop.f32.mrb[140].mxu0 }
0x1d88   :  { %v6779_v33 = vpop.f32.mrb[141].mxu0 }
0x1d89   :  { %v5109_v23 = vpop.f32.mrb[142].mxu0 }
0x1d8a   :  { %v6886_v41 = vpack.i.bf16 %v5109_v23, %v5106_v32  ;;  %v6780_v30 = vpop.f32.mrb[143].mxu0 }
0x1d8c   :  { %6887 = vrot.lane.b32.xlu0 %v6886_v41, %s7338_s0 }
0x1d8f   :  { %v5231_v10 = vpop.f32.mrb[144].mxu0 }
0x1d90   :  { %6892 = vrot.lane.b32.xlu0 %v6891_v44, %s7338_s0  ;;  %v6791_v2 = vpop.f32.mrb[145].mxu0 }
0x1d91   :  { %v5234_v13 = vpop.f32.mrb[146].mxu0 }
0x1d92   :  { %v6896_v5 = vpack.i.bf16 %v5234_v13, %v5231_v10  ;;  %v6792_v3 = vpop.f32.mrb[147].mxu0 }
0x1d94   :  { %6897 = vrot.lane.b32.xlu1 %v6896_v5, %s7341_s29 }
0x1d98   :  { %6902 = vrot.lane.b32.xlu1 %v6901_v47, %s7341_s29 }
0x1dad   :  { %v6878_v58 = vpop.permute.xlu0 %6877 }
0x1dae   :  { %v6880_v14 = vunpack.i.h.bf16 %v6878_v58  ;;  %v6879_v26 = vunpack.i.l.bf16 %v6878_v58 }
0x1db0   :  { %v4704_v21 = vsel %vm567_vm8, %v8906_v6, %v6880_v14  ;;  %v4705_v20 = vsel %vm567_vm8, %v8908_v59, %v6879_v26  ;;  %v6150_v6 = vld [vmem:[%s9103_s11 + $0x2] ss:$0 sm:$0xff]  ;;  %v7039_v26 = vld [vmem:[%s9104_s14 + $0x94] ss:$8 sps:$4 sm:$0xff]  }
0x1db1   :  { %v7034_v14 = vld [vmem:[%s9104_s14 + $0x80] ss:$8 sps:$4 sm:$0xff]  }
0x1de8   :  { %v6883_v62 = vpop.permute.xlu0 %6882 }
0x1de9   :  { %v6885_v43 = vunpack.i.h.bf16 %v6883_v62  ;;  %v6884_v8 = vunpack.i.l.bf16 %v6883_v62 }
0x1deb   :  { %v5263_v18 = vsel %vm567_vm8, %v4859_v12, %v6885_v43  ;;  %v5262_v42 = vsel %vm567_vm8, %v4856_v16, %v6884_v8 }
0x1dfe   :  { %v6888_v55 = vpop.permute.xlu0 %6887 }
0x1dff   :  { %v6890_v35 = vunpack.i.h.bf16 %v6888_v55  ;;  %v6889_v15 = vunpack.i.l.bf16 %v6888_v55 }
0x1e01   :  { %v5265_v7 = vsel %vm1095_vm11, %v5263_v18, %v6890_v35  ;;  %v5264_v57 = vsel %vm1095_vm11, %v5262_v42, %v6889_v15  ;;  %v7042_v18 = vld [vmem:[%s9104_s14 + $0xa4] ss:$8 sps:$4 sm:$0xff]   ;;  %v7040_v42 = vld [vmem:[%s9104_s14 + $0xa0] ss:$8 sps:$4 sm:$0xff]  }
0x1e02   :  { %v6893_v40 = vpop.permute.xlu0 %6892 }
0x1e03   :  { %v6895_v11 = vunpack.i.h.bf16 %v6893_v40  ;;  %v6894_v24 = vunpack.i.l.bf16 %v6893_v40  ;;  %v7036_v40 = vld [vmem:[%s9104_s14 + $0x84] ss:$8 sps:$4 sm:$0xff]  }
0x1e04   :  { %5507 = vmatprep.subr.bf16.mxu0 %v7036_v40 }
0x1e05   :  { %v4706_v47 = vsel %vm1095_vm11, %v4704_v21, %v6895_v11  ;;  %v4707_v31 = vsel %vm1095_vm11, %v4705_v20, %v6894_v24  ;;  %5508 = vmatpush1.bf16.msra.mxu0 %v7034_v14 }
0x1e06   :  { %v6898_v50 = vpop.permute.xlu1 %6897  ;;  %5509 = vmatprep.subr.bf16.mxu0 %v7039_v26 }
0x1e07   :  { %v6900_v37 = vunpack.i.h.bf16 %v6898_v50  ;;  %v6899_v49 = vunpack.i.l.bf16 %v6898_v50  ;;  %v7037_v50 = vld [vmem:[%s9104_s14 + $0x90] ss:$8 sps:$4 sm:$0xff]  }
0x1e09   :  { %v5267_v1 = vsel %vm1098_vm12, %v5265_v7, %v6900_v37  ;;  %v5266_v4 = vsel %vm1098_vm12, %v5264_v57, %v6899_v49  ;;  %5510 = vmatpush1.bf16.msra.mxu0 %v7037_v50  ;;  %v7043_v37 = vld [vmem:[%s9104_s14 + $0xb0] ss:$8 sps:$4 sm:$0xff]   ;;  %v7045_v49 = vld [vmem:[%s9104_s14 + $0xb4] ss:$8 sps:$4 sm:$0xff]  }
0x1e0a   :  { %v5271_v63 = vrot.slane %v5267_v1, 7  ;;  %v5270_v39 = vrot.slane %v5266_v4, 7  ;;  %v6903_v44 = vpop.permute.xlu1 %6902  ;;  %5511 = vmatprep.subr.bf16.mxu0 %v7042_v18 }
0x1e0b   :  { %v6905_v48 = vunpack.i.h.bf16 %v6903_v44  ;;  %v6904_v17 = vunpack.i.l.bf16 %v6903_v44 }
0x1e0c   :  { %v5272_v16 = vsel %vm374_vm1, %v5270_v39, %v5271_v63 }
0x1e0d   :  { %v4708_v54 = vsel %vm1098_vm12, %v4706_v47, %v6905_v48  ;;  %v4709_v12 = vsel %vm1098_vm12, %v4707_v31, %v6904_v17  ;;  %v5277_v25 = vpack.c.bf16 %v5272_v16, %v5272_v16  ;;  %5512 = vmatpush1.bf16.msra.mxu0 %v7040_v42  ;;  %v6159_v48 = vld [vmem:[%s9105_s12 + $0x2] ss:$0 sm:$0xff] }
0x1e0e   :  { %v5275_v28 = vsel %vm374_vm1, %v4709_v12, %v5270_v39  ;;  %5513 = vmatprep.subr.bf16.mxu0 %v7045_v49 }
0x1e0f   :  { %v5276_v45 = vpack.c.bf16 %v5275_v28, %v4708_v54  ;;  %v6160_v54 = vld [vmem:[%s9106_s13 + $0x2] ss:$0 sm:$0xff] }
0x1e11   :  { %6801 = vmatprep.mubr.msk.bf16.mxu1 %vm381_vm2, %v5276_v45  ;;  %5514 = vmatpush1.bf16.msra.mxu0 %v7043_v37 }
0x1e12   :  { %6802 = vmatmul.mubr.msk.bf16.vlgmr.msra.gmra.mrb[116].mxu1 %vm381_vm2, %v5277_v25 }
0x1ee5   :  { %v6803_v59 = vpop.f32.mrb[116].mxu1 }
0x1ee6   :  { %v5359_v46 = vpop.f32.mrb[117].mxu1  ;;  %v5368_v29 = vadd.f32 %v6803_v59, %v6150_v6 }
0x1ee7   :  { %v5360_v53 = vadd.f32 %v6150_v6, %v5359_v46  ;;  %v6804_v22 = vpop.f32.mrb[118].mxu1 }
0x1ee8   :  { %v5362_v9 = vpop.f32.mrb[119].mxu1  ;;  %v8953_v23 = vadd.f32 %v5368_v29, %v8577_v34  ;;  %v7047_v22 = vld [vmem:[%s9107_s16 + $0x100] sm:$0xff]  }
0x1ee9   :  { %v8950_v32 = vadd.f32 %v5360_v53, %v8567_v52  ;;  %v5363_v33 = vadd.f32 %v6150_v6, %v5362_v9  ;;  %v7046_v53 = vld [vmem:[%s9107_s16 + $0x140] sm:$0xff]   ;;  %v7048_v9 = vld [vmem:[%s9107_s16 + $0x148] sm:$0xff]  }
0x1eea   :  { %v5386_v36 = vsel %vm388_vm4, %v8953_v23, 0.0  ;;  %6433 = vmatprep.subr.bf16.mxu1 %v7046_v53 }
0x1eeb   :  { %v8956_v38 = vadd.f32 %v5363_v33, %v8570_v19  ;;  %v5380_v41 = vsel %vm381_vm2, %v8950_v32, 0.0  ;;  %6434 = vmatpush3.bf16.msra.mxu1 %v7047_v22  ;;  %v7050_v33 = vld [vmem:[%s9107_s16 + $0x150] sm:$0xff]  }
0x1eec   :  { %5381 = vadd.xlane.f32.xlu0 %v5380_v41  ;;  %6435 = vmatprep.subr.bf16.mxu1 %v7048_v9  ;;  %v7051_v41 = vld [vmem:[%s9107_s16 + $0x110] sm:$0xff]  }
0x1eed   :  { %v5383_v30 = vsel %vm381_vm2, %v8956_v38, 0.0 }
0x1eee   :  { %5384 = vadd.xlane.f32.xlu1 %v5383_v30  ;;  %v7052_v30 = vld [vmem:[%s9107_s16 + $0x158] sm:$0xff]  }
0x1ef0   :  { %5387 = vadd.xlane.f32.xlu0 %v5386_v36  ;;  %v7053_v36 = vld [vmem:[%s9107_s16 + $0x118] sm:$0xff]  }
0x1f79   :  { %v5382_v52 = vpop.xlane.xlu0 %5381 }
0x1f7a   :  { %v5389_v10 = vmul.f32 0.015625, %v5382_v52  ;;  %v7054_v52 = vld [vmem:[%s9107_s16 + $0x160] sm:$0xff]  }
0x1f7b   :  { %v5385_v2 = vpop.xlane.xlu1 %5384 }
0x1f7c   :  { %v5392_v34 = vsub.f32 %v8950_v32, %v5389_v10  ;;  %v5390_v13 = vmul.f32 0.015625, %v5385_v2  ;;  %v7055_v10 = vld [vmem:[%s9107_s16 + $0x120] sm:$0xff]   ;;  %v7056_v2 = vld [vmem:[%s9107_s16 + $0x168] sm:$0xff]  }
0x1f7d   :  { %v5388_v19 = vpop.xlane.xlu0 %5387 }
0x1f7e   :  { %v5393_v5 = vsub.f32 %v8956_v38, %v5390_v13  ;;  %v5391_v3 = vmul.f32 0.015625, %v5388_v19  ;;  %v5395_v58 = vmul.f32 %v5392_v34, %v5392_v34  ;;  %v7058_v13 = vld [vmem:[%s9107_s16 + $0x170] sm:$0xff]  }
0x1f7f   :  { %v7059_v19 = vld [vmem:[%s9107_s16 + $0x130] sm:$0xff]  }
0x1f80   :  { %v5394_v62 = vsub.f32 %v8953_v23, %v5391_v3  ;;  %v5398_v55 = vsel %vm381_vm2, %v5395_v58, 0.0  ;;  %v5396_v43 = vmul.f32 %v5393_v5, %v5393_v5  ;;  %v7061_v3 = vld [vmem:[%s9107_s16 + $0x138] sm:$0xff]   ;;  %v6169_v58 = vld [vmem:[%s9108_s15 + $0x4] sm:$0x3] }
0x1f81   :  { %5399 = vadd.xlane.f32.xlu0 %v5398_v55  ;;  %v5458_v55 = vrot.slane %v6169_v58, %v7631_v56 }
0x1f82   :  { %v5397_v8 = vmul.f32 %v5394_v62, %v5394_v62  ;;  %v5401_v35 = vsel %vm381_vm2, %v5396_v43, 0.0 }
0x1f84   :  { %v5404_v15 = vsel %vm388_vm4, %v5397_v8, 0.0 }
0x1f85   :  { %5402 = vadd.xlane.f32.xlu0 %v5401_v35  ;;  %5405 = vadd.xlane.f32.xlu1 %v5404_v15 }
0x200e   :  { %v5400_v7 = vpop.xlane.xlu0 %5399 }
0x200f   :  { %v5407_v57 = vmul.f32 0.015625, %v5400_v7 }
0x2011   :  { %v5410_v11 = vadd.f32 1e-06, %v5407_v57 }
0x2012   :  { %v5406_v24 = vpop.xlane.xlu1 %5405  ;;  %v5403_v1 = vpop.xlane.xlu0 %5402 }
0x2013   :  { %7308 = vrsqrt.f32 %v5410_v11  ;;  %v5409_v4 = vmul.f32 0.015625, %v5406_v24  ;;  %v5408_v63 = vmul.f32 0.015625, %v5403_v1 }
0x2015   :  { %v5412_v39 = vadd.f32 1e-06, %v5409_v4  ;;  %v5411_v44 = vadd.f32 1e-06, %v5408_v63 }
0x2017   :  { %7310 = vrsqrt.f32 %v5412_v39 }
0x2018   :  { %7312 = vrsqrt.f32 %v5411_v44 }
0x201d   :  { %v7309_v21 = vpop.eup %7308 }
0x201e   :  { %v5416_v20 = vmul.f32 %v7309_v21, %v5392_v34  ;;  %v7057_v34 = vld [vmem:[%s9107_s16 + $0x128] sm:$0xff]  }
0x2020   :  { %v5425_v31 = vmul.f32 %v6159_v48, %v5416_v20 }
0x2021   :  { %v7311_v17 = vpop.eup %7310 }
0x2022   :  { %v7313_v47 = vpop.eup %7312  ;;  %v5418_v28 = vmul.f32 %v7311_v17, %v5394_v62  ;;  %v5434_v45 = vadd.f32 %v6160_v54, %v5425_v31  ;;  %v5454_v62 = vrot.slane %v6169_v58, %v7563_v51 }
0x2023   :  { %v5417_v16 = vmul.f32 %v7313_v47, %v5393_v5  ;;  %v7060_v5 = vld [vmem:[%s9107_s16 + $0x178] sm:$0xff]  }
0x2024   :  { %v5427_v59 = vmul.f32 %v6159_v48, %v5418_v28 }
0x2025   :  { %v5426_v12 = vmul.f32 %v6159_v48, %v5417_v16 }
0x2026   :  { %v5436_v46 = vadd.f32 %v6160_v54, %v5427_v59 }
0x2027   :  { %v5435_v25 = vadd.f32 %v6160_v54, %v5426_v12 }
0x2028   :  { %v5438_v29 = vpack.c.bf16 %v5436_v46, %v5436_v46 }
0x2029   :  { %v5437_v6 = vpack.c.bf16 %v5435_v25, %v5434_v45 }
0x202b   :  { %6178 = vmatmul.mubr.msk.bf16.vlgmr.msra.gmra.mrb[148].mxu0 %vm381_vm2, %v5437_v6 }
0x202c   :  { %5549 = vmatprep.mubr.bf16.mxu0 %v7334_v27  ;;  %v7049_v27 = vld [vmem:[%s9107_s16 + $0x108] sm:$0xff]  }
0x202d   :  { %6436 = vmatpush3.bf16.msra.mxu1 %v7049_v27 }
0x202e   :  { %6437 = vmatprep.subr.bf16.mxu1 %v7050_v33 }
0x2031   :  { %6438 = vmatpush3.bf16.msra.mxu1 %v7051_v41 }
0x2032   :  { %6439 = vmatprep.subr.bf16.mxu1 %v7052_v30 }
0x2033   :  { %6179 = vmatmul.mubr.msk.bf16.gmra.mrb[152].mxu0 %vm381_vm2, %v5438_v29 }
0x2035   :  { %6440 = vmatpush3.bf16.msra.mxu1 %v7053_v36 }
0x2036   :  { %6441 = vmatprep.subr.bf16.mxu1 %v7054_v52 }
0x2039   :  { %6442 = vmatpush3.bf16.msra.mxu1 %v7055_v10 }
0x203a   :  { %6443 = vmatprep.subr.bf16.mxu1 %v7056_v2 }
0x203d   :  { %6444 = vmatpush3.bf16.msra.mxu1 %v7057_v34 }
0x203e   :  { %6445 = vmatprep.subr.bf16.mxu1 %v7058_v13 }
0x2041   :  { %6446 = vmatpush3.bf16.msra.mxu1 %v7059_v19 }
0x2042   :  { %6447 = vmatprep.subr.bf16.mxu1 %v7060_v5 }
0x2045   :  { %6448 = vmatpush3.bf16.msra.mxu1 %v7061_v3 }
0x20fe   :  { %v5541_v43 = vpop.f32.mrb[148].mxu0 }
0x20ff   :  { %v5542_v8 = vadd.f32 %v5541_v43, %v5454_v62  ;;  %v5543_v35 = vpop.f32.mrb[149].mxu0 }
0x2100   :  { %v5544_v15 = vadd.f32 %v5543_v35, %v5458_v55  ;;  %v5545_v40 = vpop.f32.mrb[150].mxu0 }
0x2101   :  { %v5564_v14 = vmul.f32 0.044715, %v5542_v8  ;;  %v5546_v26 = vadd.f32 %v5545_v40, %v5454_v62  ;;  %v5547_v50 = vpop.f32.mrb[151].mxu0  ;;  %v5558_v34 = vmul.f32 0.5, %v5542_v8 }
0x2102   :  { %v5565_v18 = vmul.f32 0.044715, %v5544_v15  ;;  %v5548_v42 = vadd.f32 %v5547_v50, %v5458_v55  ;;  %v5559_v5 = vmul.f32 0.5, %v5544_v15 }
0x2103   :  { %v5570_v37 = vmul.f32 %v5564_v14, %v5542_v8  ;;  %v5566_v49 = vmul.f32 0.044715, %v5546_v26  ;;  %v5560_v13 = vmul.f32 0.5, %v5546_v26 }
0x2104   :  { %v5571_v7 = vmul.f32 %v5565_v18, %v5544_v15  ;;  %v5567_v57 = vmul.f32 0.044715, %v5548_v42  ;;  %v5561_v3 = vmul.f32 0.5, %v5548_v42 }
0x2105   :  { %v5576_v11 = vmul.f32 %v5570_v37, %v5542_v8  ;;  %v5572_v24 = vmul.f32 %v5566_v49, %v5546_v26 }
0x2106   :  { %v5577_v1 = vmul.f32 %v5571_v7, %v5544_v15  ;;  %v5573_v51 = vmul.f32 %v5567_v57, %v5548_v42  ;;  %v5551_v4 = vpop.f32.mrb[152].mxu0 }
0x2107   :  { %v5582_v56 = vadd.f32 %v5576_v11, %v5542_v8  ;;  %v5578_v63 = vmul.f32 %v5572_v24, %v5546_v26  ;;  %v5552_v39 = vadd.f32 %v5551_v4, %v5454_v62  ;;  %v5553_v44 = vpop.f32.mrb[153].mxu0  ;;  %v6213_v24 = vld [vmem:[%s9109_s17 + $0x2] ss:$0 sm:$0xff] }
0x2108   :  { %v5579_v21 = vmul.f32 %v5573_v51, %v5548_v42  ;;  %v5554_v20 = vadd.f32 %v5553_v44, %v5458_v55  ;;  %v5555_v48 = vpop.f32.mrb[154].mxu0  ;;  %v5583_v17 = vadd.f32 %v5577_v1, %v5544_v15 }
0x2109   :  { %v5588_v47 = vmul.f32 0.7978846, %v5582_v56  ;;  %v5584_v31 = vadd.f32 %v5578_v63, %v5546_v26  ;;  %v5568_v16 = vmul.f32 0.044715, %v5552_v39  ;;  %v5556_v54 = vpop.f32.mrb[155].mxu0  ;;  %v5562_v57 = vmul.f32 0.5, %v5552_v39 }
0x210a   :  { %v5569_v12 = vmul.f32 0.044715, %v5554_v20  ;;  %v5585_v28 = vadd.f32 %v5579_v21, %v5548_v42  ;;  %v5589_v45 = vmul.f32 0.7978846, %v5583_v17  ;;  %v5563_v49 = vmul.f32 0.5, %v5554_v20 }
0x210b   :  { %7314 = vtanh.f32 %v5588_v47  ;;  %v5590_v25 = vmul.f32 0.7978846, %v5584_v31  ;;  %v5574_v6 = vmul.f32 %v5568_v16, %v5552_v39 }
0x210c   :  { %v5575_v59 = vmul.f32 %v5569_v12, %v5554_v20  ;;  %v5591_v46 = vmul.f32 0.7978846, %v5585_v28  ;;  %7316 = vtanh.f32 %v5589_v45 }
0x210d   :  { %7318 = vtanh.f32 %v5590_v25  ;;  %v5580_v29 = vmul.f32 %v5574_v6, %v5552_v39 }
0x210e   :  { %7320 = vtanh.f32 %v5591_v46  ;;  %v5581_v53 = vmul.f32 %v5575_v59, %v5554_v20 }
0x210f   :  { %v5586_v22 = vadd.f32 %v5580_v29, %v5552_v39 }
0x2110   :  { %v5587_v9 = vadd.f32 %v5581_v53, %v5554_v20 }
0x2111   :  { %v5592_v27 = vmul.f32 0.7978846, %v5586_v22 }
0x2112   :  { %v5593_v33 = vmul.f32 0.7978846, %v5587_v9 }
0x2113   :  { %7322 = vtanh.f32 %v5592_v27 }
0x2114   :  { %7324 = vtanh.f32 %v5593_v33 }
0x2115   :  { %v7315_v41 = vpop.eup %7314 }
0x2116   :  { %v7317_v30 = vpop.eup %7316  ;;  %v5600_v36 = vadd.f32 1.0, %v7315_v41 }
0x2117   :  { %v7319_v52 = vpop.eup %7318  ;;  %v5601_v10 = vadd.f32 1.0, %v7317_v30 }
0x2118   :  { %v7321_v2 = vpop.eup %7320  ;;  %v5602_v19 = vadd.f32 1.0, %v7319_v52  ;;  %v5606_v62 = vmul.f32 %v5600_v36, %v5558_v34 }
0x2119   :  { %v5603_v58 = vadd.f32 1.0, %v7321_v2  ;;  %v5607_v43 = vmul.f32 %v5601_v10, %v5559_v5 }
0x211a   :  { %v5608_v55 = vmul.f32 %v5602_v19, %v5560_v13 }
0x211b   :  { %v5609_v35 = vmul.f32 %v5603_v58, %v5561_v3 }
0x211c   :  { %v5612_v40 = vpack.c.bf16 %v5608_v55, %v5606_v62  ;;  %v6230_v55 = vld [vmem:[%s9110_s18] ss:$0 sm:$0xff] }
0x211d   :  { %v7323_v14 = vpop.eup %7322  ;;  %v5613_v50 = vpack.c.bf16 %v5609_v35, %v5607_v43 }
0x211e   :  { %v7325_v18 = vpop.eup %7324  ;;  %v5604_v37 = vadd.f32 1.0, %v7323_v14 }
0x211f   :  { %5785 = vmatprep.mubr.bf16.mxu1 %v5613_v50  ;;  %v5605_v7 = vadd.f32 1.0, %v7325_v18 }
0x2120   :  { %5786 = vmatmul.mubr.bf16.vlgmr.msra.gmra.mrb[120].mxu1 %v5612_v40  ;;  %v5610_v26 = vmul.f32 %v5604_v37, %v5562_v57  ;;  %v6231_v40 = vld [vmem:[%s9111_s19] ss:$0 sm:$0xff] }
0x2121   :  { %v5611_v8 = vmul.f32 %v5605_v7, %v5563_v49 }
0x2122   :  { %v5614_v15 = vpack.c.bf16 %v5610_v26, %v5610_v26 }
0x2123   :  { %v5615_v11 = vpack.c.bf16 %v5611_v8, %v5611_v8 }
0x2125   :  { %5793 = vmatprep.mubr.bf16.mxu1 %v5615_v11 }
0x2128   :  { %5794 = vmatmul.mubr.bf16.gmra.mrb[124].mxu1 %v5614_v15 }
0x21f3   :  { %v6449_v42 = vpop.f32.mrb[120].mxu1 }
0x21f4   :  { %v6450_v1 = vpop.f32.mrb[121].mxu1 }
0x21f5   :  { %v6451_v51 = vadd.f32 %v6450_v1, %v6449_v42  ;;  %v6452_v4 = vpop.f32.mrb[122].mxu1 }
0x21f6   :  { %v6453_v56 = vpop.f32.mrb[123].mxu1 }
0x21f7   :  { %v5788_v63 = vadd.f32 %v6451_v51, %v6213_v24  ;;  %v6454_v44 = vadd.f32 %v6453_v56, %v6452_v4 }
0x21f9   :  { %v5791_v21 = vadd.f32 %v6454_v44, %v6213_v24  ;;  %v5801_v39 = vadd.f32 %v5788_v63, %v8950_v32 }
0x21fb   :  { %v6455_v20 = vpop.f32.mrb[124].mxu1  ;;  %v5806_v48 = vsel %vm381_vm2, %v5801_v39, 0.0  ;;  %v5802_v17 = vadd.f32 %v5791_v21, %v8956_v38 }
0x21fc   :  { %v6456_v47 = vpop.f32.mrb[125].mxu1  ;;  %5807 = vadd.xlane.f32.xlu0 %v5806_v48 }
0x21fd   :  { %v6457_v31 = vadd.f32 %v6456_v47, %v6455_v20  ;;  %v6458_v16 = vpop.f32.mrb[126].mxu1  ;;  %v5809_v54 = vsel %vm381_vm2, %v5802_v17, 0.0 }
0x21fe   :  { %v6459_v12 = vpop.f32.mrb[127].mxu1  ;;  %5810 = vadd.xlane.f32.xlu1 %v5809_v54 }
0x21ff   :  { %v5796_v28 = vadd.f32 %v6457_v31, %v6213_v24 }
0x2201   :  { %v5803_v45 = vadd.f32 %v5796_v28, %v8953_v23 }
0x2203   :  { %v5812_v25 = vsel %vm388_vm4, %v5803_v45, 0.0 }
0x2204   :  { %5813 = vadd.xlane.f32.xlu0 %v5812_v25 }
0x2289   :  { %v5808_v32 = vpop.xlane.xlu0 %5807 }
0x228a   :  { %v5815_v6 = vmul.f32 0.015625, %v5808_v32 }
0x228b   :  { %v5811_v59 = vpop.xlane.xlu1 %5810 }
0x228c   :  { %v5818_v46 = vsub.f32 %v5801_v39, %v5815_v6  ;;  %v5816_v29 = vmul.f32 0.015625, %v5811_v59 }
0x228e   :  { %v5819_v38 = vsub.f32 %v5802_v17, %v5816_v29  ;;  %v5821_v53 = vmul.f32 %v5818_v46, %v5818_v46 }
0x2290   :  { %v5824_v22 = vsel %vm381_vm2, %v5821_v53, 0.0  ;;  %v5822_v9 = vmul.f32 %v5819_v38, %v5819_v38 }
0x2291   :  { %5825 = vadd.xlane.f32.xlu1 %v5824_v22  ;;  %v5814_v27 = vpop.xlane.xlu0 %5813 }
0x2292   :  { %v5817_v33 = vmul.f32 0.015625, %v5814_v27  ;;  %v5827_v41 = vsel %vm381_vm2, %v5822_v9, 0.0 }
0x2293   :  { %5828 = vadd.xlane.f32.xlu0 %v5827_v41 }
0x2294   :  { %v5820_v23 = vsub.f32 %v5803_v45, %v5817_v33 }
0x2296   :  { %v5823_v30 = vmul.f32 %v5820_v23, %v5820_v23 }
0x2298   :  { %v5830_v36 = vsel %vm388_vm4, %v5823_v30, 0.0 }
0x2299   :  { %5831 = vadd.xlane.f32.xlu1 %v5830_v36 }
0x231e   :  { %v5826_v52 = vpop.xlane.xlu1 %5825 }
0x231f   :  { %v5833_v10 = vmul.f32 0.015625, %v5826_v52 }
0x2320   :  { %v5829_v2 = vpop.xlane.xlu0 %5828 }
0x2321   :  { %v5836_v34 = vadd.f32 1e-06, %v5833_v10  ;;  %v5834_v13 = vmul.f32 0.015625, %v5829_v2 }
0x2323   :  { %7326 = vrsqrt.f32 %v5836_v34  ;;  %v5837_v19 = vadd.f32 1e-06, %v5834_v13 }
0x2325   :  { %7328 = vrsqrt.f32 %v5837_v19 }
0x2326   :  { %v5832_v5 = vpop.xlane.xlu1 %5831 }
0x2327   :  { %v5835_v3 = vmul.f32 0.015625, %v5832_v5 }
0x2329   :  { %v5838_v58 = vadd.f32 1e-06, %v5835_v3 }
0x232b   :  { %7330 = vrsqrt.f32 %v5838_v58 }
0x232d   :  { %v7327_v62 = vpop.eup %7326 }
0x232e   :  { %v5842_v43 = vmul.f32 %v7327_v62, %v5818_v46 }
0x232f   :  { %v7329_v35 = vpop.eup %7328 }
0x2330   :  { %v5851_v14 = vmul.f32 %v6230_v55, %v5842_v43  ;;  %v5843_v50 = vmul.f32 %v7329_v35, %v5819_v38 }
0x2332   :  { %v5860_v18 = vadd.f32 %v6231_v40, %v5851_v14  ;;  %v5852_v37 = vmul.f32 %v6230_v55, %v5843_v50 }
0x2334   :  { %5866 = vrot.lane.b32.xlu0 %v5860_v18, %s7336_s26  ;;  %v5861_v49 = vadd.f32 %v6231_v40, %v5852_v37 }
0x2335   :  { %v7331_v7 = vpop.eup %7330 }
0x2336   :  { %5868 = vrot.lane.b32.xlu1 %v5861_v49, %s7336_s26  ;;  %v5844_v57 = vmul.f32 %v7331_v7, %v5820_v23 }
0x2338   :  { %v5853_v8 = vmul.f32 %v6230_v55, %v5844_v57 }
0x233a   :  { %v5862_v26 = vadd.f32 %v6231_v40, %v5853_v8 }
0x233c   :  { %5870 = vrot.lane.b32.xlu1 %v5862_v26, %s7336_s26 }
0x23a6   :  { %v5867_v11 = vpop.permute.xlu0 %5866 }
0x23a7   :  { %v5875_v15 = vsel %vm381_vm2, %v7572_v61, %v5867_v11 }
0x23a8   :  { %5878 = vst [vmem:[%s9112_s20] sm:$0xff] %v5875_v15  ;;  %v5869_v42 = vpop.permute.xlu1 %5868 }
0x23a9   :  { %v5876_v24 = vsel %vm381_vm2, %v7578_v0, %v5869_v42 }
0x23aa   :  { %5879 = vst [vmem:[%s9112_s20 + $0x8] sm:$0xff] %v5876_v24 }
0x23ae   :  { %v5871_v1 = vpop.permute.xlu1 %5870 }
0x23af   :  { %v5877_v51 = vsel %vm381_vm2, %v7569_v60, %v5871_v1 }
0x23b0   :  { %5880 = vst [vmem:[%s9112_s20 + $0x10] sm:$0x3] %v5877_v51 }

</bundles_post_ra>
